<compile_context>
chip_gen: v7x
topology: tpu7x:2x2x1
jax: 0.10.0
libtpu: 0.0.40
codegen_flags: <defaults>
</compile_context>

<pallas_src>
import jax
import jax.numpy as jnp
from jax.experimental import pallas as pl
from jax.experimental.pallas import tpu as pltpu

_CPAD = 128  # lane-padded conv output channel width
_VMEM_LIMIT = 32 * 1024 * 1024


# ----------------------------------------------------------------------------
# Pallas kernels
# ----------------------------------------------------------------------------
def _conv_relu_pool_kernel(p00_ref, p01_ref, p10_ref, p11_ref, w_ref, b_ref,
                           o_ref):
    """Fused conv (as 4 im2col matmuls) + bias + ReLU + 2x2 max-pool.

    p??: (TM, K) bf16 patches for the 4 positions inside each pool window.
    w:   (K, 128) bf16 (output channels zero-padded to 128 lanes).
    b:   (1, 128) f32.
    o:   (TM, 128) bf16 pooled activation.
    """
    w = w_ref[...]
    z00 = jnp.dot(p00_ref[...], w, preferred_element_type=jnp.float32)
    z01 = jnp.dot(p01_ref[...], w, preferred_element_type=jnp.float32)
    z10 = jnp.dot(p10_ref[...], w, preferred_element_type=jnp.float32)
    z11 = jnp.dot(p11_ref[...], w, preferred_element_type=jnp.float32)
    z = jnp.maximum(jnp.maximum(z00, z01), jnp.maximum(z10, z11))
    z = jnp.maximum(z + b_ref[...], 0.0)      # relu(max(.)+b) == max(relu(.+b))
    o_ref[...] = z.astype(o_ref.dtype)


def _fc_head_kernel(x_ref, w1_ref, b1_ref, w2_ref, b2_ref, w3_ref, b3_ref,
                    o_ref):
    """Fused fc1+ReLU -> fc2+ReLU -> fc3 -> log_softmax for one batch tile."""
    h = jnp.dot(x_ref[...], w1_ref[...],
                preferred_element_type=jnp.float32) + b1_ref[...]
    h = jnp.maximum(h, 0.0)
    h = jnp.dot(h, w2_ref[...],
                preferred_element_type=jnp.float32) + b2_ref[...]
    h = jnp.maximum(h, 0.0)
    z = jnp.dot(h, w3_ref[...],
                preferred_element_type=jnp.float32) + b3_ref[...]
    m = jnp.max(z, axis=-1, keepdims=True)
    zs = z - m
    lse = jnp.log(jnp.sum(jnp.exp(zs), axis=-1, keepdims=True))
    o_ref[...] = (zs - lse).astype(o_ref.dtype)


# ----------------------------------------------------------------------------
# pallas_call wrappers
# ----------------------------------------------------------------------------
def _compiler_params():
    return pltpu.CompilerParams(dimension_semantics=("parallel",),
                                vmem_limit_bytes=_VMEM_LIMIT)


def _conv_relu_pool(p00, p01, p10, p11, w, b, *, tile_m):
    M, K = p00.shape
    _, Nc = w.shape
    tm = min(tile_m, M)                      # tm == M or tm == tile_m (mult of 8)
    patch_spec = pl.BlockSpec((tm, K), lambda i: (i, 0))
    return pl.pallas_call(
        _conv_relu_pool_kernel,
        out_shape=jax.ShapeDtypeStruct((M, Nc), jnp.bfloat16),
        grid=(pl.cdiv(M, tm),),
        in_specs=[patch_spec, patch_spec, patch_spec, patch_spec,
                  pl.BlockSpec((K, Nc), lambda i: (0, 0)),
                  pl.BlockSpec((1, Nc), lambda i: (0, 0))],
        out_specs=pl.BlockSpec((tm, Nc), lambda i: (i, 0)),
        compiler_params=_compiler_params(),
    )(p00, p01, p10, p11, w, b)


def _fc_head(x, w1, b1, w2, b2, w3, b3, *, tile_m):
    M, K1 = x.shape
    H1 = w1.shape[1]
    H2 = w2.shape[1]
    NO = w3.shape[1]
    tm = min(tile_m, M)
    return pl.pallas_call(
        _fc_head_kernel,
        out_shape=jax.ShapeDtypeStruct((M, NO), jnp.float32),
        grid=(pl.cdiv(M, tm),),
        in_specs=[pl.BlockSpec((tm, K1), lambda i: (i, 0)),
                  pl.BlockSpec((K1, H1), lambda i: (0, 0)),
                  pl.BlockSpec((1, H1), lambda i: (0, 0)),
                  pl.BlockSpec((H1, H2), lambda i: (0, 0)),
                  pl.BlockSpec((1, H2), lambda i: (0, 0)),
                  pl.BlockSpec((H2, NO), lambda i: (0, 0)),
                  pl.BlockSpec((1, NO), lambda i: (0, 0))],
        out_specs=pl.BlockSpec((tm, NO), lambda i: (i, 0)),
        compiler_params=_compiler_params(),
    )(x, w1, b1, w2, b2, w3, b3)


# ----------------------------------------------------------------------------
# JAX glue (layout plumbing only; all compute stays in the kernels above)
# ----------------------------------------------------------------------------
def _pooled_patches(x_nhwc, kh, kw):
    """im2col split by 2x2-pool offset.

    Returns 4 patch matrices [(a,b) in {0,1}^2], each (N*Po*Qo, C*kh*kw) with
    column order c*kh*kw + di*kw + dj (matching torch's weight.reshape order),
    plus the pooled spatial dims.
    """
    N, H, W, C = x_nhwc.shape
    Ho, Wo = H - kh + 1, W - kw + 1
    Po, Qo = Ho // 2, Wo // 2
    mats = []
    for a in (0, 1):
        for b in (0, 1):
            taps = [x_nhwc[:, a + di: a + di + 2 * Po: 2,
                           b + dj: b + dj + 2 * Qo: 2, :]
                    for di in range(kh) for dj in range(kw)]
            p = jnp.stack(taps, axis=-1)               # (N,Po,Qo,C,kh*kw)
            mats.append(p.reshape(N * Po * Qo, C * kh * kw))
    return mats, (N, Po, Qo)


def init_params(key):
    """Deterministic synthetic parameters with PyTorch shapes."""
    ks = jax.random.split(key, 10)

    def uni(k, shape, fan_in):
        bound = 1.0 / jnp.sqrt(jnp.float32(fan_in))
        return jax.random.uniform(k, shape, jnp.float32, -bound, bound)

    return {
        "conv1_w": uni(ks[0], (30, 1, 5, 5), 1 * 5 * 5),
        "conv1_b": uni(ks[1], (30,), 1 * 5 * 5),
        "conv2_w": uni(ks[2], (15, 30, 3, 3), 30 * 3 * 3),
        "conv2_b": uni(ks[3], (15,), 30 * 3 * 3),
        "fc1_w": uni(ks[4], (128, 15 * 5 * 5), 15 * 5 * 5),
        "fc1_b": uni(ks[5], (128,), 15 * 5 * 5),
        "fc2_w": uni(ks[6], (50, 128), 128),
        "fc2_b": uni(ks[7], (50,), 128),
        "fc3_w": uni(ks[8], (10, 50), 50),
        "fc3_b": uni(ks[9], (10,), 50),
    }


def prepare_params(params):
    """One-time (outside the hot path) weight re-layout:
    transpose, zero-pad conv output channels to 128 lanes, fold the padding /
    NHWC flatten order into conv2 & fc1 weights, pre-transpose fc weights."""
    f32, bf16 = jnp.float32, jnp.bfloat16
    C1, C2, CP = 30, 15, _CPAD

    w1 = params["conv1_w"].reshape(C1, 25).T                       # (25,30)
    w1 = jnp.pad(w1, ((0, 0), (0, CP - C1))).astype(bf16)          # (25,128)
    b1 = jnp.pad(params["conv1_b"], (0, CP - C1)).reshape(1, CP).astype(f32)

    w2 = params["conv2_w"].reshape(C2, C1 * 9).T                   # (270,15)
    w2 = jnp.pad(w2, ((0, (CP - C1) * 9), (0, CP - C2))).astype(bf16)  # (1152,128)
    b2 = jnp.pad(params["conv2_b"], (0, CP - C2)).reshape(1, CP).astype(f32)

    # fc1: accept the NHWC-flattened, channel-padded (N, 5*5*128) activation.
    wf1 = params["fc1_w"].reshape(128, C2, 5, 5)                   # [out,c,h,w]
    wf1 = jnp.transpose(wf1, (2, 3, 1, 0))                         # [h,w,c,out]
    wf1 = jnp.pad(wf1, ((0, 0), (0, 0), (0, CP - C2), (0, 0)))     # (5,5,128,128)
    wf1 = wf1.reshape(5 * 5 * CP, 128).astype(bf16)                # (3200,128)
    bf1 = params["fc1_b"].reshape(1, 128).astype(f32)

    wf2 = params["fc2_w"].T.astype(f32)                            # (128,50)
    bf2 = params["fc2_b"].reshape(1, 50).astype(f32)
    wf3 = params["fc3_w"].T.astype(f32)                            # (50,10)
    bf3 = params["fc3_b"].reshape(1, 10).astype(f32)

    return {"w1": w1, "b1": b1, "w2": w2, "b2": b2,
            "fc1_w": wf1, "fc1_b": bf1, "fc2_w": wf2, "fc2_b": bf2,
            "fc3_w": wf3, "fc3_b": bf3}


@jax.jit
def model_forward(x_nchw, kp):
    N, _, H, W = x_nchw.shape
    # NCHW with C=1 has identical layout to NHWC -> pure reshape, then bf16.
    x = x_nchw.reshape(N, H, W, 1).astype(jnp.bfloat16)

    # conv1(5x5) + ReLU + maxpool(2), fused.   (dropout p=0.4 == identity)
    (p00, p01, p10, p11), (n, po, qo) = _pooled_patches(x, 5, 5)
    y = _conv_relu_pool(p00, p01, p10, p11, kp["w1"], kp["b1"], tile_m=1024)
    y = y.reshape(n, po, qo, _CPAD)                       # (N,12,12,128) bf16

    # conv2(3x3) + ReLU + maxpool(2), fused.   (dropout p=0.4 == identity)
    (p00, p01, p10, p11), (n, po, qo) = _pooled_patches(y, 3, 3)
    y = _conv_relu_pool(p00, p01, p10, p11, kp["w2"], kp["b2"], tile_m=512)
    y = y.reshape(N, po * qo * _CPAD)                     # (N, 3200) NHWC-flat

    # fc1+ReLU -> fc2+ReLU -> fc3 -> log_softmax, one fused kernel.
    return _fc_head(y, kp["fc1_w"], kp["fc1_b"], kp["fc2_w"], kp["fc2_b"],
                    kp["fc3_w"], kp["fc3_b"], tile_m=512)


if __name__ == "__main__":
    key = jax.random.PRNGKey(0)
    k_x, k_p = jax.random.split(key)
    # MNIST-shaped input implied by the fc1 dimension (15*5*5): (N,1,28,28)
    x = jax.random.normal(k_x, (2, 1, 28, 28), jnp.float32)
    params = init_params(k_p)
    kparams = prepare_params(params)

    out = model_forward(x, kparams)
    out = jax.block_until_ready(out)

    assert out.shape == (2, 10), out.shape
    # log_softmax rows must sum (in prob space) to ~1
    assert jnp.allclose(jnp.sum(jnp.exp(out), axis=1), 1.0, atol=1e-3)
    print("KERNEL_OK")
</pallas_src>

<mosaic_0001>
module attributes {stable_mosaic.version = 11 : i64} {
  func.func @_conv_relu_pool_kernel(%arg0: i32, %arg1: memref<288x25xbf16, #tpu.memory_space<vmem>>, %arg2: memref<288x25xbf16, #tpu.memory_space<vmem>>, %arg3: memref<288x25xbf16, #tpu.memory_space<vmem>>, %arg4: memref<288x25xbf16, #tpu.memory_space<vmem>>, %arg5: memref<25x128xbf16, #tpu.memory_space<vmem>>, %arg6: memref<1x128xf32, #tpu.memory_space<vmem>>, %arg7: memref<288x128xbf16, #tpu.memory_space<vmem>>) attributes {dimension_semantics = [#tpu.dimension_semantics<parallel>], iteration_bounds = array<i64: 1>, scalar_prefetch = 0 : i64, scratch_operands = 0 : i64, tpu.core_type = #tpu.core_type<tc>, window_params = [{transform_indices = @transform_0, window_bounds = array<i64: 288, 25>}, {transform_indices = @transform_1, window_bounds = array<i64: 288, 25>}, {transform_indices = @transform_2, window_bounds = array<i64: 288, 25>}, {transform_indices = @transform_3, window_bounds = array<i64: 288, 25>}, {pipeline_mode = #tpu.pipeline_mode<synchronous>, transform_indices = @transform_4, window_bounds = array<i64: 25, 128>}, {pipeline_mode = #tpu.pipeline_mode<synchronous>, transform_indices = @transform_5, window_bounds = array<i64: 1, 128>}, {transform_indices = @transform_6, window_bounds = array<i64: 288, 128>}]} {
    %c0 = arith.constant 0 : index
    %c0_0 = arith.constant 0 : index
    %0 = vector.load %arg5[%c0, %c0_0] : memref<25x128xbf16, #tpu.memory_space<vmem>>, vector<25x128xbf16>
    %c0_1 = arith.constant 0 : index
    %c0_2 = arith.constant 0 : index
    %1 = vector.load %arg1[%c0_1, %c0_2] : memref<288x25xbf16, #tpu.memory_space<vmem>>, vector<288x25xbf16>
    %cst = arith.constant dense<0.000000e+00> : vector<288x128xf32>
    %2 = tpu.matmul %1, %0, %cst {dimension_numbers = #tpu.dot_dimension_numbers<[1], [0], [0], [1], [0, 0, 1, 1], [], []>} : vector<288x25xbf16>, vector<25x128xbf16>, vector<288x128xf32> -> vector<288x128xf32>
    %c0_3 = arith.constant 0 : index
    %c0_4 = arith.constant 0 : index
    %3 = vector.load %arg2[%c0_3, %c0_4] : memref<288x25xbf16, #tpu.memory_space<vmem>>, vector<288x25xbf16>
    %cst_5 = arith.constant dense<0.000000e+00> : vector<288x128xf32>
    %4 = tpu.matmul %3, %0, %cst_5 {dimension_numbers = #tpu.dot_dimension_numbers<[1], [0], [0], [1], [0, 0, 1, 1], [], []>} : vector<288x25xbf16>, vector<25x128xbf16>, vector<288x128xf32> -> vector<288x128xf32>
    %c0_6 = arith.constant 0 : index
    %c0_7 = arith.constant 0 : index
    %5 = vector.load %arg3[%c0_6, %c0_7] : memref<288x25xbf16, #tpu.memory_space<vmem>>, vector<288x25xbf16>
    %cst_8 = arith.constant dense<0.000000e+00> : vector<288x128xf32>
    %6 = tpu.matmul %5, %0, %cst_8 {dimension_numbers = #tpu.dot_dimension_numbers<[1], [0], [0], [1], [0, 0, 1, 1], [], []>} : vector<288x25xbf16>, vector<25x128xbf16>, vector<288x128xf32> -> vector<288x128xf32>
    %c0_9 = arith.constant 0 : index
    %c0_10 = arith.constant 0 : index
    %7 = vector.load %arg4[%c0_9, %c0_10] : memref<288x25xbf16, #tpu.memory_space<vmem>>, vector<288x25xbf16>
    %cst_11 = arith.constant dense<0.000000e+00> : vector<288x128xf32>
    %8 = tpu.matmul %7, %0, %cst_11 {dimension_numbers = #tpu.dot_dimension_numbers<[1], [0], [0], [1], [0, 0, 1, 1], [], []>} : vector<288x25xbf16>, vector<25x128xbf16>, vector<288x128xf32> -> vector<288x128xf32>
    %9 = arith.maximumf %2, %4 : vector<288x128xf32>
    %10 = arith.maximumf %6, %8 : vector<288x128xf32>
    %11 = arith.maximumf %9, %10 : vector<288x128xf32>
    %c0_12 = arith.constant 0 : index
    %c0_13 = arith.constant 0 : index
    %12 = vector.load %arg6[%c0_12, %c0_13] : memref<1x128xf32, #tpu.memory_space<vmem>>, vector<1x128xf32>
    %13 = vector.broadcast %12 : vector<1x128xf32> to vector<288x128xf32>
    %14 = arith.addf %11, %13 : vector<288x128xf32>
    %cst_14 = arith.constant 0.000000e+00 : f32
    %15 = vector.broadcast %cst_14 : f32 to vector<288x128xf32>
    %16 = arith.maximumf %14, %15 : vector<288x128xf32>
    %17 = arith.truncf %16 : vector<288x128xf32> to vector<288x128xbf16>
    %c0_15 = arith.constant 0 : index
    %c0_16 = arith.constant 0 : index
    %18 = vector.load %arg7[%c0_15, %c0_16] : memref<288x128xbf16, #tpu.memory_space<vmem>>, vector<288x128xbf16>
    tpu.vector_store %arg7[%c0_15, %c0_16], %17 {strides = array<i32>} : memref<288x128xbf16, #tpu.memory_space<vmem>>, vector<288x128xbf16>,
    return
  }
  func.func @transform_0(%arg0: i32) -> (i32, i32) {
    %c0_i32 = arith.constant 0 : i32
    %c0_i32_0 = arith.constant 0 : i32
    return %arg0, %c0_i32 : i32, i32
  }
  func.func @transform_1(%arg0: i32) -> (i32, i32) {
    %c0_i32 = arith.constant 0 : i32
    %c0_i32_0 = arith.constant 0 : i32
    return %arg0, %c0_i32 : i32, i32
  }
  func.func @transform_2(%arg0: i32) -> (i32, i32) {
    %c0_i32 = arith.constant 0 : i32
    %c0_i32_0 = arith.constant 0 : i32
    return %arg0, %c0_i32 : i32, i32
  }
  func.func @transform_3(%arg0: i32) -> (i32, i32) {
    %c0_i32 = arith.constant 0 : i32
    %c0_i32_0 = arith.constant 0 : i32
    return %arg0, %c0_i32 : i32, i32
  }
  func.func @transform_4(%arg0: i32) -> (i32, i32) {
    %c0_i32 = arith.constant 0 : i32
    %c0_i32_0 = arith.constant 0 : i32
    %c0_i32_1 = arith.constant 0 : i32
    return %c0_i32, %c0_i32_0 : i32, i32
  }
  func.func @transform_5(%arg0: i32) -> (i32, i32) {
    %c0_i32 = arith.constant 0 : i32
    %c0_i32_0 = arith.constant 0 : i32
    %c0_i32_1 = arith.constant 0 : i32
    return %c0_i32, %c0_i32_0 : i32, i32
  }
  func.func @transform_6(%arg0: i32) -> (i32, i32) {
    %c0_i32 = arith.constant 0 : i32
    %c0_i32_0 = arith.constant 0 : i32
    return %arg0, %c0_i32 : i32, i32
  }
}

module attributes {stable_mosaic.version = 11 : i64} {
  func.func @_conv_relu_pool_kernel(%arg0: i32, %arg1: memref<50x1152xbf16, #tpu.memory_space<vmem>>, %arg2: memref<50x1152xbf16, #tpu.memory_space<vmem>>, %arg3: memref<50x1152xbf16, #tpu.memory_space<vmem>>, %arg4: memref<50x1152xbf16, #tpu.memory_space<vmem>>, %arg5: memref<1152x128xbf16, #tpu.memory_space<vmem>>, %arg6: memref<1x128xf32, #tpu.memory_space<vmem>>, %arg7: memref<50x128xbf16, #tpu.memory_space<vmem>>) attributes {dimension_semantics = [#tpu.dimension_semantics<parallel>], iteration_bounds = array<i64: 1>, scalar_prefetch = 0 : i64, scratch_operands = 0 : i64, tpu.core_type = #tpu.core_type<tc>, window_params = [{transform_indices = @transform_0, window_bounds = array<i64: 50, 1152>}, {transform_indices = @transform_1, window_bounds = array<i64: 50, 1152>}, {transform_indices = @transform_2, window_bounds = array<i64: 50, 1152>}, {transform_indices = @transform_3, window_bounds = array<i64: 50, 1152>}, {pipeline_mode = #tpu.pipeline_mode<synchronous>, transform_indices = @transform_4, window_bounds = array<i64: 1152, 128>}, {pipeline_mode = #tpu.pipeline_mode<synchronous>, transform_indices = @transform_5, window_bounds = array<i64: 1, 128>}, {transform_indices = @transform_6, window_bounds = array<i64: 50, 128>}]} {
    %c0 = arith.constant 0 : index
    %c0_0 = arith.constant 0 : index
    %0 = vector.load %arg5[%c0, %c0_0] : memref<1152x128xbf16, #tpu.memory_space<vmem>>, vector<1152x128xbf16>
    %c0_1 = arith.constant 0 : index
    %c0_2 = arith.constant 0 : index
    %1 = vector.load %arg1[%c0_1, %c0_2] : memref<50x1152xbf16, #tpu.memory_space<vmem>>, vector<50x1152xbf16>
    %cst = arith.constant dense<0.000000e+00> : vector<50x128xf32>
    %2 = tpu.matmul %1, %0, %cst {dimension_numbers = #tpu.dot_dimension_numbers<[1], [0], [0], [1], [0, 0, 1, 1], [], []>} : vector<50x1152xbf16>, vector<1152x128xbf16>, vector<50x128xf32> -> vector<50x128xf32>
    %c0_3 = arith.constant 0 : index
    %c0_4 = arith.constant 0 : index
    %3 = vector.load %arg2[%c0_3, %c0_4] : memref<50x1152xbf16, #tpu.memory_space<vmem>>, vector<50x1152xbf16>
    %cst_5 = arith.constant dense<0.000000e+00> : vector<50x128xf32>
    %4 = tpu.matmul %3, %0, %cst_5 {dimension_numbers = #tpu.dot_dimension_numbers<[1], [0], [0], [1], [0, 0, 1, 1], [], []>} : vector<50x1152xbf16>, vector<1152x128xbf16>, vector<50x128xf32> -> vector<50x128xf32>
    %c0_6 = arith.constant 0 : index
    %c0_7 = arith.constant 0 : index
    %5 = vector.load %arg3[%c0_6, %c0_7] : memref<50x1152xbf16, #tpu.memory_space<vmem>>, vector<50x1152xbf16>
    %cst_8 = arith.constant dense<0.000000e+00> : vector<50x128xf32>
    %6 = tpu.matmul %5, %0, %cst_8 {dimension_numbers = #tpu.dot_dimension_numbers<[1], [0], [0], [1], [0, 0, 1, 1], [], []>} : vector<50x1152xbf16>, vector<1152x128xbf16>, vector<50x128xf32> -> vector<50x128xf32>
    %c0_9 = arith.constant 0 : index
    %c0_10 = arith.constant 0 : index
    %7 = vector.load %arg4[%c0_9, %c0_10] : memref<50x1152xbf16, #tpu.memory_space<vmem>>, vector<50x1152xbf16>
    %cst_11 = arith.constant dense<0.000000e+00> : vector<50x128xf32>
    %8 = tpu.matmul %7, %0, %cst_11 {dimension_numbers = #tpu.dot_dimension_numbers<[1], [0], [0], [1], [0, 0, 1, 1], [], []>} : vector<50x1152xbf16>, vector<1152x128xbf16>, vector<50x128xf32> -> vector<50x128xf32>
    %9 = arith.maximumf %2, %4 : vector<50x128xf32>
    %10 = arith.maximumf %6, %8 : vector<50x128xf32>
    %11 = arith.maximumf %9, %10 : vector<50x128xf32>
    %c0_12 = arith.constant 0 : index
    %c0_13 = arith.constant 0 : index
    %12 = vector.load %arg6[%c0_12, %c0_13] : memref<1x128xf32, #tpu.memory_space<vmem>>, vector<1x128xf32>
    %13 = vector.broadcast %12 : vector<1x128xf32> to vector<50x128xf32>
    %14 = arith.addf %11, %13 : vector<50x128xf32>
    %cst_14 = arith.constant 0.000000e+00 : f32
    %15 = vector.broadcast %cst_14 : f32 to vector<50x128xf32>
    %16 = arith.maximumf %14, %15 : vector<50x128xf32>
    %17 = arith.truncf %16 : vector<50x128xf32> to vector<50x128xbf16>
    %c0_15 = arith.constant 0 : index
    %c0_16 = arith.constant 0 : index
    %18 = vector.load %arg7[%c0_15, %c0_16] : memref<50x128xbf16, #tpu.memory_space<vmem>>, vector<50x128xbf16>
    tpu.vector_store %arg7[%c0_15, %c0_16], %17 {strides = array<i32>} : memref<50x128xbf16, #tpu.memory_space<vmem>>, vector<50x128xbf16>,
    return
  }
  func.func @transform_0(%arg0: i32) -> (i32, i32) {
    %c0_i32 = arith.constant 0 : i32
    %c0_i32_0 = arith.constant 0 : i32
    return %arg0, %c0_i32 : i32, i32
  }
  func.func @transform_1(%arg0: i32) -> (i32, i32) {
    %c0_i32 = arith.constant 0 : i32
    %c0_i32_0 = arith.constant 0 : i32
    return %arg0, %c0_i32 : i32, i32
  }
  func.func @transform_2(%arg0: i32) -> (i32, i32) {
    %c0_i32 = arith.constant 0 : i32
    %c0_i32_0 = arith.constant 0 : i32
    return %arg0, %c0_i32 : i32, i32
  }
  func.func @transform_3(%arg0: i32) -> (i32, i32) {
    %c0_i32 = arith.constant 0 : i32
    %c0_i32_0 = arith.constant 0 : i32
    return %arg0, %c0_i32 : i32, i32
  }
  func.func @transform_4(%arg0: i32) -> (i32, i32) {
    %c0_i32 = arith.constant 0 : i32
    %c0_i32_0 = arith.constant 0 : i32
    %c0_i32_1 = arith.constant 0 : i32
    return %c0_i32, %c0_i32_0 : i32, i32
  }
  func.func @transform_5(%arg0: i32) -> (i32, i32) {
    %c0_i32 = arith.constant 0 : i32
    %c0_i32_0 = arith.constant 0 : i32
    %c0_i32_1 = arith.constant 0 : i32
    return %c0_i32, %c0_i32_0 : i32, i32
  }
  func.func @transform_6(%arg0: i32) -> (i32, i32) {
    %c0_i32 = arith.constant 0 : i32
    %c0_i32_0 = arith.constant 0 : i32
    return %arg0, %c0_i32 : i32, i32
  }
}

module attributes {stable_mosaic.version = 11 : i64} {
  func.func @_fc_head_kernel(%arg0: i32, %arg1: memref<2x3200xbf16, #tpu.memory_space<vmem>>, %arg2: memref<3200x128xbf16, #tpu.memory_space<vmem>>, %arg3: memref<1x128xf32, #tpu.memory_space<vmem>>, %arg4: memref<128x50xf32, #tpu.memory_space<vmem>>, %arg5: memref<1x50xf32, #tpu.memory_space<vmem>>, %arg6: memref<50x10xf32, #tpu.memory_space<vmem>>, %arg7: memref<1x10xf32, #tpu.memory_space<vmem>>, %arg8: memref<2x10xf32, #tpu.memory_space<vmem>>) attributes {dimension_semantics = [#tpu.dimension_semantics<parallel>], iteration_bounds = array<i64: 1>, scalar_prefetch = 0 : i64, scratch_operands = 0 : i64, tpu.core_type = #tpu.core_type<tc>, window_params = [{transform_indices = @transform_0, window_bounds = array<i64: 2, 3200>}, {pipeline_mode = #tpu.pipeline_mode<synchronous>, transform_indices = @transform_1, window_bounds = array<i64: 3200, 128>}, {pipeline_mode = #tpu.pipeline_mode<synchronous>, transform_indices = @transform_2, window_bounds = array<i64: 1, 128>}, {pipeline_mode = #tpu.pipeline_mode<synchronous>, transform_indices = @transform_3, window_bounds = array<i64: 128, 50>}, {pipeline_mode = #tpu.pipeline_mode<synchronous>, transform_indices = @transform_4, window_bounds = array<i64: 1, 50>}, {pipeline_mode = #tpu.pipeline_mode<synchronous>, transform_indices = @transform_5, window_bounds = array<i64: 50, 10>}, {pipeline_mode = #tpu.pipeline_mode<synchronous>, transform_indices = @transform_6, window_bounds = array<i64: 1, 10>}, {transform_indices = @transform_7, window_bounds = array<i64: 2, 10>}]} {
    %c0 = arith.constant 0 : index
    %c0_0 = arith.constant 0 : index
    %0 = vector.load %arg1[%c0, %c0_0] : memref<2x3200xbf16, #tpu.memory_space<vmem>>, vector<2x3200xbf16>
    %c0_1 = arith.constant 0 : index
    %c0_2 = arith.constant 0 : index
    %1 = vector.load %arg2[%c0_1, %c0_2] : memref<3200x128xbf16, #tpu.memory_space<vmem>>, vector<3200x128xbf16>
    %cst = arith.constant dense<0.000000e+00> : vector<2x128xf32>
    %2 = tpu.matmul %0, %1, %cst {dimension_numbers = #tpu.dot_dimension_numbers<[1], [0], [0], [1], [0, 0, 1, 1], [], []>} : vector<2x3200xbf16>, vector<3200x128xbf16>, vector<2x128xf32> -> vector<2x128xf32>
    %c0_3 = arith.constant 0 : index
    %c0_4 = arith.constant 0 : index
    %3 = vector.load %arg3[%c0_3, %c0_4] : memref<1x128xf32, #tpu.memory_space<vmem>>, vector<1x128xf32>
    %4 = vector.broadcast %3 : vector<1x128xf32> to vector<2x128xf32>
    %5 = arith.addf %2, %4 : vector<2x128xf32>
    %cst_5 = arith.constant 0.000000e+00 : f32
    %6 = vector.broadcast %cst_5 : f32 to vector<2x128xf32>
    %7 = arith.maximumf %5, %6 : vector<2x128xf32>
    %c0_6 = arith.constant 0 : index
    %c0_7 = arith.constant 0 : index
    %8 = vector.load %arg4[%c0_6, %c0_7] : memref<128x50xf32, #tpu.memory_space<vmem>>, vector<128x50xf32>
    %cst_8 = arith.constant dense<0.000000e+00> : vector<2x50xf32>
    %9 = tpu.matmul %7, %8, %cst_8 {dimension_numbers = #tpu.dot_dimension_numbers<[1], [0], [0], [1], [0, 0, 1, 1], [], []>} : vector<2x128xf32>, vector<128x50xf32>, vector<2x50xf32> -> vector<2x50xf32>
    %c0_9 = arith.constant 0 : index
    %c0_10 = arith.constant 0 : index
    %10 = vector.load %arg5[%c0_9, %c0_10] : memref<1x50xf32, #tpu.memory_space<vmem>>, vector<1x50xf32>
    %11 = vector.broadcast %10 : vector<1x50xf32> to vector<2x50xf32>
    %12 = arith.addf %9, %11 : vector<2x50xf32>
    %cst_11 = arith.constant 0.000000e+00 : f32
    %13 = vector.broadcast %cst_11 : f32 to vector<2x50xf32>
    %14 = arith.maximumf %12, %13 : vector<2x50xf32>
    %c0_12 = arith.constant 0 : index
    %c0_13 = arith.constant 0 : index
    %15 = vector.load %arg6[%c0_12, %c0_13] : memref<50x10xf32, #tpu.memory_space<vmem>>, vector<50x10xf32>
    %cst_14 = arith.constant dense<0.000000e+00> : vector<2x10xf32>
    %16 = tpu.matmul %14, %15, %cst_14 {dimension_numbers = #tpu.dot_dimension_numbers<[1], [0], [0], [1], [0, 0, 1, 1], [], []>} : vector<2x50xf32>, vector<50x10xf32>, vector<2x10xf32> -> vector<2x10xf32>
    %c0_15 = arith.constant 0 : index
    %c0_16 = arith.constant 0 : index
    %17 = vector.load %arg7[%c0_15, %c0_16] : memref<1x10xf32, #tpu.memory_space<vmem>>, vector<1x10xf32>
    %18 = vector.broadcast %17 : vector<1x10xf32> to vector<2x10xf32>
    %19 = arith.addf %16, %18 : vector<2x10xf32>
    %cst_17 = arith.constant dense<0xFF800000> : vector<2xf32>
    %20 = vector.multi_reduction <maximumf>, %19, %cst_17 [1] : vector<2x10xf32> to vector<2xf32>
    %21 = vector.shape_cast %20 : vector<2xf32> to vector<2x1xf32>
    %22 = vector.broadcast %21 : vector<2x1xf32> to vector<2x10xf32>
    %23 = arith.subf %19, %22 : vector<2x10xf32>
    %24 = math.exp %23 : vector<2x10xf32>
    %cst_18 = arith.constant dense<0.000000e+00> : vector<2xf32>
    %25 = vector.multi_reduction <add>, %24, %cst_18 [1] : vector<2x10xf32> to vector<2xf32>
    %26 = vector.shape_cast %25 : vector<2xf32> to vector<2x1xf32>
    %27 = math.log %26 : vector<2x1xf32>
    %28 = vector.broadcast %27 : vector<2x1xf32> to vector<2x10xf32>
    %29 = arith.subf %23, %28 : vector<2x10xf32>
    %c0_19 = arith.constant 0 : index
    %c0_20 = arith.constant 0 : index
    %30 = vector.load %arg8[%c0_19, %c0_20] : memref<2x10xf32, #tpu.memory_space<vmem>>, vector<2x10xf32>
    tpu.vector_store %arg8[%c0_19, %c0_20], %29 {strides = array<i32>} : memref<2x10xf32, #tpu.memory_space<vmem>>, vector<2x10xf32>,
    return
  }
  func.func @transform_0(%arg0: i32) -> (i32, i32) {
    %c0_i32 = arith.constant 0 : i32
    %c0_i32_0 = arith.constant 0 : i32
    return %arg0, %c0_i32 : i32, i32
  }
  func.func @transform_1(%arg0: i32) -> (i32, i32) {
    %c0_i32 = arith.constant 0 : i32
    %c0_i32_0 = arith.constant 0 : i32
    %c0_i32_1 = arith.constant 0 : i32
    return %c0_i32, %c0_i32_0 : i32, i32
  }
  func.func @transform_2(%arg0: i32) -> (i32, i32) {
    %c0_i32 = arith.constant 0 : i32
    %c0_i32_0 = arith.constant 0 : i32
    %c0_i32_1 = arith.constant 0 : i32
    return %c0_i32, %c0_i32_0 : i32, i32
  }
  func.func @transform_3(%arg0: i32) -> (i32, i32) {
    %c0_i32 = arith.constant 0 : i32
    %c0_i32_0 = arith.constant 0 : i32
    %c0_i32_1 = arith.constant 0 : i32
    return %c0_i32, %c0_i32_0 : i32, i32
  }
  func.func @transform_4(%arg0: i32) -> (i32, i32) {
    %c0_i32 = arith.constant 0 : i32
    %c0_i32_0 = arith.constant 0 : i32
    %c0_i32_1 = arith.constant 0 : i32
    return %c0_i32, %c0_i32_0 : i32, i32
  }
  func.func @transform_5(%arg0: i32) -> (i32, i32) {
    %c0_i32 = arith.constant 0 : i32
    %c0_i32_0 = arith.constant 0 : i32
    %c0_i32_1 = arith.constant 0 : i32
    return %c0_i32, %c0_i32_0 : i32, i32
  }
  func.func @transform_6(%arg0: i32) -> (i32, i32) {
    %c0_i32 = arith.constant 0 : i32
    %c0_i32_0 = arith.constant 0 : i32
    %c0_i32_1 = arith.constant 0 : i32
    return %c0_i32, %c0_i32_0 : i32, i32
  }
  func.func @transform_7(%arg0: i32) -> (i32, i32) {
    %c0_i32 = arith.constant 0 : i32
    %c0_i32_0 = arith.constant 0 : i32
    return %arg0, %c0_i32 : i32, i32
  }
}

</mosaic_0001>

<bundles_post_ra>
// kernel: model_forward.3
= control target key start
LH: loop header
LB: loop body
LE: loop exit
PB: predicated region body
PF: predicated region fallthrough
CT: control target
= control target key end

     0   :  { %vm220_vm0 = vcmask 1043456   ;;  %vm221_vm1 = vcmask 1044480   ;;  %vm165_vm2 = vcmask 203776   ;;  %v2487_v1 = vmov 65535   ;;  %s3236_s4 = inlined_call_operand.vmem [shape: bf16[25,128], index: 4, kind: input, shape index: {}]   ;;  %s3237_s0 = inlined_call_operand.vmem [shape: bf16[288,25], index: 0, kind: input, shape index: {}]   ;;  %s3238_s1 = inlined_call_operand.vmem [shape: bf16[288,25], index: 1, kind: input, shape index: {}]   ;;  %s3239_s2 = inlined_call_operand.vmem [shape: bf16[288,25], index: 2, kind: input, shape index: {}]   ;;  %s3240_s3 = inlined_call_operand.vmem [shape: bf16[288,25], index: 3, kind: input, shape index: {}]   ;;  %s3241_s5 = inlined_call_operand.vmem [shape: f32[1,128], index: 5, kind: input, shape index: {}]   ;;  %s3242_s6 = inlined_call_operand.vmem [shape: bf16[288,128], index: 6, kind: output, shape index: {}]  }
   0x1   :  { %v2413_v0 = vld [vmem:[%s3236_s4] sm:$0xff]   ;;  %v222_v2 = vsel %vm220_vm0, 4294967295, %v2487_v1  ;;  %v2414_v3 = vld [vmem:[%s3236_s4 + $0x8] sm:$0x1f]   ;;  %v2419_v10 = vld [vmem:[%s3237_s0 + $0x10] sm:$0xff]  }
   0x2   :  { %2252 = vmatprep.subr.bf16.mxu0 %v2413_v0  ;;  %2292 = vmatprep.subr.bf16.mxu1 %v2413_v0  ;;  %v223_v4 = vsel %vm221_vm1, %v222_v2, 0  ;;  %v2415_v5 = vld [vmem:[%s3237_s0] sm:$0xff]   ;;  %v2417_v8 = vld [vmem:[%s3237_s0 + $0x8] sm:$0xff]   ;;  %v2420_v11 = vld [vmem:[%s3238_s1 + $0x10] sm:$0xff]  }
   0x3   :  { %2253 = vmatpush3.bf16.msra.mxu0 %v2413_v0  ;;  %2293 = vmatpush3.bf16.msra.mxu1 %v2413_v0  ;;  %v225_v6 = vand.u32 %v2414_v3, %v223_v4  ;;  %v2416_v7 = vld [vmem:[%s3238_s1] sm:$0xff]   ;;  %v2418_v9 = vld [vmem:[%s3238_s1 + $0x8] sm:$0xff]   ;;  %v2421_v12 = vld [vmem:[%s3237_s0 + $0x18] sm:$0xff]  }
   0x4   :  { %2256 = vmatprep.mubr.msk.bf16.mxu0 %vm165_vm2, %v2415_v5  ;;  %2296 = vmatprep.mubr.msk.bf16.mxu1 %vm165_vm2, %v2416_v7  ;;  %v2422_v13 = vld [vmem:[%s3238_s1 + $0x18] sm:$0xff]   ;;  %v2423_v14 = vld [vmem:[%s3237_s0 + $0x20] sm:$0xff]   ;;  %v2425_v16 = vld [vmem:[%s3237_s0 + $0x28] sm:$0xff]  }
   0x5   :  { %2254 = vmatprep.subr.bf16.mxu0 %v225_v6  ;;  %2294 = vmatprep.subr.bf16.mxu1 %v225_v6  ;;  %v2424_v15 = vld [vmem:[%s3238_s1 + $0x20] sm:$0xff]   ;;  %v2426_v17 = vld [vmem:[%s3238_s1 + $0x28] sm:$0xff]   ;;  %v2427_v18 = vld [vmem:[%s3237_s0 + $0x30] sm:$0xff]  }
   0x6   :  { %v2428_v19 = vld [vmem:[%s3238_s1 + $0x30] sm:$0xff]   ;;  %v2429_v20 = vld [vmem:[%s3237_s0 + $0x38] sm:$0xff]   ;;  %v2431_v22 = vld [vmem:[%s3237_s0 + $0x40] sm:$0xff]  }
   0x7   :  { %2255 = vmatpush3.bf16.msra.mxu0 %v225_v6  ;;  %2295 = vmatpush3.bf16.msra.mxu1 %v225_v6  ;;  %v2430_v21 = vld [vmem:[%s3238_s1 + $0x38] sm:$0xff]   ;;  %v2432_v23 = vld [vmem:[%s3238_s1 + $0x40] sm:$0xff]   ;;  %v2433_v24 = vld [vmem:[%s3237_s0 + $0x48] sm:$0xff]  }
   0x8   :  { %2332 = vmatprep.subr.bf16.mxu0 %v2413_v0  ;;  %2372 = vmatprep.subr.bf16.mxu1 %v2413_v0  ;;  %v2434_v25 = vld [vmem:[%s3238_s1 + $0x48] sm:$0xff]   ;;  %v2435_v26 = vld [vmem:[%s3237_s0 + $0x50] sm:$0xff]   ;;  %v2437_v28 = vld [vmem:[%s3237_s0 + $0x58] sm:$0xff]  }
   0x9   :  { %v2436_v27 = vld [vmem:[%s3238_s1 + $0x50] sm:$0xff]   ;;  %v2438_v29 = vld [vmem:[%s3238_s1 + $0x58] sm:$0xff]   ;;  %v2439_v30 = vld [vmem:[%s3237_s0 + $0x60] sm:$0xff]  }
   0xa   :  { %2257 = vmatmul.mubr.msk.bf16.vlgmr.msra.gmra.mrb[0].mxu0 %vm165_vm2, %v2417_v8  ;;  %2297 = vmatmul.mubr.msk.bf16.vlgmr.msra.gmra.mrb[0].mxu1 %vm165_vm2, %v2418_v9  ;;  %v2440_v31 = vld [vmem:[%s3238_s1 + $0x60] sm:$0xff]   ;;  %v2441_v32 = vld [vmem:[%s3237_s0 + $0x68] sm:$0xff]   ;;  %v2443_v34 = vld [vmem:[%s3237_s0 + $0x70] sm:$0xff]  }
   0xb   :  { %2333 = vmatpush3.bf16.msra.mxu0 %v2413_v0  ;;  %2373 = vmatpush3.bf16.msra.mxu1 %v2413_v0  ;;  %v2442_v33 = vld [vmem:[%s3238_s1 + $0x68] sm:$0xff]   ;;  %v2444_v35 = vld [vmem:[%s3238_s1 + $0x70] sm:$0xff]   ;;  %v2445_v36 = vld [vmem:[%s3237_s0 + $0x78] sm:$0xff]  }
   0xc   :  { %2260 = vmatprep.mubr.msk.bf16.mxu0 %vm165_vm2, %v2419_v10  ;;  %2300 = vmatprep.mubr.msk.bf16.mxu1 %vm165_vm2, %v2420_v11  ;;  %v2446_v37 = vld [vmem:[%s3238_s1 + $0x78] sm:$0xff]   ;;  %v2447_v38 = vld [vmem:[%s3237_s0 + $0x80] sm:$0xff]   ;;  %v2449_v40 = vld [vmem:[%s3237_s0 + $0x88] sm:$0xff]  }
   0xd   :  { %2334 = vmatprep.subr.bf16.mxu0 %v225_v6  ;;  %2374 = vmatprep.subr.bf16.mxu1 %v225_v6  ;;  %v2448_v39 = vld [vmem:[%s3238_s1 + $0x80] sm:$0xff]   ;;  %v2450_v41 = vld [vmem:[%s3238_s1 + $0x88] sm:$0xff]   ;;  %v2455_v46 = vld [vmem:[%s3239_s2 + $0x10] sm:$0xff]  }
   0xe   :  { %v2451_v42 = vld [vmem:[%s3239_s2] sm:$0xff]   ;;  %v2453_v44 = vld [vmem:[%s3239_s2 + $0x8] sm:$0xff]   ;;  %v2456_v47 = vld [vmem:[%s3240_s3 + $0x10] sm:$0xff]  }
   0xf   :  { %2335 = vmatpush3.bf16.msra.mxu0 %v225_v6  ;;  %2375 = vmatpush3.bf16.msra.mxu1 %v225_v6  ;;  %v2452_v43 = vld [vmem:[%s3240_s3] sm:$0xff]   ;;  %v2454_v45 = vld [vmem:[%s3240_s3 + $0x8] sm:$0xff]   ;;  %v2457_v48 = vld [vmem:[%s3239_s2 + $0x18] sm:$0xff]  }
  0x10   :  { %v2458_v49 = vld [vmem:[%s3240_s3 + $0x18] sm:$0xff]   ;;  %v2459_v50 = vld [vmem:[%s3239_s2 + $0x20] sm:$0xff]   ;;  %v2461_v52 = vld [vmem:[%s3239_s2 + $0x28] sm:$0xff]  }
  0x11   :  { %v2460_v51 = vld [vmem:[%s3240_s3 + $0x20] sm:$0xff]   ;;  %v2462_v53 = vld [vmem:[%s3240_s3 + $0x28] sm:$0xff]   ;;  %v2463_v54 = vld [vmem:[%s3239_s2 + $0x30] sm:$0xff]  }
  0x12   :  { %2261 = vmatmul.mubr.msk.bf16.gmra.mrb[4].mxu0 %vm165_vm2, %v2421_v12  ;;  %2301 = vmatmul.mubr.msk.bf16.gmra.mrb[4].mxu1 %vm165_vm2, %v2422_v13  ;;  %v2464_v55 = vld [vmem:[%s3240_s3 + $0x30] sm:$0xff]   ;;  %v2465_v56 = vld [vmem:[%s3239_s2 + $0x38] sm:$0xff]   ;;  %v2467_v58 = vld [vmem:[%s3239_s2 + $0x40] sm:$0xff]  }
  0x13   :  { %2264 = vmatprep.mubr.msk.bf16.mxu0 %vm165_vm2, %v2423_v14  ;;  %2304 = vmatprep.mubr.msk.bf16.mxu1 %vm165_vm2, %v2424_v15  ;;  %v2466_v57 = vld [vmem:[%s3240_s3 + $0x38] sm:$0xff]   ;;  %v2468_v59 = vld [vmem:[%s3240_s3 + $0x40] sm:$0xff]   ;;  %v2469_v60 = vld [vmem:[%s3239_s2 + $0x48] sm:$0xff]  }
  0x14   :  { %v2470_v61 = vld [vmem:[%s3240_s3 + $0x48] sm:$0xff]   ;;  %v2471_v62 = vld [vmem:[%s3239_s2 + $0x50] sm:$0xff]   ;;  %v2473_v0 = vld [vmem:[%s3239_s2 + $0x58] sm:$0xff]  }
  0x15   :  { %v2472_v63 = vld [vmem:[%s3240_s3 + $0x50] sm:$0xff]   ;;  %v2474_v1 = vld [vmem:[%s3240_s3 + $0x58] sm:$0xff]   ;;  %v2475_v2 = vld [vmem:[%s3239_s2 + $0x60] sm:$0xff]  }
  0x16   :  { %v2476_v3 = vld [vmem:[%s3240_s3 + $0x60] sm:$0xff]   ;;  %v2477_v4 = vld [vmem:[%s3239_s2 + $0x68] sm:$0xff]   ;;  %v2479_v6 = vld [vmem:[%s3239_s2 + $0x70] sm:$0xff]  }
  0x17   :  { %v2478_v5 = vld [vmem:[%s3240_s3 + $0x68] sm:$0xff]   ;;  %v2480_v7 = vld [vmem:[%s3240_s3 + $0x70] sm:$0xff]   ;;  %v2481_v8 = vld [vmem:[%s3239_s2 + $0x78] sm:$0xff]  }
  0x18   :  { %v2482_v9 = vld [vmem:[%s3240_s3 + $0x78] sm:$0xff]   ;;  %v2483_v10 = vld [vmem:[%s3239_s2 + $0x80] sm:$0xff]   ;;  %v2485_v12 = vld [vmem:[%s3239_s2 + $0x88] sm:$0xff]  }
  0x19   :  { %v2484_v11 = vld [vmem:[%s3240_s3 + $0x80] sm:$0xff]   ;;  %v2486_v13 = vld [vmem:[%s3240_s3 + $0x88] sm:$0xff]  }
  0x1a   :  { %2265 = vmatmul.mubr.msk.bf16.gmra.mrb[8].mxu0 %vm165_vm2, %v2425_v16  ;;  %2305 = vmatmul.mubr.msk.bf16.gmra.mrb[8].mxu1 %vm165_vm2, %v2426_v17 }
  0x1b   :  { %2268 = vmatprep.mubr.msk.bf16.mxu0 %vm165_vm2, %v2427_v18  ;;  %2308 = vmatprep.mubr.msk.bf16.mxu1 %vm165_vm2, %v2428_v19 }
  0x22   :  { %2269 = vmatmul.mubr.msk.bf16.gmra.mrb[12].mxu0 %vm165_vm2, %v2429_v20  ;;  %2309 = vmatmul.mubr.msk.bf16.gmra.mrb[12].mxu1 %vm165_vm2, %v2430_v21 }
  0x23   :  { %2272 = vmatprep.mubr.msk.bf16.mxu0 %vm165_vm2, %v2431_v22  ;;  %2312 = vmatprep.mubr.msk.bf16.mxu1 %vm165_vm2, %v2432_v23 }
  0x2a   :  { %2273 = vmatmul.mubr.msk.bf16.gmra.mrb[16].mxu0 %vm165_vm2, %v2433_v24  ;;  %2313 = vmatmul.mubr.msk.bf16.gmra.mrb[16].mxu1 %vm165_vm2, %v2434_v25 }
  0x2b   :  { %2276 = vmatprep.mubr.msk.bf16.mxu0 %vm165_vm2, %v2435_v26  ;;  %2316 = vmatprep.mubr.msk.bf16.mxu1 %vm165_vm2, %v2436_v27 }
  0x32   :  { %2277 = vmatmul.mubr.msk.bf16.gmra.mrb[20].mxu0 %vm165_vm2, %v2437_v28  ;;  %2317 = vmatmul.mubr.msk.bf16.gmra.mrb[20].mxu1 %vm165_vm2, %v2438_v29 }
  0x33   :  { %2280 = vmatprep.mubr.msk.bf16.mxu0 %vm165_vm2, %v2439_v30  ;;  %2320 = vmatprep.mubr.msk.bf16.mxu1 %vm165_vm2, %v2440_v31 }
  0x3a   :  { %2281 = vmatmul.mubr.msk.bf16.gmra.mrb[24].mxu0 %vm165_vm2, %v2441_v32  ;;  %2321 = vmatmul.mubr.msk.bf16.gmra.mrb[24].mxu1 %vm165_vm2, %v2442_v33 }
  0x3b   :  { %2284 = vmatprep.mubr.msk.bf16.mxu0 %vm165_vm2, %v2443_v34  ;;  %2324 = vmatprep.mubr.msk.bf16.mxu1 %vm165_vm2, %v2444_v35 }
  0x42   :  { %2285 = vmatmul.mubr.msk.bf16.gmra.mrb[28].mxu0 %vm165_vm2, %v2445_v36  ;;  %2325 = vmatmul.mubr.msk.bf16.gmra.mrb[28].mxu1 %vm165_vm2, %v2446_v37 }
  0x43   :  { %2288 = vmatprep.mubr.msk.bf16.mxu0 %vm165_vm2, %v2447_v38  ;;  %2328 = vmatprep.mubr.msk.bf16.mxu1 %vm165_vm2, %v2448_v39 }
  0x4a   :  { %2289 = vmatmul.mubr.msk.bf16.gmra.mrb[32].mxu0 %vm165_vm2, %v2449_v40  ;;  %2329 = vmatmul.mubr.msk.bf16.gmra.mrb[32].mxu1 %vm165_vm2, %v2450_v41 }
  0x4b   :  { %2336 = vmatprep.mubr.msk.bf16.mxu0 %vm165_vm2, %v2451_v42  ;;  %2376 = vmatprep.mubr.msk.bf16.mxu1 %vm165_vm2, %v2452_v43 }
  0x52   :  { %2337 = vmatmul.mubr.msk.bf16.vlgmr.msra.gmra.mrb[36].mxu0 %vm165_vm2, %v2453_v44  ;;  %2377 = vmatmul.mubr.msk.bf16.vlgmr.msra.gmra.mrb[36].mxu1 %vm165_vm2, %v2454_v45 }
  0x53   :  { %2340 = vmatprep.mubr.msk.bf16.mxu0 %vm165_vm2, %v2455_v46  ;;  %2380 = vmatprep.mubr.msk.bf16.mxu1 %vm165_vm2, %v2456_v47 }
  0x5a   :  { %2341 = vmatmul.mubr.msk.bf16.gmra.mrb[40].mxu0 %vm165_vm2, %v2457_v48  ;;  %2381 = vmatmul.mubr.msk.bf16.gmra.mrb[40].mxu1 %vm165_vm2, %v2458_v49 }
  0x5b   :  { %2344 = vmatprep.mubr.msk.bf16.mxu0 %vm165_vm2, %v2459_v50  ;;  %2384 = vmatprep.mubr.msk.bf16.mxu1 %vm165_vm2, %v2460_v51 }
  0x62   :  { %2345 = vmatmul.mubr.msk.bf16.gmra.mrb[44].mxu0 %vm165_vm2, %v2461_v52  ;;  %2385 = vmatmul.mubr.msk.bf16.gmra.mrb[44].mxu1 %vm165_vm2, %v2462_v53 }
  0x63   :  { %2348 = vmatprep.mubr.msk.bf16.mxu0 %vm165_vm2, %v2463_v54  ;;  %2388 = vmatprep.mubr.msk.bf16.mxu1 %vm165_vm2, %v2464_v55 }
  0x6a   :  { %2349 = vmatmul.mubr.msk.bf16.gmra.mrb[48].mxu0 %vm165_vm2, %v2465_v56  ;;  %2389 = vmatmul.mubr.msk.bf16.gmra.mrb[48].mxu1 %vm165_vm2, %v2466_v57 }
  0x6b   :  { %2352 = vmatprep.mubr.msk.bf16.mxu0 %vm165_vm2, %v2467_v58  ;;  %2392 = vmatprep.mubr.msk.bf16.mxu1 %vm165_vm2, %v2468_v59 }
  0x72   :  { %2353 = vmatmul.mubr.msk.bf16.gmra.mrb[52].mxu0 %vm165_vm2, %v2469_v60  ;;  %2393 = vmatmul.mubr.msk.bf16.gmra.mrb[52].mxu1 %vm165_vm2, %v2470_v61 }
  0x73   :  { %2356 = vmatprep.mubr.msk.bf16.mxu0 %vm165_vm2, %v2471_v62  ;;  %2396 = vmatprep.mubr.msk.bf16.mxu1 %vm165_vm2, %v2472_v63 }
  0x7a   :  { %2357 = vmatmul.mubr.msk.bf16.gmra.mrb[56].mxu0 %vm165_vm2, %v2473_v0  ;;  %2397 = vmatmul.mubr.msk.bf16.gmra.mrb[56].mxu1 %vm165_vm2, %v2474_v1 }
  0x7b   :  { %2360 = vmatprep.mubr.msk.bf16.mxu0 %vm165_vm2, %v2475_v2  ;;  %2400 = vmatprep.mubr.msk.bf16.mxu1 %vm165_vm2, %v2476_v3 }
  0x82   :  { %2361 = vmatmul.mubr.msk.bf16.gmra.mrb[60].mxu0 %vm165_vm2, %v2477_v4  ;;  %2401 = vmatmul.mubr.msk.bf16.gmra.mrb[60].mxu1 %vm165_vm2, %v2478_v5 }
  0x83   :  { %2364 = vmatprep.mubr.msk.bf16.mxu0 %vm165_vm2, %v2479_v6  ;;  %2404 = vmatprep.mubr.msk.bf16.mxu1 %vm165_vm2, %v2480_v7  ;;  %v3036_v6 = vld [vmem:[%s3241_s5] ss:$0 sm:$0xff] }
  0x8a   :  { %2365 = vmatmul.mubr.msk.bf16.gmra.mrb[64].mxu0 %vm165_vm2, %v2481_v8  ;;  %2405 = vmatmul.mubr.msk.bf16.gmra.mrb[64].mxu1 %vm165_vm2, %v2482_v9 }
  0x8b   :  { %2368 = vmatprep.mubr.msk.bf16.mxu0 %vm165_vm2, %v2483_v10  ;;  %2408 = vmatprep.mubr.msk.bf16.mxu1 %vm165_vm2, %v2484_v11 }
  0x92   :  { %2369 = vmatmul.mubr.msk.bf16.gmra.mrb[68].mxu0 %vm165_vm2, %v2485_v12  ;;  %2409 = vmatmul.mubr.msk.bf16.gmra.mrb[68].mxu1 %vm165_vm2, %v2486_v13 }
  0xdd   :  { %v2817_v14 = vpop.f32.mrb[0].mxu0  ;;  %v2819_v15 = vpop.f32.mrb[0].mxu1 }
  0xde   :  { %v2823_v17 = vpop.f32.mrb[1].mxu0  ;;  %v2825_v18 = vpop.f32.mrb[1].mxu1 }
  0xdf   :  { %v2829_v20 = vpop.f32.mrb[2].mxu0  ;;  %v2831_v21 = vpop.f32.mrb[2].mxu1 }
  0xe0   :  { %v2835_v23 = vpop.f32.mrb[3].mxu0  ;;  %v2837_v24 = vpop.f32.mrb[3].mxu1 }
  0xe5   :  { %v2841_v26 = vpop.f32.mrb[4].mxu0  ;;  %v2843_v27 = vpop.f32.mrb[4].mxu1 }
  0xe6   :  { %v2847_v29 = vpop.f32.mrb[5].mxu0  ;;  %v2849_v30 = vpop.f32.mrb[5].mxu1 }
  0xe7   :  { %v2853_v32 = vpop.f32.mrb[6].mxu0  ;;  %v2855_v33 = vpop.f32.mrb[6].mxu1 }
  0xe8   :  { %v2859_v35 = vpop.f32.mrb[7].mxu0  ;;  %v2861_v36 = vpop.f32.mrb[7].mxu1 }
  0xed   :  { %v2865_v38 = vpop.f32.mrb[8].mxu0  ;;  %v2867_v39 = vpop.f32.mrb[8].mxu1 }
  0xee   :  { %v2871_v41 = vpop.f32.mrb[9].mxu0  ;;  %v2873_v42 = vpop.f32.mrb[9].mxu1 }
  0xef   :  { %v2877_v44 = vpop.f32.mrb[10].mxu0  ;;  %v2879_v45 = vpop.f32.mrb[10].mxu1 }
  0xf0   :  { %v2883_v47 = vpop.f32.mrb[11].mxu0  ;;  %v2885_v48 = vpop.f32.mrb[11].mxu1 }
  0xf5   :  { %v2889_v50 = vpop.f32.mrb[12].mxu0  ;;  %v2891_v51 = vpop.f32.mrb[12].mxu1 }
  0xf6   :  { %v2895_v53 = vpop.f32.mrb[13].mxu0  ;;  %v2897_v54 = vpop.f32.mrb[13].mxu1 }
  0xf7   :  { %v2901_v56 = vpop.f32.mrb[14].mxu0  ;;  %v2903_v57 = vpop.f32.mrb[14].mxu1 }
  0xf8   :  { %v2907_v59 = vpop.f32.mrb[15].mxu0  ;;  %v2909_v60 = vpop.f32.mrb[15].mxu1 }
  0xfd   :  { %v2913_v62 = vpop.f32.mrb[16].mxu0  ;;  %v2915_v63 = vpop.f32.mrb[16].mxu1 }
  0xfe   :  { %v2919_v1 = vpop.f32.mrb[17].mxu0  ;;  %v2921_v2 = vpop.f32.mrb[17].mxu1 }
  0xff   :  { %v2925_v4 = vpop.f32.mrb[18].mxu0  ;;  %v2927_v5 = vpop.f32.mrb[18].mxu1 }
 0x100   :  { %v2931_v7 = vpop.f32.mrb[19].mxu0  ;;  %v2933_v8 = vpop.f32.mrb[19].mxu1 }
 0x105   :  { %v2937_v10 = vpop.f32.mrb[20].mxu0  ;;  %v2939_v11 = vpop.f32.mrb[20].mxu1 }
 0x106   :  { %v2943_v13 = vpop.f32.mrb[21].mxu0  ;;  %v2945_v3 = vpop.f32.mrb[21].mxu1 }
 0x107   :  { %v2949_v0 = vpop.f32.mrb[22].mxu0  ;;  %v2951_v61 = vpop.f32.mrb[22].mxu1 }
 0x108   :  { %v2955_v58 = vpop.f32.mrb[23].mxu0  ;;  %v2957_v55 = vpop.f32.mrb[23].mxu1 }
 0x109   :  { %3268 = vst [vmem:[#allocation2_spill] sm:$0xff] %v2957_v55  ;;  %v3295_v55 = vmax.f32 %v2829_v20, %v2831_v21 }
 0x10d   :  { %v2961_v52 = vpop.f32.mrb[24].mxu0  ;;  %v2963_v49 = vpop.f32.mrb[24].mxu1 }
 0x10e   :  { %3269 = vst [vmem:[#allocation3_spill] sm:$0xff] %v2961_v52  ;;  %3270 = vst [vmem:[#allocation4_spill] sm:$0xff] %v2963_v49  ;;  %v2967_v46 = vpop.f32.mrb[25].mxu0  ;;  %v2969_v43 = vpop.f32.mrb[25].mxu1 }
 0x10f   :  { %3271 = vst [vmem:[#allocation5_spill] sm:$0xff] %v2967_v46  ;;  %3272 = vst [vmem:[#allocation6_spill] sm:$0xff] %v2969_v43  ;;  %v2973_v40 = vpop.f32.mrb[26].mxu0  ;;  %v2975_v37 = vpop.f32.mrb[26].mxu1 }
 0x110   :  { %3273 = vst [vmem:[#allocation7_spill] sm:$0xff] %v2973_v40  ;;  %3274 = vst [vmem:[#allocation8_spill] sm:$0xff] %v2975_v37  ;;  %v2979_v34 = vpop.f32.mrb[27].mxu0  ;;  %v2981_v31 = vpop.f32.mrb[27].mxu1 }
 0x111   :  { %3275 = vst [vmem:[#allocation9_spill] sm:$0xff] %v2979_v34  ;;  %3276 = vst [vmem:[#allocation10_spill] sm:$0xff] %v2981_v31 }
 0x115   :  { %v2985_v28 = vpop.f32.mrb[28].mxu0  ;;  %v2987_v25 = vpop.f32.mrb[28].mxu1 }
 0x116   :  { %3277 = vst [vmem:[#allocation11_spill] sm:$0xff] %v2985_v28  ;;  %3278 = vst [vmem:[#allocation12_spill] sm:$0xff] %v2987_v25  ;;  %v2991_v22 = vpop.f32.mrb[29].mxu0  ;;  %v2993_v19 = vpop.f32.mrb[29].mxu1 }
 0x117   :  { %3279 = vst [vmem:[#allocation13_spill] sm:$0xff] %v2991_v22  ;;  %3280 = vst [vmem:[#allocation14_spill] sm:$0xff] %v2993_v19  ;;  %v2997_v16 = vpop.f32.mrb[30].mxu0  ;;  %v2999_v37 = vpop.f32.mrb[30].mxu1 }
 0x118   :  { %3281 = vst [vmem:[#allocation15_spill] sm:$0xff] %v2997_v16  ;;  %3282 = vst [vmem:[#allocation16_spill] sm:$0xff] %v2999_v37  ;;  %v3003_v31 = vpop.f32.mrb[31].mxu0  ;;  %v3005_v34 = vpop.f32.mrb[31].mxu1 }
 0x119   :  { %3283 = vst [vmem:[#allocation17_spill] sm:$0xff] %v3003_v31  ;;  %3284 = vst [vmem:[#allocation18_spill] sm:$0xff] %v3005_v34 }
 0x11d   :  { %v3009_v25 = vpop.f32.mrb[32].mxu0  ;;  %v3011_v28 = vpop.f32.mrb[32].mxu1 }
 0x11e   :  { %3285 = vst [vmem:[#allocation19_spill] sm:$0xff] %v3009_v25  ;;  %3286 = vst [vmem:[#allocation20_spill] sm:$0xff] %v3011_v28  ;;  %v3015_v19 = vpop.f32.mrb[33].mxu0  ;;  %v3017_v22 = vpop.f32.mrb[33].mxu1 }
 0x11f   :  { %3287 = vst [vmem:[#allocation21_spill] sm:$0xff] %v3015_v19  ;;  %3288 = vst [vmem:[#allocation22_spill] sm:$0xff] %v3017_v22  ;;  %v3021_v37 = vpop.f32.mrb[34].mxu0  ;;  %v3023_v16 = vpop.f32.mrb[34].mxu1 }
 0x120   :  { %3289 = vst [vmem:[#allocation23_spill] sm:$0xff] %v3021_v37  ;;  %3290 = vst [vmem:[#allocation24_spill] sm:$0xff] %v3023_v16  ;;  %v3027_v34 = vpop.f32.mrb[35].mxu0  ;;  %v3029_v31 = vpop.f32.mrb[35].mxu1  ;;  %v3293_v16 = vmax.f32 %v2817_v14, %v2819_v15  ;;  %v3296_v14 = vmax.f32 %v2835_v23, %v2837_v24  ;;  %v3297_v23 = vmax.f32 %v2841_v26, %v2843_v27 }
 0x121   :  { %3291 = vst [vmem:[#allocation25_spill] sm:$0xff] %v3027_v34  ;;  %3292 = vst [vmem:[#allocation26_spill] sm:$0xff] %v3029_v31 }
 0x125   :  { %v2338_v28 = vpop.f32.mrb[36].mxu0  ;;  %v2378_v25 = vpop.f32.mrb[36].mxu1 }
 0x126   :  { %v1513_v40 = vmax.f32 %v2338_v28, %v2378_v25  ;;  %v975_v43 = vpop.f32.mrb[37].mxu0  ;;  %v1332_v46 = vpop.f32.mrb[37].mxu1  ;;  %v3294_v25 = vmax.f32 %v2823_v17, %v2825_v18 }
 0x127   :  { %v1511_v22 = vmax.f32 %v975_v43, %v1332_v46  ;;  %v2339_v19 = vpop.f32.mrb[38].mxu0  ;;  %v2379_v9 = vpop.f32.mrb[38].mxu1 }
 0x128   :  { %v1549_v37 = vmax.f32 %v3293_v16, %v1513_v40  ;;  %v1514_v49 = vmax.f32 %v2339_v19, %v2379_v9  ;;  %v978_v52 = vpop.f32.mrb[39].mxu0  ;;  %v1335_v12 = vpop.f32.mrb[39].mxu1 }
 0x129   :  { %v1547_v28 = vmax.f32 %v3294_v25, %v1511_v22  ;;  %v1512_v31 = vmax.f32 %v978_v52, %v1335_v12 }
 0x12a   :  { %v1592_v34 = vadd.f32 %v3036_v6, %v1549_v37  ;;  %v1550_v43 = vmax.f32 %v3295_v55, %v1514_v49 }
 0x12b   :  { %v1590_v46 = vadd.f32 %v3036_v6, %v1547_v28  ;;  %v1548_v15 = vmax.f32 %v3296_v14, %v1512_v31 }
 0x12c   :  { %v1593_v16 = vadd.f32 %v3036_v6, %v1550_v43  ;;  %v1628_v18 = vmax.f32 %v1592_v34, 0.0  ;;  %v3298_v34 = vmax.f32 %v2847_v29, %v2849_v30  ;;  %v3300_v29 = vmax.f32 %v2859_v35, %v2861_v36 }
 0x12d   :  { %v1591_v19 = vadd.f32 %v3036_v6, %v1548_v15  ;;  %v2342_v40 = vpop.f32.mrb[40].mxu0  ;;  %v2382_v17 = vpop.f32.mrb[40].mxu1  ;;  %v1626_v12 = vmax.f32 %v1590_v46, 0.0  ;;  %v3301_v35 = vmax.f32 %v2865_v38, %v2867_v39 }
 0x12e   :  { %v1629_v22 = vmax.f32 %v1593_v16, 0.0  ;;  %v1517_v52 = vmax.f32 %v2342_v40, %v2382_v17  ;;  %v991_v37 = vpop.f32.mrb[41].mxu0  ;;  %v1348_v9 = vpop.f32.mrb[41].mxu1 }
 0x12f   :  { %v1627_v20 = vmax.f32 %v1591_v19, 0.0  ;;  %v1515_v21 = vmax.f32 %v991_v37, %v1348_v9  ;;  %v2343_v49 = vpop.f32.mrb[42].mxu0  ;;  %v2383_v55 = vpop.f32.mrb[42].mxu1  ;;  %v3299_v19 = vmax.f32 %v2853_v32, %v2855_v33 }
 0x130   :  { %v2073_v25 = vpack.c.bf16 %v1629_v22, %v1628_v18  ;;  %v1553_v24 = vmax.f32 %v3297_v23, %v1517_v52  ;;  %v1518_v31 = vmax.f32 %v2343_v49, %v2383_v55  ;;  %v994_v28 = vpop.f32.mrb[43].mxu0  ;;  %v1351_v43 = vpop.f32.mrb[43].mxu1 }
 0x131   :  { %v2068_v14 = vpack.c.bf16 %v1627_v20, %v1626_v12  ;;  %v1551_v15 = vmax.f32 %v3298_v34, %v1515_v21  ;;  %v1516_v16 = vmax.f32 %v994_v28, %v1351_v43  ;;  %v3302_v43 = vmax.f32 %v2871_v41, %v2873_v42 }
 0x132   :  { %2155 = vst [vmem:[%s3242_s6 + $0x8] sm:$0xff] %v2073_v25   ;;  %v1596_v46 = vadd.f32 %v3036_v6, %v1553_v24  ;;  %v1554_v26 = vmax.f32 %v3299_v19, %v1518_v31  ;;  %v3304_v41 = vmax.f32 %v2883_v47, %v2885_v48  ;;  %v3305_v47 = vmax.f32 %v2889_v50, %v2891_v51 }
 0x133   :  { %2069 = vst [vmem:[%s3242_s6] sm:$0xff] %v2068_v14   ;;  %v1594_v27 = vadd.f32 %v3036_v6, %v1551_v15  ;;  %v1552_v30 = vmax.f32 %v3300_v29, %v1516_v16  ;;  %v3303_v16 = vmax.f32 %v2877_v44, %v2879_v45 }
 0x134   :  { %v1597_v40 = vadd.f32 %v3036_v6, %v1554_v26  ;;  %v1632_v52 = vmax.f32 %v1596_v46, 0.0 }
 0x135   :  { %v1595_v17 = vadd.f32 %v3036_v6, %v1552_v30  ;;  %v2346_v18 = vpop.f32.mrb[44].mxu0  ;;  %v2386_v22 = vpop.f32.mrb[44].mxu1  ;;  %v1630_v12 = vmax.f32 %v1594_v27, 0.0 }
 0x136   :  { %v1633_v37 = vmax.f32 %v1597_v40, 0.0  ;;  %v1521_v32 = vmax.f32 %v2346_v18, %v2386_v22  ;;  %v1007_v33 = vpop.f32.mrb[45].mxu0  ;;  %v1364_v9 = vpop.f32.mrb[45].mxu1 }
 0x137   :  { %v1631_v20 = vmax.f32 %v1595_v17, 0.0  ;;  %v1519_v21 = vmax.f32 %v1007_v33, %v1364_v9  ;;  %v2347_v49 = vpop.f32.mrb[46].mxu0  ;;  %v2387_v55 = vpop.f32.mrb[46].mxu1 }
 0x138   :  { %v2083_v25 = vpack.c.bf16 %v1633_v37, %v1632_v52  ;;  %v1557_v36 = vmax.f32 %v3301_v35, %v1521_v32  ;;  %v1522_v23 = vmax.f32 %v2347_v49, %v2387_v55  ;;  %v1010_v24 = vpop.f32.mrb[47].mxu0  ;;  %v1367_v31 = vpop.f32.mrb[47].mxu1  ;;  %v3307_v35 = vmax.f32 %v2901_v56, %v2903_v57 }
 0x139   :  { %v2078_v28 = vpack.c.bf16 %v1631_v20, %v1630_v12  ;;  %v1555_v14 = vmax.f32 %v3302_v43, %v1519_v21  ;;  %v1520_v34 = vmax.f32 %v1010_v24, %v1367_v31  ;;  %v3306_v21 = vmax.f32 %v2895_v53, %v2897_v54 }
 0x13a   :  { %2157 = vst [vmem:[%s3242_s6 + $0x18] sm:$0xff] %v2083_v25   ;;  %v1600_v15 = vadd.f32 %v3036_v6, %v1557_v36  ;;  %v1558_v38 = vmax.f32 %v3303_v16, %v1522_v23  ;;  %v3308_v53 = vmax.f32 %v2907_v59, %v2909_v60  ;;  %v3309_v59 = vmax.f32 %v2913_v62, %v2915_v63 }
 0x13b   :  { %2156 = vst [vmem:[%s3242_s6 + $0x10] sm:$0xff] %v2078_v28   ;;  %v1598_v39 = vadd.f32 %v3036_v6, %v1555_v14  ;;  %v1556_v42 = vmax.f32 %v3304_v41, %v1520_v34 }
 0x13c   :  { %v1601_v46 = vadd.f32 %v3036_v6, %v1558_v38  ;;  %v1636_v29 = vmax.f32 %v1600_v15, 0.0 }
 0x13d   :  { %v1599_v19 = vadd.f32 %v3036_v6, %v1556_v42  ;;  %v2350_v26 = vpop.f32.mrb[48].mxu0  ;;  %v2390_v27 = vpop.f32.mrb[48].mxu1  ;;  %v1634_v17 = vmax.f32 %v1598_v39, 0.0 }
 0x13e   :  { %v1637_v30 = vmax.f32 %v1601_v46, 0.0  ;;  %v1525_v44 = vmax.f32 %v2350_v26, %v2390_v27  ;;  %v1023_v45 = vpop.f32.mrb[49].mxu0  ;;  %v1380_v40 = vpop.f32.mrb[49].mxu1  ;;  %v3310_v27 = vmax.f32 %v2919_v1, %v2921_v2  ;;  %v3312_v1 = vmax.f32 %v2931_v7, %v2933_v8 }
 0x13f   :  { %v1635_v18 = vmax.f32 %v1599_v19, 0.0  ;;  %v1523_v22 = vmax.f32 %v1023_v45, %v1380_v40  ;;  %v2351_v52 = vpop.f32.mrb[50].mxu0  ;;  %v2391_v37 = vpop.f32.mrb[50].mxu1  ;;  %v3311_v45 = vmax.f32 %v2925_v4, %v2927_v5  ;;  %v3313_v7 = vmax.f32 %v2937_v10, %v2939_v11 }
 0x140   :  { %v2093_v32 = vpack.c.bf16 %v1637_v30, %v1636_v29  ;;  %v1561_v48 = vmax.f32 %v3305_v47, %v1525_v44  ;;  %v1526_v33 = vmax.f32 %v2351_v52, %v2391_v37  ;;  %v1026_v9 = vpop.f32.mrb[51].mxu0  ;;  %v1383_v12 = vpop.f32.mrb[51].mxu1 }
 0x141   :  { %v2088_v20 = vpack.c.bf16 %v1635_v18, %v1634_v17  ;;  %v1559_v49 = vmax.f32 %v3306_v21, %v1523_v22  ;;  %v1524_v55 = vmax.f32 %v1026_v9, %v1383_v12 }
 0x142   :  { %2159 = vst [vmem:[%s3242_s6 + $0x28] sm:$0xff] %v2093_v32   ;;  %v1604_v25 = vadd.f32 %v3036_v6, %v1561_v48  ;;  %v1562_v50 = vmax.f32 %v3307_v35, %v1526_v33  ;;  %v3314_v35 = vmax.f32 %v2943_v13, %v2945_v3  ;;  %v3316_v3 = vld [vmem:[#allocation2_spill] sm:$0xff] }
 0x143   :  { %2158 = vst [vmem:[%s3242_s6 + $0x20] sm:$0xff] %v2088_v20   ;;  %v1602_v51 = vadd.f32 %v3036_v6, %v1559_v49  ;;  %v1560_v54 = vmax.f32 %v3308_v53, %v1524_v55  ;;  %v3317_v13 = vmax.f32 %v2955_v58, %v3316_v3  ;;  %v3319_v58 = vld [vmem:[#allocation4_spill] sm:$0xff] }
 0x144   :  { %v1605_v36 = vadd.f32 %v3036_v6, %v1562_v50  ;;  %v1640_v28 = vmax.f32 %v1604_v25, 0.0 }
 0x145   :  { %v1603_v23 = vadd.f32 %v3036_v6, %v1560_v54  ;;  %v2354_v24 = vpop.f32.mrb[52].mxu0  ;;  %v2394_v31 = vpop.f32.mrb[52].mxu1  ;;  %v1638_v34 = vmax.f32 %v1602_v51, 0.0  ;;  %v3315_v54 = vmax.f32 %v2949_v0, %v2951_v61 }
 0x146   :  { %v1641_v43 = vmax.f32 %v1605_v36, 0.0  ;;  %v1529_v56 = vmax.f32 %v2354_v24, %v2394_v31  ;;  %v1039_v57 = vpop.f32.mrb[53].mxu0  ;;  %v1396_v14 = vpop.f32.mrb[53].mxu1 }
 0x147   :  { %v1639_v15 = vmax.f32 %v1603_v23, 0.0  ;;  %v1527_v16 = vmax.f32 %v1039_v57, %v1396_v14  ;;  %v2355_v38 = vpop.f32.mrb[54].mxu0  ;;  %v2395_v39 = vpop.f32.mrb[54].mxu1 }
 0x148   :  { %v2103_v41 = vpack.c.bf16 %v1641_v43, %v1640_v28  ;;  %v1565_v60 = vmax.f32 %v3309_v59, %v1529_v56  ;;  %v1530_v42 = vmax.f32 %v2355_v38, %v2395_v39  ;;  %v1042_v46 = vpop.f32.mrb[55].mxu0  ;;  %v1399_v19 = vpop.f32.mrb[55].mxu1 }
 0x149   :  { %v2098_v26 = vpack.c.bf16 %v1639_v15, %v1638_v34  ;;  %v1563_v29 = vmax.f32 %v3310_v27, %v1527_v16  ;;  %v1528_v30 = vmax.f32 %v1042_v46, %v1399_v19  ;;  %v3321_v27 = vld [vmem:[#allocation5_spill] sm:$0xff] }
 0x14a   :  { %2161 = vst [vmem:[%s3242_s6 + $0x38] sm:$0xff] %v2103_v41   ;;  %v1608_v44 = vadd.f32 %v3036_v6, %v1565_v60  ;;  %v1566_v62 = vmax.f32 %v3311_v45, %v1530_v42  ;;  %v3318_v41 = vld [vmem:[#allocation3_spill] sm:$0xff] }
 0x14b   :  { %2160 = vst [vmem:[%s3242_s6 + $0x30] sm:$0xff] %v2098_v26   ;;  %v1606_v63 = vadd.f32 %v3036_v6, %v1563_v29  ;;  %v1564_v2 = vmax.f32 %v3312_v1, %v1528_v30  ;;  %v3320_v59 = vmax.f32 %v3318_v41, %v3319_v58  ;;  %v3322_v29 = vld [vmem:[#allocation6_spill] sm:$0xff]  ;;  %v3325_v1 = vld [vmem:[#allocation8_spill] sm:$0xff] }
 0x14c   :  { %v1609_v40 = vadd.f32 %v3036_v6, %v1566_v62  ;;  %v1644_v52 = vmax.f32 %v1608_v44, 0.0  ;;  %v3323_v30 = vmax.f32 %v3321_v27, %v3322_v29 }
 0x14d   :  { %v1607_v17 = vadd.f32 %v3036_v6, %v1564_v2  ;;  %v2358_v18 = vpop.f32.mrb[56].mxu0  ;;  %v2398_v22 = vpop.f32.mrb[56].mxu1  ;;  %v1642_v47 = vmax.f32 %v1606_v63, 0.0  ;;  %v3324_v63 = vld [vmem:[#allocation7_spill] sm:$0xff] }
 0x14e   :  { %v1645_v37 = vmax.f32 %v1609_v40, 0.0  ;;  %v1533_v4 = vmax.f32 %v2358_v18, %v2398_v22  ;;  %v1055_v5 = vpop.f32.mrb[57].mxu0  ;;  %v1412_v32 = vpop.f32.mrb[57].mxu1  ;;  %v3326_v2 = vmax.f32 %v3324_v63, %v3325_v1  ;;  %v3327_v18 = vld [vmem:[#allocation9_spill] sm:$0xff]  ;;  %v3328_v22 = vld [vmem:[#allocation10_spill] sm:$0xff]  ;;  %v3343_v63 = vld [vmem:[#allocation20_spill] sm:$0xff] }
 0x14f   :  { %v1643_v48 = vmax.f32 %v1607_v17, 0.0  ;;  %v1531_v33 = vmax.f32 %v1055_v5, %v1412_v32  ;;  %v2359_v9 = vpop.f32.mrb[58].mxu0  ;;  %v2399_v12 = vpop.f32.mrb[58].mxu1 }
 0x150   :  { %v2113_v20 = vpack.c.bf16 %v1645_v37, %v1644_v52  ;;  %v1569_v8 = vmax.f32 %v3313_v7, %v1533_v4  ;;  %v1534_v21 = vmax.f32 %v2359_v9, %v2399_v12  ;;  %v1058_v49 = vpop.f32.mrb[59].mxu0  ;;  %v1415_v55 = vpop.f32.mrb[59].mxu1  ;;  %v3329_v52 = vmax.f32 %v3327_v18, %v3328_v22 }
 0x151   :  { %v2108_v25 = vpack.c.bf16 %v1643_v48, %v1642_v47  ;;  %v1567_v50 = vmax.f32 %v3314_v35, %v1531_v33  ;;  %v1532_v51 = vmax.f32 %v1058_v49, %v1415_v55  ;;  %v3330_v35 = vld [vmem:[#allocation11_spill] sm:$0xff] }
 0x152   :  { %2163 = vst [vmem:[%s3242_s6 + $0x48] sm:$0xff] %v2113_v20   ;;  %v1612_v53 = vadd.f32 %v3036_v6, %v1569_v8  ;;  %v1570_v10 = vmax.f32 %v3315_v54, %v1534_v21 }
 0x153   :  { %2162 = vst [vmem:[%s3242_s6 + $0x40] sm:$0xff] %v2108_v25   ;;  %v1610_v11 = vadd.f32 %v3036_v6, %v1567_v50  ;;  %v1568_v36 = vmax.f32 %v3317_v13, %v1532_v51  ;;  %v3331_v50 = vld [vmem:[#allocation12_spill] sm:$0xff]  ;;  %v3333_v13 = vld [vmem:[#allocation13_spill] sm:$0xff] }
 0x154   :  { %v1613_v23 = vadd.f32 %v3036_v6, %v1570_v10  ;;  %v1648_v43 = vmax.f32 %v1612_v53, 0.0  ;;  %v3332_v51 = vmax.f32 %v3330_v35, %v3331_v50 }
 0x155   :  { %v1611_v24 = vadd.f32 %v3036_v6, %v1568_v36  ;;  %v2362_v31 = vpop.f32.mrb[60].mxu0  ;;  %v2402_v28 = vpop.f32.mrb[60].mxu1  ;;  %v1646_v14 = vmax.f32 %v1610_v11, 0.0  ;;  %v3334_v36 = vld [vmem:[#allocation14_spill] sm:$0xff] }
 0x156   :  { %v1649_v56 = vmax.f32 %v1613_v23, 0.0  ;;  %v1537_v61 = vmax.f32 %v2362_v31, %v2402_v28  ;;  %v1071_v0 = vpop.f32.mrb[61].mxu0  ;;  %v1428_v57 = vpop.f32.mrb[61].mxu1  ;;  %v3335_v23 = vmax.f32 %v3333_v13, %v3334_v36 }
 0x157   :  { %v1647_v34 = vmax.f32 %v1611_v24, 0.0  ;;  %v1535_v15 = vmax.f32 %v1071_v0, %v1428_v57  ;;  %v2363_v16 = vpop.f32.mrb[62].mxu0  ;;  %v2403_v38 = vpop.f32.mrb[62].mxu1 }
 0x158   :  { %v2123_v39 = vpack.c.bf16 %v1649_v56, %v1648_v43  ;;  %v1573_v60 = vmax.f32 %v3320_v59, %v1537_v61  ;;  %v1538_v42 = vmax.f32 %v2363_v16, %v2403_v38  ;;  %v1074_v46 = vpop.f32.mrb[63].mxu0  ;;  %v1431_v19 = vpop.f32.mrb[63].mxu1  ;;  %v3336_v43 = vld [vmem:[#allocation15_spill] sm:$0xff]  ;;  %v3337_v56 = vld [vmem:[#allocation16_spill] sm:$0xff] }
 0x159   :  { %v2118_v26 = vpack.c.bf16 %v1647_v34, %v1646_v14  ;;  %v1571_v44 = vmax.f32 %v3323_v30, %v1535_v15  ;;  %v1536_v45 = vmax.f32 %v1074_v46, %v1431_v19  ;;  %v3338_v61 = vmax.f32 %v3336_v43, %v3337_v56  ;;  %v3339_v14 = vld [vmem:[#allocation17_spill] sm:$0xff]  ;;  %v3340_v34 = vld [vmem:[#allocation18_spill] sm:$0xff] }
 0x15a   :  { %2165 = vst [vmem:[%s3242_s6 + $0x58] sm:$0xff] %v2123_v39   ;;  %v1616_v62 = vadd.f32 %v3036_v6, %v1573_v60  ;;  %v1574_v40 = vmax.f32 %v3326_v2, %v1538_v42  ;;  %v3341_v15 = vmax.f32 %v3339_v14, %v3340_v34 }
 0x15b   :  { %2164 = vst [vmem:[%s3242_s6 + $0x50] sm:$0xff] %v2118_v26   ;;  %v1614_v17 = vadd.f32 %v3036_v6, %v1571_v44  ;;  %v1572_v37 = vmax.f32 %v3329_v52, %v1536_v45  ;;  %v3345_v52 = vld [vmem:[#allocation21_spill] sm:$0xff] }
 0x15c   :  { %v1617_v4 = vadd.f32 %v3036_v6, %v1574_v40  ;;  %v1652_v48 = vmax.f32 %v1616_v62, 0.0  ;;  %v3342_v62 = vld [vmem:[#allocation19_spill] sm:$0xff] }
 0x15d   :  { %v1615_v5 = vadd.f32 %v3036_v6, %v1572_v37  ;;  %v2366_v32 = vpop.f32.mrb[64].mxu0  ;;  %v2406_v47 = vpop.f32.mrb[64].mxu1  ;;  %v1650_v7 = vmax.f32 %v1614_v17, 0.0  ;;  %v3344_v1 = vmax.f32 %v3342_v62, %v3343_v63  ;;  %v3346_v37 = vld [vmem:[#allocation22_spill] sm:$0xff] }
 0x15e   :  { %v1653_v33 = vmax.f32 %v1617_v4, 0.0  ;;  %v1541_v9 = vmax.f32 %v2366_v32, %v2406_v47  ;;  %v1087_v12 = vpop.f32.mrb[65].mxu0  ;;  %v1444_v20 = vpop.f32.mrb[65].mxu1  ;;  %v3347_v4 = vmax.f32 %v3345_v52, %v3346_v37 }
 0x15f   :  { %v1651_v8 = vmax.f32 %v1615_v5, 0.0  ;;  %v1539_v21 = vmax.f32 %v1087_v12, %v1444_v20  ;;  %v2367_v49 = vpop.f32.mrb[66].mxu0  ;;  %v2407_v55 = vpop.f32.mrb[66].mxu1 }
 0x160   :  { %v2133_v25 = vpack.c.bf16 %v1653_v33, %v1652_v48  ;;  %v1577_v53 = vmax.f32 %v3332_v51, %v1541_v9  ;;  %v1542_v54 = vmax.f32 %v2367_v49, %v2407_v55  ;;  %v1090_v10 = vpop.f32.mrb[67].mxu0  ;;  %v1447_v11 = vpop.f32.mrb[67].mxu1  ;;  %v3348_v48 = vld [vmem:[#allocation23_spill] sm:$0xff]  ;;  %v3349_v33 = vld [vmem:[#allocation24_spill] sm:$0xff] }
 0x161   :  { %v2128_v3 = vpack.c.bf16 %v1651_v8, %v1650_v7  ;;  %v1575_v24 = vmax.f32 %v3335_v23, %v1539_v21  ;;  %v1540_v31 = vmax.f32 %v1090_v10, %v1447_v11  ;;  %v3350_v9 = vmax.f32 %v3348_v48, %v3349_v33  ;;  %v3351_v7 = vld [vmem:[#allocation25_spill] sm:$0xff]  ;;  %v3352_v8 = vld [vmem:[#allocation26_spill] sm:$0xff] }
 0x162   :  { %2167 = vst [vmem:[%s3242_s6 + $0x68] sm:$0xff] %v2133_v25   ;;  %v1620_v28 = vadd.f32 %v3036_v6, %v1577_v53  ;;  %v1578_v0 = vmax.f32 %v3338_v61, %v1542_v54  ;;  %v3353_v21 = vmax.f32 %v3351_v7, %v3352_v8 }
 0x163   :  { %2166 = vst [vmem:[%s3242_s6 + $0x60] sm:$0xff] %v2128_v3   ;;  %v1618_v57 = vadd.f32 %v3036_v6, %v1575_v24  ;;  %v1576_v16 = vmax.f32 %v3341_v15, %v1540_v31 }
 0x164   :  { %v1621_v38 = vadd.f32 %v3036_v6, %v1578_v0  ;;  %v1656_v59 = vmax.f32 %v1620_v28, 0.0 }
 0x165   :  { %v1619_v39 = vadd.f32 %v3036_v6, %v1576_v16  ;;  %v2370_v41 = vpop.f32.mrb[68].mxu0  ;;  %v2410_v58 = vpop.f32.mrb[68].mxu1  ;;  %v1654_v26 = vmax.f32 %v1618_v57, 0.0 }
 0x166   :  { %v1657_v60 = vmax.f32 %v1621_v38, 0.0  ;;  %v1545_v42 = vmax.f32 %v2370_v41, %v2410_v58  ;;  %v1103_v46 = vpop.f32.mrb[69].mxu0  ;;  %v1460_v19 = vpop.f32.mrb[69].mxu1 }
 0x167   :  { %v1655_v27 = vmax.f32 %v1619_v39, 0.0  ;;  %v1543_v29 = vmax.f32 %v1103_v46, %v1460_v19  ;;  %v2371_v30 = vpop.f32.mrb[70].mxu0  ;;  %v2411_v44 = vpop.f32.mrb[70].mxu1 }
 0x168   :  { %v2143_v45 = vpack.c.bf16 %v1657_v60, %v1656_v59  ;;  %v1581_v2 = vmax.f32 %v3344_v1, %v1545_v42  ;;  %v1546_v40 = vmax.f32 %v2371_v30, %v2411_v44  ;;  %v1106_v17 = vpop.f32.mrb[71].mxu0  ;;  %v1463_v18 = vpop.f32.mrb[71].mxu1 }
 0x169   :  { %v2138_v22 = vpack.c.bf16 %v1655_v27, %v1654_v26  ;;  %v1579_v5 = vmax.f32 %v3347_v4, %v1543_v29  ;;  %v1544_v32 = vmax.f32 %v1106_v17, %v1463_v18 }
 0x16a   :  { %2169 = vst [vmem:[%s3242_s6 + $0x78] sm:$0xff] %v2143_v45   ;;  %v1624_v47 = vadd.f32 %v3036_v6, %v1581_v2  ;;  %v1582_v12 = vmax.f32 %v3350_v9, %v1546_v40 }
 0x16b   :  { %2168 = vst [vmem:[%s3242_s6 + $0x70] sm:$0xff] %v2138_v22   ;;  %v1622_v20 = vadd.f32 %v3036_v6, %v1579_v5  ;;  %v1580_v49 = vmax.f32 %v3353_v21, %v1544_v32 }
 0x16c   :  { %v1625_v55 = vadd.f32 %v3036_v6, %v1582_v12  ;;  %v1660_v35 = vmax.f32 %v1624_v47, 0.0 }
 0x16d   :  { %v1623_v25 = vadd.f32 %v3036_v6, %v1580_v49  ;;  %v1658_v51 = vmax.f32 %v1622_v20, 0.0 }
 0x16e   :  { %v1661_v50 = vmax.f32 %v1625_v55, 0.0 }
 0x16f   :  { %v1659_v53 = vmax.f32 %v1623_v25, 0.0 }
 0x170   :  { %v2153_v54 = vpack.c.bf16 %v1661_v50, %v1660_v35 }
 0x171   :  { %v2148_v10 = vpack.c.bf16 %v1659_v53, %v1658_v51 }
 0x172   :  { %2171 = vst [vmem:[%s3242_s6 + $0x88] sm:$0xff] %v2153_v54  }
 0x173   :  { %2170 = vst [vmem:[%s3242_s6 + $0x80] sm:$0xff] %v2148_v10  }

// kernel: model_forward.4
= control target key start
LH: loop header
LB: loop body
LE: loop exit
PB: predicated region body
PF: predicated region fallthrough
CT: control target
= control target key end

     0   :  { %s5688_s4 = inlined_call_operand.vmem [shape: bf16[1152,128], index: 4, kind: input, shape index: {}]   ;;  %s5689_s0 = inlined_call_operand.vmem [shape: bf16[50,1152], index: 0, kind: input, shape index: {}]   ;;  %s5690_s1 = inlined_call_operand.vmem [shape: bf16[50,1152], index: 1, kind: input, shape index: {}]   ;;  %s5691_s2 = inlined_call_operand.vmem [shape: bf16[50,1152], index: 2, kind: input, shape index: {}]   ;;  %s5692_s3 = inlined_call_operand.vmem [shape: bf16[50,1152], index: 3, kind: input, shape index: {}]   ;;  %s5693_s5 = inlined_call_operand.vmem [shape: f32[1,128], index: 5, kind: input, shape index: {}]   ;;  %s5694_s6 = inlined_call_operand.vmem [shape: bf16[50,128], index: 6, kind: output, shape index: {}]  }
   0x1   :  { %v4188_v0 = vld [vmem:[%s5688_s4 + $0x40] sm:$0xff]   ;;  %v4211_v4 = vld [vmem:[%s5688_s4 + $0x48] sm:$0xff]   ;;  %v4235_v8 = vld [vmem:[%s5688_s4 + $0x50] sm:$0xff]  }
   0x2   :  { %v4193_v1 = vld [vmem:[%s5688_s4 + $0xc0] sm:$0xff]   ;;  %3030 = vmatprep.subr.bf16.mxu0 %v4188_v0  ;;  %v4217_v5 = vld [vmem:[%s5688_s4 + $0xc8] sm:$0xff]   ;;  %v4241_v9 = vld [vmem:[%s5688_s4 + $0xd0] sm:$0xff]  }
   0x3   :  { %v4199_v2 = vld [vmem:[%s5688_s4] sm:$0xff]   ;;  %3070 = vmatprep.subr.bf16.mxu1 %v4193_v1  ;;  %v4223_v6 = vld [vmem:[%s5688_s4 + $0x8] sm:$0xff]   ;;  %v4247_v10 = vld [vmem:[%s5688_s4 + $0x10] sm:$0xff]  }
   0x4   :  { %v4205_v3 = vld [vmem:[%s5688_s4 + $0x80] sm:$0xff]   ;;  %3031 = vmatpush3.bf16.msra.mxu0 %v4199_v2  ;;  %v4229_v7 = vld [vmem:[%s5688_s4 + $0x88] sm:$0xff]   ;;  %v4253_v11 = vld [vmem:[%s5688_s4 + $0x90] sm:$0xff]  }
   0x5   :  { %3071 = vmatpush3.bf16.msra.mxu1 %v4205_v3  ;;  %3032 = vmatprep.subr.bf16.mxu0 %v4211_v4  ;;  %v4259_v12 = vld [vmem:[%s5688_s4 + $0x58] sm:$0xff]   ;;  %v4283_v16 = vld [vmem:[%s5688_s4 + $0x60] sm:$0xff]   ;;  %v4307_v20 = vld [vmem:[%s5688_s4 + $0x68] sm:$0xff]  }
   0x6   :  { %3072 = vmatprep.subr.bf16.mxu1 %v4217_v5  ;;  %v4265_v13 = vld [vmem:[%s5688_s4 + $0xd8] sm:$0xff]   ;;  %v4289_v17 = vld [vmem:[%s5688_s4 + $0xe0] sm:$0xff]   ;;  %v4313_v21 = vld [vmem:[%s5688_s4 + $0xe8] sm:$0xff]  }
   0x7   :  { %v4271_v14 = vld [vmem:[%s5688_s4 + $0x18] sm:$0xff]   ;;  %v4295_v18 = vld [vmem:[%s5688_s4 + $0x20] sm:$0xff]   ;;  %v4319_v22 = vld [vmem:[%s5688_s4 + $0x28] sm:$0xff]  }
   0x8   :  { %3033 = vmatpush3.bf16.msra.mxu0 %v4223_v6  ;;  %v4277_v15 = vld [vmem:[%s5688_s4 + $0x98] sm:$0xff]   ;;  %v4301_v19 = vld [vmem:[%s5688_s4 + $0xa0] sm:$0xff]   ;;  %v4325_v23 = vld [vmem:[%s5688_s4 + $0xa8] sm:$0xff]  }
   0x9   :  { %3073 = vmatpush3.bf16.msra.mxu1 %v4229_v7  ;;  %3034 = vmatprep.subr.bf16.mxu0 %v4235_v8  ;;  %v4331_v24 = vld [vmem:[%s5688_s4 + $0x70] sm:$0xff]   ;;  %v4355_v28 = vld [vmem:[%s5688_s4 + $0x78] sm:$0xff]   ;;  %v3846_v32 = vld [vmem:[%s5689_s0] ss:$36 sps:$4 sm:$0xff]  }
   0xa   :  { %3074 = vmatprep.subr.bf16.mxu1 %v4241_v9  ;;  %v4337_v25 = vld [vmem:[%s5688_s4 + $0xf0] sm:$0xff]   ;;  %v4361_v29 = vld [vmem:[%s5688_s4 + $0xf8] sm:$0xff]   ;;  %v3848_v33 = vld [vmem:[%s5689_s0 + $0x4] ss:$36 sps:$4 sm:$0xff]  }
   0xb   :  { %v4343_v26 = vld [vmem:[%s5688_s4 + $0x30] sm:$0xff]   ;;  %v4367_v30 = vld [vmem:[%s5688_s4 + $0x38] sm:$0xff]   ;;  %v3849_v34 = vld [vmem:[%s5689_s0 + $0x8] ss:$36 sps:$4 sm:$0xff]   ;;  %837 = vmatprep.mubr.bf16.mxu0 %v3848_v33 }
   0xc   :  { %3035 = vmatpush3.bf16.msra.mxu0 %v4247_v10  ;;  %v4349_v27 = vld [vmem:[%s5688_s4 + $0xb0] sm:$0xff]   ;;  %v4373_v31 = vld [vmem:[%s5688_s4 + $0xb8] sm:$0xff]   ;;  %v4392_v36 = vld [vmem:[%s5688_s4 + $0x140] sm:$0xff]  }
   0xd   :  { %3075 = vmatpush3.bf16.msra.mxu1 %v4253_v11  ;;  %3036 = vmatprep.subr.bf16.mxu0 %v4259_v12  ;;  %v3851_v35 = vld [vmem:[%s5689_s0 + $0xc] ss:$36 sps:$4 sm:$0xff]   ;;  %v4397_v37 = vld [vmem:[%s5688_s4 + $0x1c0] sm:$0xff]   ;;  %v3862_v45 = vld [vmem:[%s5689_s0 + $0x54] ss:$36 sps:$4 sm:$0xff]  }
   0xe   :  { %3076 = vmatprep.subr.bf16.mxu1 %v4265_v13  ;;  %901 = vmatprep.mubr.bf16.mxu1 %v3851_v35  ;;  %v4403_v38 = vld [vmem:[%s5688_s4 + $0x100] sm:$0xff]   ;;  %v4415_v40 = vld [vmem:[%s5688_s4 + $0x148] sm:$0xff]   ;;  %v3865_v47 = vld [vmem:[%s5689_s0 + $0x50] ss:$36 sps:$4 sm:$0xff]  }
   0xf   :  { %v4409_v39 = vld [vmem:[%s5688_s4 + $0x180] sm:$0xff]   ;;  %v4421_v41 = vld [vmem:[%s5688_s4 + $0x1c8] sm:$0xff]   ;;  %v4452_v48 = vld [vmem:[%s5688_s4 + $0x150] sm:$0xff]  }
  0x10   :  { %3037 = vmatpush3.bf16.msra.mxu0 %v4271_v14  ;;  %v4427_v42 = vld [vmem:[%s5688_s4 + $0x108] sm:$0xff]   ;;  %v4457_v49 = vld [vmem:[%s5688_s4 + $0x1d0] sm:$0xff]   ;;  %v4475_v52 = vld [vmem:[%s5688_s4 + $0x158] sm:$0xff]  }
  0x11   :  { %3077 = vmatpush3.bf16.msra.mxu1 %v4277_v15  ;;  %3038 = vmatprep.subr.bf16.mxu0 %v4283_v16  ;;  %v4433_v43 = vld [vmem:[%s5688_s4 + $0x188] sm:$0xff]   ;;  %v4463_v50 = vld [vmem:[%s5688_s4 + $0x110] sm:$0xff]   ;;  %v4481_v53 = vld [vmem:[%s5688_s4 + $0x1d8] sm:$0xff]  }
  0x12   :  { %3078 = vmatprep.subr.bf16.mxu1 %v4289_v17  ;;  %v3860_v44 = vld [vmem:[%s5689_s0 + $0x4c] ss:$36 sps:$4 sm:$0xff]   ;;  %v4487_v54 = vld [vmem:[%s5688_s4 + $0x118] sm:$0xff]   ;;  %v4512_v60 = vld [vmem:[%s5688_s4 + $0x160] sm:$0xff]  }
  0x13   :  { %v3864_v46 = vld [vmem:[%s5689_s0 + $0x48] ss:$36 sps:$4 sm:$0xff]   ;;  %v4469_v51 = vld [vmem:[%s5688_s4 + $0x190] sm:$0xff]   ;;  %v4493_v55 = vld [vmem:[%s5688_s4 + $0x198] sm:$0xff]  }
  0x14   :  { %3039 = vmatpush3.bf16.msra.mxu0 %v4295_v18  ;;  %v3874_v56 = vld [vmem:[%s5689_s0 + $0x94] ss:$36 sps:$4 sm:$0xff]   ;;  %v3876_v57 = vld [vmem:[%s5689_s0 + $0x9c] ss:$36 sps:$4 sm:$0xff]   ;;  %v4541_v33 = vld [vmem:[%s5688_s4 + $0x1e8] sm:$0xff]  }
  0x15   :  { %3079 = vmatpush3.bf16.msra.mxu1 %v4301_v19  ;;  %3040 = vmatprep.subr.bf16.mxu0 %v4307_v20  ;;  %v3878_v58 = vld [vmem:[%s5689_s0 + $0x90] ss:$36 sps:$4 sm:$0xff]   ;;  %v3879_v59 = vld [vmem:[%s5689_s0 + $0x98] ss:$36 sps:$4 sm:$0xff]   ;;  %v4517_v61 = vld [vmem:[%s5688_s4 + $0x1e0] sm:$0xff]   ;;  %5723 = vst [vmem:[#allocation2_spill] sm:$0xff] %v4541_v33 }
  0x16   :  { %3080 = vmatprep.subr.bf16.mxu1 %v4313_v21  ;;  %v4523_v62 = vld [vmem:[%s5688_s4 + $0x120] sm:$0xff]   ;;  %v4553_v35 = vld [vmem:[%s5688_s4 + $0x1a8] sm:$0xff]  }
  0x17   :  { %v4529_v63 = vld [vmem:[%s5688_s4 + $0x1a0] sm:$0xff]   ;;  %5724 = vst [vmem:[#allocation3_spill] sm:$0xff] %v4553_v35 }
  0x18   :  { %3041 = vmatpush3.bf16.msra.mxu0 %v4319_v22 }
  0x19   :  { %3081 = vmatpush3.bf16.msra.mxu1 %v4325_v23  ;;  %3042 = vmatprep.subr.bf16.mxu0 %v4331_v24 }
  0x1a   :  { %3082 = vmatprep.subr.bf16.mxu1 %v4337_v25 }
  0x1c   :  { %3043 = vmatpush3.bf16.msra.mxu0 %v4343_v26 }
  0x1d   :  { %3083 = vmatpush3.bf16.msra.mxu1 %v4349_v27  ;;  %3044 = vmatprep.subr.bf16.mxu0 %v4355_v28 }
  0x1e   :  { %3084 = vmatprep.subr.bf16.mxu1 %v4361_v29 }
  0x20   :  { %3045 = vmatpush3.bf16.msra.mxu0 %v4367_v30 }
  0x21   :  { %3085 = vmatpush3.bf16.msra.mxu1 %v4373_v31  ;;  %3110 = vmatprep.subr.bf16.mxu0 %v4392_v36 }
  0x22   :  { %3150 = vmatprep.subr.bf16.mxu1 %v4397_v37 }
  0x23   :  { %838 = vmatmul.mubr.bf16.vlgmr.msra.gmra.mrb[0].mxu0 %v3846_v32  ;;  %v4535_v32 = vld [vmem:[%s5688_s4 + $0x168] sm:$0xff]  }
  0x24   :  { %902 = vmatmul.mubr.bf16.vlgmr.msra.gmra.mrb[0].mxu1 %v3849_v34  ;;  %3111 = vmatpush3.bf16.msra.mxu0 %v4403_v38  ;;  %v4547_v34 = vld [vmem:[%s5688_s4 + $0x128] sm:$0xff]  }
  0x25   :  { %3151 = vmatpush3.bf16.msra.mxu1 %v4409_v39  ;;  %3112 = vmatprep.subr.bf16.mxu0 %v4415_v40 }
  0x26   :  { %3152 = vmatprep.subr.bf16.mxu1 %v4421_v41  ;;  %845 = vmatprep.mubr.bf16.mxu0 %v3860_v44  ;;  %v198_v44 = vld [vmem:[%s5689_s0 + $0xd8] sm:$0x11] }
  0x27   :  { %909 = vmatprep.mubr.bf16.mxu1 %v3862_v45  ;;  %v199_v45 = vld [vmem:[%s5689_s0 + $0xe0] sm:$0x11] }
  0x28   :  { %3113 = vmatpush3.bf16.msra.mxu0 %v4427_v42 }
  0x29   :  { %3153 = vmatpush3.bf16.msra.mxu1 %v4433_v43  ;;  %3114 = vmatprep.subr.bf16.mxu0 %v4452_v48 }
  0x2a   :  { %3154 = vmatprep.subr.bf16.mxu1 %v4457_v49 }
  0x2b   :  { %846 = vmatmul.mubr.bf16.gmra.mrb[4].mxu0 %v3864_v46  ;;  %v2810_v46 = vcombine.high %v198_v44, %v198_v44 }
  0x2c   :  { %910 = vmatmul.mubr.bf16.gmra.mrb[4].mxu1 %v3865_v47  ;;  %3115 = vmatpush3.bf16.msra.mxu0 %v4463_v50  ;;  %v2812_v47 = vcombine.high %v199_v45, %v199_v45 }
  0x2d   :  { %3155 = vmatpush3.bf16.msra.mxu1 %v4469_v51  ;;  %3116 = vmatprep.subr.bf16.mxu0 %v4475_v52 }
  0x2e   :  { %3156 = vmatprep.subr.bf16.mxu1 %v4481_v53  ;;  %853 = vmatprep.mubr.bf16.mxu0 %v3874_v56  ;;  %v2809_v56 = vcombine.low %v198_v44, %v198_v44  ;;  %v4581_v44 = vld [vmem:[%s5688_s4 + $0x1b0] sm:$0xff]  }
  0x2f   :  { %917 = vmatprep.mubr.bf16.mxu1 %v3876_v57  ;;  %v2811_v57 = vcombine.low %v199_v45, %v199_v45  ;;  %5726 = vst [vmem:[#allocation5_spill] sm:$0xff] %v4581_v44  ;;  %v4588_v45 = vld [vmem:[%s5688_s4 + $0x178] sm:$0xff]  }
  0x30   :  { %3117 = vmatpush3.bf16.msra.mxu0 %v4487_v54 }
  0x31   :  { %3157 = vmatpush3.bf16.msra.mxu1 %v4493_v55  ;;  %3118 = vmatprep.subr.bf16.mxu0 %v4512_v60 }
  0x32   :  { %3158 = vmatprep.subr.bf16.mxu1 %v4517_v61 }
  0x33   :  { %854 = vmatmul.mubr.bf16.gmra.mrb[8].mxu0 %v3878_v58  ;;  %v4566_v58 = vld [vmem:[%s5688_s4 + $0x170] sm:$0xff]  }
  0x34   :  { %918 = vmatmul.mubr.bf16.gmra.mrb[8].mxu1 %v3879_v59  ;;  %3119 = vmatpush3.bf16.msra.mxu0 %v4523_v62  ;;  %v4571_v59 = vld [vmem:[%s5688_s4 + $0x1f0] sm:$0xff]  }
  0x35   :  { %3159 = vmatpush3.bf16.msra.mxu1 %v4529_v63  ;;  %3120 = vmatprep.subr.bf16.mxu0 %v4535_v32  ;;  %5725 = vst [vmem:[#allocation4_spill] sm:$0xff] %v4571_v59 }
  0x36   :  { %3160 = vmatprep.subr.bf16.mxu1 %v4541_v33  ;;  %861 = vmatprep.mubr.bf16.mxu0 %v2810_v46  ;;  %v4595_v46 = vld [vmem:[%s5688_s4 + $0x1f8] sm:$0xff]   ;;  %v4627_v33 = vld [vmem:[%s5688_s4 + $0x200] sm:$0xff]  }
  0x37   :  { %925 = vmatprep.mubr.bf16.mxu1 %v2812_v47  ;;  %5727 = vst [vmem:[#allocation6_spill] sm:$0xff] %v4595_v46  ;;  %v4601_v47 = vld [vmem:[%s5688_s4 + $0x138] sm:$0xff]  }
  0x38   :  { %3121 = vmatpush3.bf16.msra.mxu0 %v4547_v34 }
  0x39   :  { %3161 = vmatpush3.bf16.msra.mxu1 %v4553_v35  ;;  %v4576_v35 = vld [vmem:[%s5688_s4 + $0x130] sm:$0xff]   ;;  %3122 = vmatprep.subr.bf16.mxu0 %v4566_v58 }
  0x3a   :  { %3162 = vmatprep.subr.bf16.mxu1 %v4571_v59  ;;  %v3905_v59 = vld [vmem:[%s5689_s0 + $0x1c] ss:$36 sps:$4 sm:$0xff]  }
  0x3b   :  { %862 = vmatmul.mubr.bf16.gmra.mrb[12].mxu0 %v2809_v56  ;;  %v4607_v56 = vld [vmem:[%s5688_s4 + $0x1b8] sm:$0xff]  }
  0x3c   :  { %926 = vmatmul.mubr.bf16.gmra.mrb[12].mxu1 %v2811_v57  ;;  %3123 = vmatpush3.bf16.msra.mxu0 %v4576_v35  ;;  %5728 = vst [vmem:[#allocation7_spill] sm:$0xff] %v4607_v56  ;;  %v3900_v57 = vld [vmem:[%s5689_s0 + $0x10] ss:$36 sps:$4 sm:$0xff]  }
  0x3d   :  { %3163 = vmatpush3.bf16.msra.mxu1 %v4581_v44  ;;  %3124 = vmatprep.subr.bf16.mxu0 %v4588_v45  ;;  %v3902_v44 = vld [vmem:[%s5689_s0 + $0x14] ss:$36 sps:$4 sm:$0xff]  }
  0x3e   :  { %3164 = vmatprep.subr.bf16.mxu1 %v4595_v46  ;;  %v3903_v46 = vld [vmem:[%s5689_s0 + $0x18] ss:$36 sps:$4 sm:$0xff]   ;;  %965 = vmatprep.mubr.bf16.mxu0 %v3902_v44 }
  0x3f   :  { %1029 = vmatprep.mubr.bf16.mxu1 %v3905_v59  ;;  %v3908_v44 = vld [vmem:[%s5689_s0 + $0x5c] ss:$36 sps:$4 sm:$0xff]  }
  0x40   :  { %3125 = vmatpush3.bf16.msra.mxu0 %v4601_v47  ;;  %v3910_v59 = vld [vmem:[%s5689_s0 + $0x58] ss:$36 sps:$4 sm:$0xff]  }
  0x41   :  { %3165 = vmatpush3.bf16.msra.mxu1 %v4607_v56  ;;  %v4632_v56 = vld [vmem:[%s5688_s4 + $0x208] sm:$0xff]   ;;  %3718 = vmatprep.subr.bf16.mxu0 %v4627_v33 }
  0x42   :  { %3202 = vmatprep.subr.bf16.mxu1 %v4188_v0  ;;  %v3911_v0 = vld [vmem:[%s5689_s0 + $0x64] ss:$36 sps:$4 sm:$0xff]  }
  0x43   :  { %966 = vmatmul.mubr.bf16.vlgmr.msra.gmra.mrb[16].mxu0 %v3900_v57  ;;  %v3916_v57 = vld [vmem:[%s5689_s0 + $0xa4] ss:$36 sps:$4 sm:$0xff]  }
  0x44   :  { %1030 = vmatmul.mubr.bf16.vlgmr.msra.gmra.mrb[16].mxu1 %v3903_v46  ;;  %3719 = vmatpush3.bf16.msra.mxu0 %v4627_v33  ;;  %v4651_v46 = vld [vmem:[%s5688_s4 + $0x210] sm:$0xff]  }
  0x45   :  { %3203 = vmatpush3.bf16.msra.mxu1 %v4199_v2  ;;  %3720 = vmatprep.subr.bf16.mxu0 %v4632_v56  ;;  %v3914_v2 = vld [vmem:[%s5689_s0 + $0x60] ss:$36 sps:$4 sm:$0xff]  }
  0x46   :  { %3204 = vmatprep.subr.bf16.mxu1 %v4211_v4  ;;  %973 = vmatprep.mubr.bf16.mxu0 %v3908_v44  ;;  %v4666_v4 = vld [vmem:[%s5688_s4 + $0x218] sm:$0xff]   ;;  %v3919_v44 = vld [vmem:[%s5689_s0 + $0xac] ss:$36 sps:$4 sm:$0xff]  }
  0x47   :  { %1037 = vmatprep.mubr.bf16.mxu1 %v3911_v0  ;;  %v4684_v0 = vld [vmem:[%s5688_s4 + $0x220] sm:$0xff]  }
  0x48   :  { %3721 = vmatpush3.bf16.msra.mxu0 %v4632_v56 }
  0x49   :  { %3205 = vmatpush3.bf16.msra.mxu1 %v4223_v6  ;;  %3722 = vmatprep.subr.bf16.mxu0 %v4651_v46  ;;  %v3918_v6 = vld [vmem:[%s5689_s0 + $0xa0] ss:$36 sps:$4 sm:$0xff]  }
  0x4a   :  { %3206 = vmatprep.subr.bf16.mxu1 %v4235_v8  ;;  %v200_v8 = vld [vmem:[%s5689_s0 + $0xe8] sm:$0x11] }
  0x4b   :  { %974 = vmatmul.mubr.bf16.gmra.mrb[20].mxu0 %v3910_v59  ;;  %v2814_v59 = vcombine.high %v200_v8, %v200_v8 }
  0x4c   :  { %1038 = vmatmul.mubr.bf16.gmra.mrb[20].mxu1 %v3914_v2  ;;  %981 = vmatprep.mubr.bf16.mxu0 %v3916_v57  ;;  %v201_v2 = vld [vmem:[%s5689_s0 + $0xf0] sm:$0x11] }
  0x4d   :  { %3723 = vmatpush3.bf16.msra.mxu0 %v4651_v46  ;;  %3207 = vmatpush3.bf16.msra.mxu1 %v4247_v10  ;;  %v3922_v10 = vld [vmem:[%s5689_s0 + $0xa8] ss:$36 sps:$4 sm:$0xff]   ;;  %v2816_v57 = vcombine.high %v201_v2, %v201_v2 }
  0x4e   :  { %3724 = vmatprep.subr.bf16.mxu0 %v4666_v4  ;;  %3208 = vmatprep.subr.bf16.mxu1 %v4259_v12  ;;  %v4699_v12 = vld [vmem:[%s5688_s4 + $0x228] sm:$0xff]  }
  0x4f   :  { %1045 = vmatprep.mubr.bf16.mxu1 %v3919_v44  ;;  %v2815_v44 = vcombine.low %v201_v2, %v201_v2  ;;  %v4885_v2 = vld [vmem:[%s5688_s4 + $0xc0] sm:$0xff]  }
  0x51   :  { %3725 = vmatpush3.bf16.msra.mxu0 %v4666_v4  ;;  %3209 = vmatpush3.bf16.msra.mxu1 %v4271_v14  ;;  %v4708_v14 = vld [vmem:[%s5688_s4 + $0x230] sm:$0xff]  }
  0x52   :  { %3726 = vmatprep.subr.bf16.mxu0 %v4684_v0  ;;  %3210 = vmatprep.subr.bf16.mxu1 %v4283_v16  ;;  %v2813_v16 = vcombine.low %v200_v8, %v200_v8  ;;  %v3971_v8 = vld [vmem:[%s5690_s1 + $0x68] ss:$36 sps:$4 sm:$0xff]  }
  0x53   :  { %982 = vmatmul.mubr.bf16.gmra.mrb[24].mxu0 %v3918_v6  ;;  %v3930_v6 = vld [vmem:[%s5689_s0 + $0x20] ss:$36 sps:$4 sm:$0xff]  }
  0x54   :  { %1046 = vmatmul.mubr.bf16.gmra.mrb[24].mxu1 %v3922_v10  ;;  %989 = vmatprep.mubr.bf16.mxu0 %v2814_v59  ;;  %v5734_v10 = vld [vmem:[#allocation7_spill] sm:$0xff]  ;;  %v4879_v59 = vld [vmem:[%s5688_s4 + $0x40] sm:$0xff]  }
  0x55   :  { %3727 = vmatpush3.bf16.msra.mxu0 %v4684_v0  ;;  %3211 = vmatpush3.bf16.msra.mxu1 %v4295_v18  ;;  %v4720_v18 = vld [vmem:[%s5688_s4 + $0x238] sm:$0xff]  }
  0x56   :  { %3728 = vmatprep.subr.bf16.mxu0 %v4699_v12  ;;  %3212 = vmatprep.subr.bf16.mxu1 %v4307_v20  ;;  %v3934_v20 = vld [vmem:[%s5690_s1 + $0x4] ss:$36 sps:$4 sm:$0xff]  }
  0x57   :  { %1053 = vmatprep.mubr.bf16.mxu1 %v2816_v57  ;;  %v3972_v57 = vld [vmem:[%s5690_s1 + $0x64] ss:$36 sps:$4 sm:$0xff]  }
  0x59   :  { %3729 = vmatpush3.bf16.msra.mxu0 %v4699_v12  ;;  %3213 = vmatpush3.bf16.msra.mxu1 %v4319_v22  ;;  %v3931_v22 = vld [vmem:[%s5689_s0 + $0x68] ss:$36 sps:$4 sm:$0xff]  }
  0x5a   :  { %3730 = vmatprep.subr.bf16.mxu0 %v4708_v14  ;;  %3214 = vmatprep.subr.bf16.mxu1 %v4331_v24  ;;  %v3932_v24 = vld [vmem:[%s5690_s1] ss:$36 sps:$4 sm:$0xff]  }
  0x5b   :  { %990 = vmatmul.mubr.bf16.gmra.mrb[28].mxu0 %v2813_v16  ;;  %v3978_v16 = vld [vmem:[%s5690_s1 + $0xb0] ss:$36 sps:$4 sm:$0xff]  }
  0x5c   :  { %1054 = vmatmul.mubr.bf16.gmra.mrb[28].mxu1 %v2815_v44  ;;  %3734 = vmatprep.mubr.bf16.mxu0 %v3930_v6  ;;  %v4897_v44 = vld [vmem:[%s5688_s4] sm:$0xff]  }
  0x5d   :  { %3731 = vmatpush3.bf16.msra.mxu0 %v4708_v14  ;;  %3215 = vmatpush3.bf16.msra.mxu1 %v4343_v26  ;;  %v3935_v26 = vld [vmem:[%s5689_s0 + $0xb0] ss:$36 sps:$4 sm:$0xff]   ;;  %v4903_v6 = vld [vmem:[%s5688_s4 + $0x80] sm:$0xff]  }
  0x5e   :  { %3732 = vmatprep.subr.bf16.mxu0 %v4720_v18  ;;  %3216 = vmatprep.subr.bf16.mxu1 %v4355_v28  ;;  %v3937_v28 = vld [vmem:[%s5690_s1 + $0x4c] ss:$36 sps:$4 sm:$0xff]  }
  0x5f   :  { %1362 = vmatprep.mubr.bf16.mxu1 %v3934_v20  ;;  %v4909_v20 = vld [vmem:[%s5688_s4 + $0x48] sm:$0xff]  }
  0x61   :  { %3733 = vmatpush3.bf16.msra.mxu0 %v4720_v18  ;;  %3217 = vmatpush3.bf16.msra.mxu1 %v4367_v30  ;;  %v3939_v30 = vld [vmem:[%s5690_s1 + $0x48] ss:$36 sps:$4 sm:$0xff]  }
  0x62   :  { %3242 = vmatprep.subr.bf16.mxu0 %v4193_v1  ;;  %3282 = vmatprep.subr.bf16.mxu1 %v4392_v36  ;;  %v3936_v1 = vld [vmem:[%s5689_s0 + $0xf8] ss:$0 sps:$4 sm:$0x11]  }
  0x63   :  { %v3959_v36 = vld [vmem:[%s5690_s1 + $0x98] ss:$36 sps:$4 sm:$0xff]  }
  0x64   :  { %3735 = vmatmul.mubr.bf16.vlgmr.msra.gmra.mrb[32].mxu0 %v3931_v22  ;;  %1363 = vmatmul.mubr.bf16.vlgmr.msra.gmra.mrb[32].mxu1 %v3932_v24  ;;  %v4915_v22 = vld [vmem:[%s5688_s4 + $0xc8] sm:$0xff]   ;;  %v3974_v24 = vld [vmem:[%s5690_s1 + $0x60] ss:$36 sps:$4 sm:$0xff]  }
  0x65   :  { %3243 = vmatpush3.bf16.msra.mxu0 %v4205_v3  ;;  %3283 = vmatpush3.bf16.msra.mxu1 %v4403_v38  ;;  %v3940_v3 = vld [vmem:[%s5690_s1 + $0x94] ss:$36 sps:$4 sm:$0xff]   ;;  %v1156_v38 = vld [vmem:[%s5690_s1 + $0xe0] sm:$0x11] }
  0x66   :  { %3244 = vmatprep.subr.bf16.mxu0 %v4217_v5  ;;  %3284 = vmatprep.subr.bf16.mxu1 %v4415_v40  ;;  %v3947_v5 = vld [vmem:[%s5690_s1 + $0xc] ss:$36 sps:$4 sm:$0xff]   ;;  %v2920_v40 = vcombine.high %v1156_v38, %v1156_v38 }
  0x67   :  { %3738 = vmatprep.mubr.bf16.mxu0 %v3935_v26  ;;  %1370 = vmatprep.mubr.bf16.mxu1 %v3937_v28  ;;  %v3979_v26 = vld [vmem:[%s5690_s1 + $0xf8] ss:$0 sps:$4 sm:$0x11]   ;;  %v4927_v28 = vld [vmem:[%s5688_s4 + $0x8] sm:$0xff]  }
  0x69   :  { %3245 = vmatpush3.bf16.msra.mxu0 %v4229_v7  ;;  %3285 = vmatpush3.bf16.msra.mxu1 %v4427_v42  ;;  %v3942_v7 = vld [vmem:[%s5690_s1 + $0x90] ss:$36 sps:$4 sm:$0xff]   ;;  %v5729_v42 = vld [vmem:[#allocation2_spill] sm:$0xff] }
  0x6a   :  { %3246 = vmatprep.subr.bf16.mxu0 %v4241_v9  ;;  %3286 = vmatprep.subr.bf16.mxu1 %v4452_v48  ;;  %v1155_v9 = vld [vmem:[%s5690_s1 + $0xd8] sm:$0x11] }
  0x6c   :  { %3739 = vmatmul.mubr.bf16.gmra.mrb[36].mxu0 %v3936_v1  ;;  %1371 = vmatmul.mubr.bf16.gmra.mrb[36].mxu1 %v3939_v30  ;;  %v4933_v1 = vld [vmem:[%s5688_s4 + $0x88] sm:$0xff]   ;;  %v4939_v30 = vld [vmem:[%s5688_s4 + $0x50] sm:$0xff]  }
  0x6d   :  { %3247 = vmatpush3.bf16.msra.mxu0 %v4253_v11  ;;  %3287 = vmatpush3.bf16.msra.mxu1 %v4463_v50  ;;  %v2918_v11 = vcombine.high %v1155_v9, %v1155_v9  ;;  %v5731_v50 = vld [vmem:[#allocation4_spill] sm:$0xff] }
  0x6e   :  { %3248 = vmatprep.subr.bf16.mxu0 %v4265_v13  ;;  %3288 = vmatprep.subr.bf16.mxu1 %v4475_v52  ;;  %v2917_v13 = vcombine.low %v1155_v9, %v1155_v9  ;;  %v3970_v52 = vld [vmem:[%s5690_s1 + $0x20] ss:$36 sps:$4 sm:$0xff]   ;;  %v4957_v9 = vld [vmem:[%s5688_s4 + $0x10] sm:$0xff]  }
  0x6f   :  { %1378 = vmatprep.mubr.bf16.mxu1 %v3940_v3  ;;  %1426 = vmatprep.mubr.bf16.mxu0 %v3947_v5  ;;  %v4945_v3 = vld [vmem:[%s5688_s4 + $0xd0] sm:$0xff]  }
  0x70   :  { %v3975_v5 = vld [vmem:[%s5690_s1 + $0xac] ss:$36 sps:$4 sm:$0xff]  }
  0x71   :  { %3249 = vmatpush3.bf16.msra.mxu0 %v4277_v15  ;;  %3289 = vmatpush3.bf16.msra.mxu1 %v4487_v54  ;;  %v3950_v15 = vld [vmem:[%s5690_s1 + $0x14] ss:$36 sps:$4 sm:$0xff]   ;;  %v5733_v54 = vld [vmem:[#allocation6_spill] sm:$0xff] }
  0x72   :  { %3250 = vmatprep.subr.bf16.mxu0 %v4289_v17  ;;  %3290 = vmatprep.subr.bf16.mxu1 %v4512_v60  ;;  %v3945_v17 = vld [vmem:[%s5690_s1 + $0x8] ss:$36 sps:$4 sm:$0xff]  }
  0x74   :  { %1379 = vmatmul.mubr.bf16.gmra.mrb[40].mxu1 %v3942_v7  ;;  %v3987_v7 = vld [vmem:[%s5691_s2 + $0xc] ss:$36 sps:$4 sm:$0xff]  }
  0x75   :  { %3251 = vmatpush3.bf16.msra.mxu0 %v4301_v19  ;;  %3291 = vmatpush3.bf16.msra.mxu1 %v4523_v62  ;;  %v3948_v19 = vld [vmem:[%s5690_s1 + $0x10] ss:$36 sps:$4 sm:$0xff]  }
  0x76   :  { %3252 = vmatprep.subr.bf16.mxu0 %v4313_v21  ;;  %3292 = vmatprep.subr.bf16.mxu1 %v4535_v32  ;;  %v3951_v21 = vld [vmem:[%s5690_s1 + $0x54] ss:$36 sps:$4 sm:$0xff]  }
  0x77   :  { %1386 = vmatprep.mubr.bf16.mxu1 %v2918_v11  ;;  %v4963_v11 = vld [vmem:[%s5688_s4 + $0x90] sm:$0xff]  }
  0x79   :  { %3253 = vmatpush3.bf16.msra.mxu0 %v4325_v23  ;;  %3293 = vmatpush3.bf16.msra.mxu1 %v4547_v34  ;;  %v3954_v23 = vld [vmem:[%s5690_s1 + $0x5c] ss:$36 sps:$4 sm:$0xff]  }
  0x7a   :  { %3254 = vmatprep.subr.bf16.mxu0 %v4337_v25  ;;  %3294 = vmatprep.subr.bf16.mxu1 %v4566_v58  ;;  %v3953_v25 = vld [vmem:[%s5690_s1 + $0x50] ss:$36 sps:$4 sm:$0xff]  }
  0x7c   :  { %1387 = vmatmul.mubr.bf16.gmra.mrb[44].mxu1 %v2917_v13  ;;  %v4969_v13 = vld [vmem:[%s5688_s4 + $0x58] sm:$0xff]  }
  0x7d   :  { %3255 = vmatpush3.bf16.msra.mxu0 %v4349_v27  ;;  %3295 = vmatpush3.bf16.msra.mxu1 %v4576_v35  ;;  %v3956_v27 = vld [vmem:[%s5690_s1 + $0x58] ss:$36 sps:$4 sm:$0xff]  }
  0x7e   :  { %3256 = vmatprep.subr.bf16.mxu0 %v4361_v29  ;;  %3296 = vmatprep.subr.bf16.mxu1 %v4588_v45  ;;  %v3957_v29 = vld [vmem:[%s5690_s1 + $0x9c] ss:$36 sps:$4 sm:$0xff]  }
  0x7f   :  { %1490 = vmatprep.mubr.bf16.mxu1 %v3950_v15  ;;  %v4975_v15 = vld [vmem:[%s5688_s4 + $0xd8] sm:$0xff]  }
  0x81   :  { %3257 = vmatpush3.bf16.msra.mxu0 %v4373_v31  ;;  %3297 = vmatpush3.bf16.msra.mxu1 %v4601_v47  ;;  %v3960_v31 = vld [vmem:[%s5690_s1 + $0xa4] ss:$36 sps:$4 sm:$0xff]  }
  0x82   :  { %3322 = vmatprep.subr.bf16.mxu0 %v4397_v37  ;;  %3742 = vmatprep.subr.bf16.mxu1 %v4627_v33  ;;  %v3962_v37 = vld [vmem:[%s5690_s1 + $0xa0] ss:$36 sps:$4 sm:$0xff]  }
  0x84   :  { %1427 = vmatmul.mubr.bf16.vlgmr.msra.gmra.mrb[40].mxu0 %v3945_v17  ;;  %1491 = vmatmul.mubr.bf16.vlgmr.msra.gmra.mrb[48].mxu1 %v3948_v19  ;;  %v3977_v17 = vld [vmem:[%s5690_s1 + $0xa8] ss:$36 sps:$4 sm:$0xff]   ;;  %v1158_v19 = vld [vmem:[%s5690_s1 + $0xf0] sm:$0x11] }
  0x85   :  { %3323 = vmatpush3.bf16.msra.mxu0 %v4409_v39  ;;  %3743 = vmatpush3.bf16.msra.mxu1 %v4627_v33  ;;  %v1157_v39 = vld [vmem:[%s5690_s1 + $0xe8] sm:$0x11] }
  0x86   :  { %3324 = vmatprep.subr.bf16.mxu0 %v4421_v41  ;;  %3744 = vmatprep.subr.bf16.mxu1 %v4632_v56  ;;  %v2922_v41 = vcombine.high %v1157_v39, %v1157_v39  ;;  %v2921_v48 = vcombine.low %v1157_v39, %v1157_v39  ;;  %v2923_v39 = vcombine.low %v1158_v19, %v1158_v19 }
  0x87   :  { %1434 = vmatprep.mubr.bf16.mxu0 %v3951_v21  ;;  %1498 = vmatprep.mubr.bf16.mxu1 %v3954_v23  ;;  %v4987_v21 = vld [vmem:[%s5688_s4 + $0x18] sm:$0xff]  }
  0x88   :  { %v4993_v23 = vld [vmem:[%s5688_s4 + $0x98] sm:$0xff]  }
  0x89   :  { %3325 = vmatpush3.bf16.msra.mxu0 %v4433_v43  ;;  %3745 = vmatpush3.bf16.msra.mxu1 %v4632_v56  ;;  %v2919_v43 = vcombine.low %v1156_v38, %v1156_v38  ;;  %v5029_v38 = vld [vmem:[%s5688_s4 + $0xe8] sm:$0xff]  }
  0x8a   :  { %3326 = vmatprep.subr.bf16.mxu0 %v4457_v49  ;;  %3746 = vmatprep.subr.bf16.mxu1 %v4651_v46  ;;  %v5730_v49 = vld [vmem:[#allocation3_spill] sm:$0xff]  ;;  %5737 = vst [vmem:[#allocation4_spill] sm:$0xff] %v5029_v38 }
  0x8c   :  { %1435 = vmatmul.mubr.bf16.gmra.mrb[44].mxu0 %v3953_v25  ;;  %1499 = vmatmul.mubr.bf16.gmra.mrb[52].mxu1 %v3956_v27  ;;  %v4999_v25 = vld [vmem:[%s5688_s4 + $0x60] sm:$0xff]  }
  0x8d   :  { %3327 = vmatpush3.bf16.msra.mxu0 %v4469_v51  ;;  %3747 = vmatpush3.bf16.msra.mxu1 %v4651_v46  ;;  %v3969_v51 = vld [vmem:[%s5690_s1 + $0x1c] ss:$36 sps:$4 sm:$0xff]  }
  0x8e   :  { %3328 = vmatprep.subr.bf16.mxu0 %v4481_v53  ;;  %3748 = vmatprep.subr.bf16.mxu1 %v4666_v4  ;;  %v5732_v53 = vld [vmem:[#allocation5_spill] sm:$0xff]  ;;  %v5005_v27 = vld [vmem:[%s5688_s4 + $0xe0] sm:$0xff]  }
  0x8f   :  { %1442 = vmatprep.mubr.bf16.mxu0 %v3957_v29  ;;  %1506 = vmatprep.mubr.bf16.mxu1 %v3960_v31  ;;  %5735 = vst [vmem:[#allocation2_spill] sm:$0xff] %v5005_v27  ;;  %v2924_v29 = vcombine.high %v1158_v19, %v1158_v19  ;;  %v5011_v31 = vld [vmem:[%s5688_s4 + $0x20] sm:$0xff]   ;;  %v3988_v19 = vld [vmem:[%s5691_s2 + $0x4c] ss:$36 sps:$4 sm:$0xff]  }
  0x91   :  { %3329 = vmatpush3.bf16.msra.mxu0 %v4493_v55  ;;  %3749 = vmatpush3.bf16.msra.mxu1 %v4666_v4  ;;  %v3967_v55 = vld [vmem:[%s5690_s1 + $0x18] ss:$36 sps:$4 sm:$0xff]  }
  0x92   :  { %3330 = vmatprep.subr.bf16.mxu0 %v4517_v61  ;;  %3750 = vmatprep.subr.bf16.mxu1 %v4684_v0 }
  0x94   :  { %1443 = vmatmul.mubr.bf16.gmra.mrb[48].mxu0 %v3959_v36  ;;  %1507 = vmatmul.mubr.bf16.gmra.mrb[56].mxu1 %v3962_v37  ;;  %v5017_v36 = vld [vmem:[%s5688_s4 + $0xa0] sm:$0xff]   ;;  %v5023_v37 = vld [vmem:[%s5688_s4 + $0x68] sm:$0xff]  }
  0x95   :  { %3331 = vmatpush3.bf16.msra.mxu0 %v4529_v63  ;;  %3751 = vmatpush3.bf16.msra.mxu1 %v4684_v0  ;;  %5736 = vst [vmem:[#allocation3_spill] sm:$0xff] %v5017_v36 }
  0x96   :  { %3332 = vmatprep.subr.bf16.mxu0 %v5729_v42  ;;  %3752 = vmatprep.subr.bf16.mxu1 %v4699_v12 }
  0x97   :  { %1450 = vmatprep.mubr.bf16.mxu0 %v2920_v40  ;;  %1514 = vmatprep.mubr.bf16.mxu1 %v2922_v41  ;;  %v5035_v40 = vld [vmem:[%s5688_s4 + $0x28] sm:$0xff]  }
  0x98   :  { %v5041_v41 = vld [vmem:[%s5688_s4 + $0xa8] sm:$0xff]  }
  0x99   :  { %3333 = vmatpush3.bf16.msra.mxu0 %v5730_v49  ;;  %3753 = vmatpush3.bf16.msra.mxu1 %v4699_v12  ;;  %5738 = vst [vmem:[#allocation5_spill] sm:$0xff] %v5041_v41 }
  0x9a   :  { %3334 = vmatprep.subr.bf16.mxu0 %v5731_v50  ;;  %3754 = vmatprep.subr.bf16.mxu1 %v4708_v14 }
  0x9c   :  { %1451 = vmatmul.mubr.bf16.gmra.mrb[52].mxu0 %v2919_v43  ;;  %1515 = vmatmul.mubr.bf16.gmra.mrb[60].mxu1 %v2921_v48  ;;  %v5047_v43 = vld [vmem:[%s5688_s4 + $0x70] sm:$0xff]  }
  0x9d   :  { %3335 = vmatpush3.bf16.msra.mxu0 %v5732_v53  ;;  %3755 = vmatpush3.bf16.msra.mxu1 %v4708_v14  ;;  %v5053_v48 = vld [vmem:[%s5688_s4 + $0xf0] sm:$0xff]  }
  0x9e   :  { %3336 = vmatprep.subr.bf16.mxu0 %v5733_v54  ;;  %3756 = vmatprep.subr.bf16.mxu1 %v4720_v18  ;;  %5739 = vst [vmem:[#allocation6_spill] sm:$0xff] %v5053_v48 }
  0x9f   :  { %1554 = vmatprep.mubr.bf16.mxu0 %v3969_v51  ;;  %3758 = vmatprep.mubr.bf16.mxu1 %v3970_v52  ;;  %v3984_v51 = vld [vmem:[%s5691_s2 + $0x4] ss:$36 sps:$4 sm:$0xff]   ;;  %v5062_v52 = vld [vmem:[%s5688_s4 + $0x30] sm:$0xff]  }
  0xa1   :  { %3337 = vmatpush3.bf16.msra.mxu0 %v5734_v10  ;;  %3757 = vmatpush3.bf16.msra.mxu1 %v4720_v18 }
  0xa2   :  { %3374 = vmatprep.subr.bf16.mxu0 %v4879_v59  ;;  %3414 = vmatprep.subr.bf16.mxu1 %v4885_v2 }
  0xa4   :  { %1555 = vmatmul.mubr.bf16.vlgmr.msra.gmra.mrb[56].mxu0 %v3967_v55  ;;  %3759 = vmatmul.mubr.bf16.vlgmr.msra.gmra.mrb[64].mxu1 %v3971_v8  ;;  %v5068_v55 = vld [vmem:[%s5688_s4 + $0xb0] sm:$0xff]   ;;  %v5074_v8 = vld [vmem:[%s5688_s4 + $0x78] sm:$0xff]  }
  0xa5   :  { %3375 = vmatpush3.bf16.msra.mxu0 %v4897_v44  ;;  %3415 = vmatpush3.bf16.msra.mxu1 %v4903_v6  ;;  %5740 = vst [vmem:[#allocation7_spill] sm:$0xff] %v5068_v55 }
  0xa6   :  { %3376 = vmatprep.subr.bf16.mxu0 %v4909_v20  ;;  %3416 = vmatprep.subr.bf16.mxu1 %v4915_v22 }
  0xa7   :  { %1562 = vmatprep.mubr.bf16.mxu0 %v3972_v57  ;;  %3762 = vmatprep.mubr.bf16.mxu1 %v3978_v16  ;;  %v5080_v57 = vld [vmem:[%s5688_s4 + $0xf8] sm:$0xff]   ;;  %v3982_v16 = vld [vmem:[%s5691_s2] ss:$36 sps:$4 sm:$0xff]  }
  0xa8   :  { %5741 = vst [vmem:[#allocation8_spill] sm:$0xff] %v5080_v57 }
  0xa9   :  { %3377 = vmatpush3.bf16.msra.mxu0 %v4927_v28  ;;  %3417 = vmatpush3.bf16.msra.mxu1 %v4933_v1 }
  0xaa   :  { %3378 = vmatprep.subr.bf16.mxu0 %v4939_v30  ;;  %3418 = vmatprep.subr.bf16.mxu1 %v4945_v3 }
  0xac   :  { %1563 = vmatmul.mubr.bf16.gmra.mrb[60].mxu0 %v3974_v24  ;;  %3763 = vmatmul.mubr.bf16.gmra.mrb[68].mxu1 %v3979_v26  ;;  %v3985_v24 = vld [vmem:[%s5691_s2 + $0x8] ss:$36 sps:$4 sm:$0xff]   ;;  %v5092_v26 = vld [vmem:[%s5688_s4 + $0x38] sm:$0xff]  }
  0xad   :  { %3379 = vmatpush3.bf16.msra.mxu0 %v4957_v9  ;;  %3419 = vmatpush3.bf16.msra.mxu1 %v4963_v11 }
  0xae   :  { %3380 = vmatprep.subr.bf16.mxu0 %v4969_v13  ;;  %3420 = vmatprep.subr.bf16.mxu1 %v4975_v15 }
  0xaf   :  { %1570 = vmatprep.mubr.bf16.mxu0 %v3975_v5  ;;  %1951 = vmatprep.mubr.bf16.mxu1 %v3987_v7  ;;  %v5098_v5 = vld [vmem:[%s5688_s4 + $0xb8] sm:$0xff]   ;;  %v5104_v7 = vld [vmem:[%s5688_s4 + $0x140] sm:$0xff]  }
  0xb0   :  { %5742 = vst [vmem:[#allocation9_spill] sm:$0xff] %v5098_v5 }
  0xb1   :  { %3381 = vmatpush3.bf16.msra.mxu0 %v4987_v21  ;;  %3421 = vmatpush3.bf16.msra.mxu1 %v4993_v23 }
  0xb2   :  { %3382 = vmatprep.subr.bf16.mxu0 %v4999_v25  ;;  %3422 = vmatprep.subr.bf16.mxu1 %v5005_v27 }
  0xb4   :  { %1571 = vmatmul.mubr.bf16.gmra.mrb[64].mxu0 %v3977_v17  ;;  %v5110_v17 = vld [vmem:[%s5688_s4 + $0x1c0] sm:$0xff]  }
  0xb5   :  { %3383 = vmatpush3.bf16.msra.mxu0 %v5011_v31  ;;  %3423 = vmatpush3.bf16.msra.mxu1 %v5017_v36  ;;  %5743 = vst [vmem:[#allocation10_spill] sm:$0xff] %v5110_v17 }
  0xb6   :  { %3384 = vmatprep.subr.bf16.mxu0 %v5023_v37  ;;  %3424 = vmatprep.subr.bf16.mxu1 %v5029_v38  ;;  %v1681_v38 = vld [vmem:[%s5691_s2 + $0xe0] sm:$0x11] }
  0xb7   :  { %1578 = vmatprep.mubr.bf16.mxu0 %v2924_v29  ;;  %v3990_v29 = vld [vmem:[%s5691_s2 + $0x54] ss:$36 sps:$4 sm:$0xff]   ;;  %v2956_v36 = vcombine.high %v1681_v38, %v1681_v38 }
  0xb9   :  { %3385 = vmatpush3.bf16.msra.mxu0 %v5035_v40  ;;  %3425 = vmatpush3.bf16.msra.mxu1 %v5041_v41  ;;  %v1680_v41 = vld [vmem:[%s5691_s2 + $0xd8] sm:$0x11] }
  0xba   :  { %3386 = vmatprep.subr.bf16.mxu0 %v5047_v43  ;;  %3426 = vmatprep.subr.bf16.mxu1 %v5053_v48  ;;  %v5194_v48 = vld [vmem:[%s5688_s4 + $0x158] sm:$0xff]   ;;  %v2953_v27 = vcombine.low %v1680_v41, %v1680_v41 }
  0xbc   :  { %1579 = vmatmul.mubr.bf16.gmra.mrb[68].mxu0 %v2923_v39  ;;  %v5122_v39 = vld [vmem:[%s5688_s4 + $0x100] sm:$0xff]  }
  0xbd   :  { %3387 = vmatpush3.bf16.msra.mxu0 %v5062_v52  ;;  %3427 = vmatpush3.bf16.msra.mxu1 %v5068_v55  ;;  %v5182_v55 = vld [vmem:[%s5688_s4 + $0x110] sm:$0xff]  }
  0xbe   :  { %3388 = vmatprep.subr.bf16.mxu0 %v5074_v8  ;;  %3428 = vmatprep.subr.bf16.mxu1 %v5080_v57  ;;  %v3994_v57 = vld [vmem:[%s5691_s2 + $0x94] ss:$36 sps:$4 sm:$0xff]  }
  0xbf   :  { %1887 = vmatprep.mubr.bf16.mxu0 %v3984_v51  ;;  %v5128_v51 = vld [vmem:[%s5688_s4 + $0x180] sm:$0xff]  }
  0xc0   :  { %5744 = vst [vmem:[#allocation11_spill] sm:$0xff] %v5128_v51 }
  0xc1   :  { %3389 = vmatpush3.bf16.msra.mxu0 %v5092_v26  ;;  %3429 = vmatpush3.bf16.msra.mxu1 %v5098_v5  ;;  %v5152_v5 = vld [vmem:[%s5688_s4 + $0x108] sm:$0xff]  }
  0xc2   :  { %3454 = vmatprep.subr.bf16.mxu0 %v5104_v7  ;;  %3494 = vmatprep.subr.bf16.mxu1 %v5110_v17  ;;  %v5134_v17 = vld [vmem:[%s5688_s4 + $0x148] sm:$0xff]  }
  0xc4   :  { %1888 = vmatmul.mubr.bf16.vlgmr.msra.gmra.mrb[72].mxu0 %v3982_v16  ;;  %1952 = vmatmul.mubr.bf16.vlgmr.msra.gmra.mrb[72].mxu1 %v3985_v24  ;;  %v5140_v16 = vld [vmem:[%s5688_s4 + $0x1c8] sm:$0xff]  }
  0xc5   :  { %3455 = vmatpush3.bf16.msra.mxu0 %v5122_v39  ;;  %3495 = vmatpush3.bf16.msra.mxu1 %v5128_v51  ;;  %5745 = vst [vmem:[#allocation12_spill] sm:$0xff] %v5140_v16  ;;  %v3992_v24 = vld [vmem:[%s5691_s2 + $0x48] ss:$36 sps:$4 sm:$0xff]   ;;  %v3993_v51 = vld [vmem:[%s5691_s2 + $0x50] ss:$36 sps:$4 sm:$0xff]  }
  0xc6   :  { %3456 = vmatprep.subr.bf16.mxu0 %v5134_v17  ;;  %3496 = vmatprep.subr.bf16.mxu1 %v5140_v16  ;;  %v5170_v16 = vld [vmem:[%s5688_s4 + $0x1d0] sm:$0xff]  }
  0xc7   :  { %1895 = vmatprep.mubr.bf16.mxu0 %v3988_v19  ;;  %1959 = vmatprep.mubr.bf16.mxu1 %v3990_v29  ;;  %v5158_v19 = vld [vmem:[%s5688_s4 + $0x188] sm:$0xff]   ;;  %v5164_v29 = vld [vmem:[%s5688_s4 + $0x150] sm:$0xff]   ;;  %5747 = vst [vmem:[#allocation14_spill] sm:$0xff] %v5170_v16 }
  0xc8   :  { %5746 = vst [vmem:[#allocation13_spill] sm:$0xff] %v5158_v19 }
  0xc9   :  { %3457 = vmatpush3.bf16.msra.mxu0 %v5152_v5  ;;  %3497 = vmatpush3.bf16.msra.mxu1 %v5158_v19  ;;  %v3996_v19 = vld [vmem:[%s5691_s2 + $0x9c] ss:$36 sps:$4 sm:$0xff]  }
  0xca   :  { %3458 = vmatprep.subr.bf16.mxu0 %v5164_v29  ;;  %3498 = vmatprep.subr.bf16.mxu1 %v5170_v16  ;;  %v5188_v16 = vld [vmem:[%s5688_s4 + $0x190] sm:$0xff]  }
  0xcb   :  { %5748 = vst [vmem:[#allocation15_spill] sm:$0xff] %v5188_v16 }
  0xcc   :  { %1896 = vmatmul.mubr.bf16.gmra.mrb[76].mxu0 %v3992_v24  ;;  %1960 = vmatmul.mubr.bf16.gmra.mrb[76].mxu1 %v3993_v51  ;;  %v5200_v51 = vld [vmem:[%s5688_s4 + $0x1d8] sm:$0xff]   ;;  %v3998_v24 = vld [vmem:[%s5691_s2 + $0x90] ss:$36 sps:$4 sm:$0xff]  }
  0xcd   :  { %3459 = vmatpush3.bf16.msra.mxu0 %v5182_v55  ;;  %3499 = vmatpush3.bf16.msra.mxu1 %v5188_v16  ;;  %5749 = vst [vmem:[#allocation16_spill] sm:$0xff] %v5200_v51  ;;  %v3999_v16 = vld [vmem:[%s5691_s2 + $0x98] ss:$36 sps:$4 sm:$0xff]  }
  0xce   :  { %3460 = vmatprep.subr.bf16.mxu0 %v5194_v48  ;;  %3500 = vmatprep.subr.bf16.mxu1 %v5200_v51  ;;  %v2954_v51 = vcombine.high %v1680_v41, %v1680_v41 }
  0xcf   :  { %1903 = vmatprep.mubr.bf16.mxu0 %v3994_v57  ;;  %1967 = vmatprep.mubr.bf16.mxu1 %v3996_v19  ;;  %v5218_v57 = vld [vmem:[%s5688_s4 + $0x118] sm:$0xff]  }
  0xd0   :  { %v5224_v19 = vld [vmem:[%s5688_s4 + $0x198] sm:$0xff]  }
  0xd1   :  { %3461 = vmatpush3.bf16.msra.mxu0 %v5218_v57  ;;  %5750 = vst [vmem:[#allocation17_spill] sm:$0xff] %v5224_v19  ;;  %3501 = vmatpush3.bf16.msra.mxu1 %v5224_v19  ;;  %v2955_v19 = vcombine.low %v1681_v38, %v1681_v38 }
  0xd2   :  { %3462 = vmatprep.subr.bf16.mxu0 %v4512_v60  ;;  %3502 = vmatprep.subr.bf16.mxu1 %v4517_v61  ;;  %v4006_v60 = vld [vmem:[%s5691_s2 + $0x14] ss:$36 sps:$4 sm:$0xff]   ;;  %v4009_v61 = vld [vmem:[%s5691_s2 + $0x1c] ss:$36 sps:$4 sm:$0xff]  }
  0xd4   :  { %1904 = vmatmul.mubr.bf16.gmra.mrb[80].mxu0 %v3998_v24  ;;  %1968 = vmatmul.mubr.bf16.gmra.mrb[80].mxu1 %v3999_v16 }
  0xd5   :  { %3463 = vmatpush3.bf16.msra.mxu0 %v4523_v62  ;;  %3503 = vmatpush3.bf16.msra.mxu1 %v4529_v63  ;;  %v4004_v62 = vld [vmem:[%s5691_s2 + $0x10] ss:$36 sps:$4 sm:$0xff]   ;;  %v4007_v63 = vld [vmem:[%s5691_s2 + $0x18] ss:$36 sps:$4 sm:$0xff]  }
  0xd6   :  { %3464 = vmatprep.subr.bf16.mxu0 %v4535_v32  ;;  %3504 = vmatprep.subr.bf16.mxu1 %v5729_v42  ;;  %v4010_v32 = vld [vmem:[%s5691_s2 + $0x5c] ss:$36 sps:$4 sm:$0xff]  }
  0xd7   :  { %1911 = vmatprep.mubr.bf16.mxu0 %v2954_v51  ;;  %1975 = vmatprep.mubr.bf16.mxu1 %v2956_v36 }
  0xd9   :  { %3465 = vmatpush3.bf16.msra.mxu0 %v4547_v34  ;;  %3505 = vmatpush3.bf16.msra.mxu1 %v5730_v49  ;;  %v4013_v34 = vld [vmem:[%s5691_s2 + $0x64] ss:$36 sps:$4 sm:$0xff]  }
  0xda   :  { %3466 = vmatprep.subr.bf16.mxu0 %v4566_v58  ;;  %3506 = vmatprep.subr.bf16.mxu1 %v5731_v50  ;;  %v4015_v58 = vld [vmem:[%s5691_s2 + $0x60] ss:$36 sps:$4 sm:$0xff]   ;;  %v4021_v50 = vld [vmem:[%s5691_s2 + $0xa8] ss:$36 sps:$4 sm:$0xff]  }
  0xdb   :  { %v4018_v49 = vld [vmem:[%s5691_s2 + $0xa0] ss:$36 sps:$4 sm:$0xff]  }
  0xdc   :  { %1912 = vmatmul.mubr.bf16.gmra.mrb[84].mxu0 %v2953_v27  ;;  %1976 = vmatmul.mubr.bf16.gmra.mrb[84].mxu1 %v2955_v19 }
  0xdd   :  { %3467 = vmatpush3.bf16.msra.mxu0 %v4576_v35  ;;  %3507 = vmatpush3.bf16.msra.mxu1 %v5732_v53  ;;  %v4012_v35 = vld [vmem:[%s5691_s2 + $0x58] ss:$36 sps:$4 sm:$0xff]  }
  0xde   :  { %3468 = vmatprep.subr.bf16.mxu0 %v4588_v45  ;;  %3508 = vmatprep.subr.bf16.mxu1 %v5733_v54  ;;  %v4019_v45 = vld [vmem:[%s5691_s2 + $0xac] ss:$36 sps:$4 sm:$0xff]  }
  0xdf   :  { %2015 = vmatprep.mubr.bf16.mxu0 %v4006_v60  ;;  %2079 = vmatprep.mubr.bf16.mxu1 %v4009_v61 }
  0xe1   :  { %3469 = vmatpush3.bf16.msra.mxu0 %v4601_v47  ;;  %3509 = vmatpush3.bf16.msra.mxu1 %v5734_v10 }
  0xe2   :  { %3766 = vmatprep.subr.bf16.mxu0 %v4627_v33  ;;  %3546 = vmatprep.subr.bf16.mxu1 %v4879_v59 }
  0xe4   :  { %2016 = vmatmul.mubr.bf16.vlgmr.msra.gmra.mrb[88].mxu0 %v4004_v62  ;;  %2080 = vmatmul.mubr.bf16.vlgmr.msra.gmra.mrb[88].mxu1 %v4007_v63  ;;  %v4026_v63 = vld [vmem:[%s5691_s2 + $0x20] ss:$36 sps:$4 sm:$0xff]  }
  0xe5   :  { %3767 = vmatpush3.bf16.msra.mxu0 %v4627_v33  ;;  %3547 = vmatpush3.bf16.msra.mxu1 %v4897_v44  ;;  %v4016_v33 = vld [vmem:[%s5691_s2 + $0xa4] ss:$36 sps:$4 sm:$0xff]  }
  0xe6   :  { %3768 = vmatprep.subr.bf16.mxu0 %v4632_v56  ;;  %3548 = vmatprep.subr.bf16.mxu1 %v4909_v20  ;;  %v1682_v20 = vld [vmem:[%s5691_s2 + $0xe8] sm:$0x11] }
  0xe7   :  { %2023 = vmatprep.mubr.bf16.mxu0 %v4010_v32  ;;  %2087 = vmatprep.mubr.bf16.mxu1 %v4013_v34  ;;  %v2958_v36 = vcombine.high %v1682_v20, %v1682_v20  ;;  %v4027_v34 = vld [vmem:[%s5691_s2 + $0x68] ss:$36 sps:$4 sm:$0xff]  }
  0xe9   :  { %3769 = vmatpush3.bf16.msra.mxu0 %v4632_v56  ;;  %3549 = vmatpush3.bf16.msra.mxu1 %v4927_v28  ;;  %v1683_v28 = vld [vmem:[%s5691_s2 + $0xf0] sm:$0x11] }
  0xea   :  { %3770 = vmatprep.subr.bf16.mxu0 %v4651_v46  ;;  %3550 = vmatprep.subr.bf16.mxu1 %v4939_v30  ;;  %v2960_v38 = vcombine.high %v1683_v28, %v1683_v28 }
  0xec   :  { %2024 = vmatmul.mubr.bf16.gmra.mrb[92].mxu0 %v4012_v35  ;;  %2088 = vmatmul.mubr.bf16.gmra.mrb[92].mxu1 %v4015_v58  ;;  %v4028_v35 = vld [vmem:[%s5692_s3] ss:$36 sps:$4 sm:$0xff]   ;;  %v4031_v58 = vld [vmem:[%s5691_s2 + $0xb0] ss:$36 sps:$4 sm:$0xff]  }
  0xed   :  { %3771 = vmatpush3.bf16.msra.mxu0 %v4651_v46  ;;  %3551 = vmatpush3.bf16.msra.mxu1 %v4957_v9 }
  0xee   :  { %3772 = vmatprep.subr.bf16.mxu0 %v4666_v4  ;;  %3552 = vmatprep.subr.bf16.mxu1 %v4969_v13 }
  0xef   :  { %2031 = vmatprep.mubr.bf16.mxu0 %v4016_v33  ;;  %2095 = vmatprep.mubr.bf16.mxu1 %v4019_v45  ;;  %v4033_v33 = vld [vmem:[%s5692_s3 + $0x4c] ss:$36 sps:$4 sm:$0xff]  }
  0xf1   :  { %3773 = vmatpush3.bf16.msra.mxu0 %v4666_v4  ;;  %3553 = vmatpush3.bf16.msra.mxu1 %v4987_v21  ;;  %v2957_v21 = vcombine.low %v1682_v20, %v1682_v20 }
  0xf2   :  { %3774 = vmatprep.subr.bf16.mxu0 %v4684_v0  ;;  %3554 = vmatprep.subr.bf16.mxu1 %v4999_v25  ;;  %v2959_v25 = vcombine.low %v1683_v28, %v1683_v28 }
  0xf4   :  { %2032 = vmatmul.mubr.bf16.gmra.mrb[96].mxu0 %v4018_v49  ;;  %2096 = vmatmul.mubr.bf16.gmra.mrb[96].mxu1 %v4021_v50 }
  0xf5   :  { %3775 = vmatpush3.bf16.msra.mxu0 %v4684_v0  ;;  %3555 = vmatpush3.bf16.msra.mxu1 %v5011_v31 }
  0xf6   :  { %v3046_v47 = vpop.f32.mrb[0].mxu0  ;;  %3776 = vmatprep.subr.bf16.mxu0 %v4699_v12  ;;  %3556 = vmatprep.subr.bf16.mxu1 %v5023_v37 }
  0xf7   :  { %v3086_v56 = vpop.f32.mrb[0].mxu1  ;;  %v3047_v42 = vpop.f32.mrb[1].mxu0  ;;  %2039 = vmatprep.mubr.bf16.mxu0 %v2958_v36  ;;  %2103 = vmatprep.mubr.bf16.mxu1 %v2960_v38 }
  0xf8   :  { %v3048_v46 = vadd.f32 %v3047_v42, %v3046_v47  ;;  %v3087_v53 = vpop.f32.mrb[1].mxu1  ;;  %v3049_v54 = vpop.f32.mrb[2].mxu0 }
  0xf9   :  { %v3088_v10 = vadd.f32 %v3087_v53, %v3086_v56  ;;  %v3089_v59 = vpop.f32.mrb[2].mxu1  ;;  %v3050_v44 = vpop.f32.mrb[3].mxu0  ;;  %3777 = vmatpush3.bf16.msra.mxu0 %v4699_v12  ;;  %3557 = vmatpush3.bf16.msra.mxu1 %v5035_v40  ;;  %v4030_v12 = vld [vmem:[%s5692_s3 + $0x4] ss:$36 sps:$4 sm:$0xff]  }
  0xfa   :  { %v3051_v30 = vadd.f32 %v3050_v44, %v3049_v54  ;;  %v3090_v9 = vpop.f32.mrb[3].mxu1  ;;  %3778 = vmatprep.subr.bf16.mxu0 %v4708_v14  ;;  %3558 = vmatprep.subr.bf16.mxu1 %v5047_v43 }
  0xfb   :  { %v5303_v13 = vadd.f32 %v3088_v10, %v3048_v46  ;;  %v3091_v27 = vadd.f32 %v3090_v9, %v3089_v59  ;;  %v4043_v46 = vld [vmem:[%s5692_s3 + $0xc] ss:$36 sps:$4 sm:$0xff]  }
  0xfc   :  { %2040 = vmatmul.mubr.bf16.gmra.mrb[100].mxu0 %v2957_v21  ;;  %2104 = vmatmul.mubr.bf16.gmra.mrb[100].mxu1 %v2959_v25  ;;  %v5752_v9 = vld [vmem:[#allocation3_spill] sm:$0xff] }
  0xfd   :  { %v5305_v41 = vadd.f32 %v3091_v27, %v3051_v30  ;;  %3779 = vmatpush3.bf16.msra.mxu0 %v4708_v14  ;;  %3559 = vmatpush3.bf16.msra.mxu1 %v5062_v52  ;;  %v4127_v27 = vld [vmem:[%s5688_s4 + $0x120] sm:$0xff]  }
  0xfe   :  { %v3052_v4 = vpop.f32.mrb[4].mxu0  ;;  %3780 = vmatprep.subr.bf16.mxu0 %v4720_v18  ;;  %3560 = vmatprep.subr.bf16.mxu1 %v5074_v8 }
  0xff   :  { %v3092_v16 = vpop.f32.mrb[4].mxu1  ;;  %v3053_v51 = vpop.f32.mrb[5].mxu0  ;;  %3782 = vmatprep.mubr.bf16.mxu0 %v4026_v63  ;;  %2412 = vmatprep.mubr.bf16.mxu1 %v4030_v12  ;;  %v5755_v63 = vld [vmem:[#allocation6_spill] sm:$0xff]  ;;  %v4130_v12 = vld [vmem:[%s5688_s4 + $0x170] sm:$0xff]  }
 0x100   :  { %v3054_v24 = vadd.f32 %v3053_v51, %v3052_v4  ;;  %v3093_v19 = vpop.f32.mrb[5].mxu1  ;;  %v3055_v0 = vpop.f32.mrb[6].mxu0 }
 0x101   :  { %v3094_v31 = vadd.f32 %v3093_v19, %v3092_v16  ;;  %v3095_v37 = vpop.f32.mrb[6].mxu1  ;;  %v3056_v60 = vpop.f32.mrb[7].mxu0  ;;  %3781 = vmatpush3.bf16.msra.mxu0 %v4720_v18  ;;  %3561 = vmatpush3.bf16.msra.mxu1 %v5092_v26 }
 0x102   :  { %v3057_v61 = vadd.f32 %v3056_v60, %v3055_v0  ;;  %v3096_v62 = vpop.f32.mrb[7].mxu1  ;;  %3586 = vmatprep.subr.bf16.mxu0 %v4885_v2  ;;  %3626 = vmatprep.subr.bf16.mxu1 %v5104_v7 }
 0x103   :  { %v5321_v40 = vadd.f32 %v3094_v31, %v3054_v24  ;;  %v3097_v32 = vadd.f32 %v3096_v62, %v3095_v37  ;;  %v5754_v24 = vld [vmem:[#allocation5_spill] sm:$0xff]  ;;  %v4129_v37 = vld [vmem:[%s5688_s4 + $0x128] sm:$0xff]  }
 0x104   :  { %3783 = vmatmul.mubr.bf16.vlgmr.msra.gmra.mrb[104].mxu0 %v4027_v34  ;;  %2413 = vmatmul.mubr.bf16.vlgmr.msra.gmra.mrb[104].mxu1 %v4028_v35  ;;  %v4046_v34 = vld [vmem:[%s5692_s3 + $0x14] ss:$36 sps:$4 sm:$0xff]  }
 0x105   :  { %v5326_v43 = vadd.f32 %v3097_v32, %v3057_v61  ;;  %3587 = vmatpush3.bf16.msra.mxu0 %v4903_v6  ;;  %3627 = vmatpush3.bf16.msra.mxu1 %v5122_v39  ;;  %v4032_v6 = vld [vmem:[%s5691_s2 + $0xf8] ss:$0 sps:$4 sm:$0x11]   ;;  %v4035_v39 = vld [vmem:[%s5692_s3 + $0x48] ss:$36 sps:$4 sm:$0xff]  }
 0x106   :  { %v3058_v14 = vpop.f32.mrb[8].mxu0  ;;  %3588 = vmatprep.subr.bf16.mxu0 %v4915_v22  ;;  %3628 = vmatprep.subr.bf16.mxu1 %v5134_v17  ;;  %v4036_v17 = vld [vmem:[%s5692_s3 + $0x94] ss:$36 sps:$4 sm:$0xff]  }
 0x107   :  { %v3098_v52 = vpop.f32.mrb[8].mxu1  ;;  %v3059_v8 = vpop.f32.mrb[9].mxu0  ;;  %3786 = vmatprep.mubr.bf16.mxu0 %v4031_v58  ;;  %2420 = vmatprep.mubr.bf16.mxu1 %v4033_v33  ;;  %v5757_v58 = vld [vmem:[#allocation8_spill] sm:$0xff]  ;;  %v4132_v33 = vld [vmem:[%s5688_s4 + $0x178] sm:$0xff]  }
 0x108   :  { %v3060_v18 = vadd.f32 %v3059_v8, %v3058_v14  ;;  %v3099_v45 = vpop.f32.mrb[9].mxu1  ;;  %v3061_v26 = vpop.f32.mrb[10].mxu0 }
 0x109   :  { %v3100_v2 = vadd.f32 %v3099_v45, %v3098_v52  ;;  %v3101_v7 = vpop.f32.mrb[10].mxu1  ;;  %v3062_v47 = vpop.f32.mrb[11].mxu0  ;;  %3589 = vmatpush3.bf16.msra.mxu0 %v4933_v1  ;;  %3629 = vmatpush3.bf16.msra.mxu1 %v5152_v5  ;;  %v4131_v52 = vld [vmem:[%s5688_s4 + $0x130] sm:$0xff]  }
 0x10a   :  { %v3063_v56 = vadd.f32 %v3062_v47, %v3061_v26  ;;  %v3102_v42 = vpop.f32.mrb[11].mxu1  ;;  %3590 = vmatprep.subr.bf16.mxu0 %v4945_v3  ;;  %3630 = vmatprep.subr.bf16.mxu1 %v5164_v29  ;;  %v4041_v47 = vld [vmem:[%s5692_s3 + $0x8] ss:$36 sps:$4 sm:$0xff]  }
 0x10b   :  { %v5349_v49 = vadd.f32 %v3100_v2, %v3060_v18  ;;  %v3103_v50 = vadd.f32 %v3102_v42, %v3101_v7  ;;  %v5758_v42 = vld [vmem:[#allocation9_spill] sm:$0xff] }
 0x10c   :  { %3787 = vmatmul.mubr.bf16.gmra.mrb[108].mxu0 %v4032_v6  ;;  %2421 = vmatmul.mubr.bf16.gmra.mrb[108].mxu1 %v4035_v39 }
 0x10d   :  { %v5358_v22 = vadd.f32 %v3103_v50, %v3063_v56  ;;  %3591 = vmatpush3.bf16.msra.mxu0 %v4963_v11  ;;  %3631 = vmatpush3.bf16.msra.mxu1 %v5182_v55  ;;  %v4038_v11 = vld [vmem:[%s5692_s3 + $0x90] ss:$36 sps:$4 sm:$0xff]   ;;  %v2205_v55 = vld [vmem:[%s5692_s3 + $0xd8] sm:$0x11] }
 0x10e   :  { %v3064_v1 = vpop.f32.mrb[12].mxu0  ;;  %3592 = vmatprep.subr.bf16.mxu0 %v4975_v15  ;;  %3632 = vmatprep.subr.bf16.mxu1 %v5194_v48  ;;  %v5751_v15 = vld [vmem:[#allocation2_spill] sm:$0xff]  ;;  %v2990_v30 = vcombine.high %v2205_v55, %v2205_v55  ;;  %v2989_v51 = vcombine.low %v2205_v55, %v2205_v55  ;;  %v4044_v56 = vld [vmem:[%s5692_s3 + $0x10] ss:$36 sps:$4 sm:$0xff]  }
 0x10f   :  { %v3104_v53 = vpop.f32.mrb[12].mxu1  ;;  %v3065_v5 = vpop.f32.mrb[13].mxu0  ;;  %2428 = vmatprep.mubr.bf16.mxu1 %v4036_v17  ;;  %2476 = vmatprep.mubr.bf16.mxu0 %v4043_v46  ;;  %v4126_v48 = vld [vmem:[%s5688_s4 + $0x160] sm:$0xff]   ;;  %v4133_v17 = vld [vmem:[%s5688_s4 + $0x138] sm:$0xff]  }
 0x110   :  { %v3105_v3 = vpop.f32.mrb[13].mxu1  ;;  %v3066_v29 = vadd.f32 %v3065_v5, %v3064_v1  ;;  %v3067_v10 = vpop.f32.mrb[14].mxu0  ;;  %v5759_v5 = vld [vmem:[#allocation10_spill] sm:$0xff] }
 0x111   :  { %v3106_v54 = vadd.f32 %v3105_v3, %v3104_v53  ;;  %v3107_v59 = vpop.f32.mrb[14].mxu1  ;;  %v3068_v44 = vpop.f32.mrb[15].mxu0  ;;  %3593 = vmatpush3.bf16.msra.mxu0 %v4993_v23  ;;  %3633 = vmatpush3.bf16.msra.mxu1 %v5218_v57  ;;  %v5753_v23 = vld [vmem:[#allocation4_spill] sm:$0xff]  ;;  %v4128_v57 = vld [vmem:[%s5688_s4 + $0x168] sm:$0xff]   ;;  %v4134_v3 = vld [vmem:[%s5688_s4 + $0x200] sm:$0xff]  }
 0x112   :  { %v3108_v20 = vpop.f32.mrb[15].mxu1  ;;  %3594 = vmatprep.subr.bf16.mxu0 %v5751_v15  ;;  %3634 = vmatprep.subr.bf16.mxu1 %v4126_v48  ;;  %v4050_v10 = vld [vmem:[%s5692_s3 + $0x5c] ss:$36 sps:$4 sm:$0xff]   ;;  %v5760_v44 = vld [vmem:[#allocation11_spill] sm:$0xff] }
 0x113   :  { %v5379_v28 = vadd.f32 %v3106_v54, %v3066_v29  ;;  %v4047_v29 = vld [vmem:[%s5692_s3 + $0x54] ss:$36 sps:$4 sm:$0xff]  }
 0x114   :  { %2429 = vmatmul.mubr.bf16.gmra.mrb[112].mxu1 %v4038_v11  ;;  %v5761_v20 = vld [vmem:[#allocation12_spill] sm:$0xff] }
 0x115   :  { %3595 = vmatpush3.bf16.msra.mxu0 %v5752_v9  ;;  %3635 = vmatpush3.bf16.msra.mxu1 %v4127_v27 }
 0x116   :  { %v3126_v36 = vpop.f32.mrb[16].mxu0  ;;  %3596 = vmatprep.subr.bf16.mxu0 %v5753_v23  ;;  %3636 = vmatprep.subr.bf16.mxu1 %v4128_v57  ;;  %v4052_v23 = vld [vmem:[%s5692_s3 + $0x58] ss:$36 sps:$4 sm:$0xff]  }
 0x117   :  { %v3127_v38 = vpop.f32.mrb[17].mxu0  ;;  %v3166_v4 = vpop.f32.mrb[16].mxu1  ;;  %2436 = vmatprep.mubr.bf16.mxu1 %v2990_v30  ;;  %v4135_v30 = vld [vmem:[%s5688_s4 + $0x208] sm:$0xff]   ;;  %v5762_v57 = vld [vmem:[#allocation13_spill] sm:$0xff] }
 0x118   :  { %v3128_v21 = vadd.f32 %v3127_v38, %v3126_v36  ;;  %v3129_v25 = vpop.f32.mrb[18].mxu0  ;;  %v3167_v16 = vpop.f32.mrb[17].mxu1  ;;  %v4049_v36 = vld [vmem:[%s5692_s3 + $0x50] ss:$36 sps:$4 sm:$0xff]  }
 0x119   :  { %3597 = vmatpush3.bf16.msra.mxu0 %v5754_v24  ;;  %v3130_v19 = vpop.f32.mrb[19].mxu0  ;;  %v3168_v0 = vadd.f32 %v3167_v16, %v3166_v4  ;;  %v3169_v31 = vpop.f32.mrb[18].mxu1  ;;  %3637 = vmatpush3.bf16.msra.mxu1 %v4129_v37  ;;  %v5763_v24 = vld [vmem:[#allocation14_spill] sm:$0xff] }
 0x11a   :  { %v968_v60 = vadd.f32 %v3128_v21, %v5303_v13  ;;  %v3131_v61 = vadd.f32 %v3130_v19, %v3129_v25  ;;  %v3170_v62 = vpop.f32.mrb[19].mxu1  ;;  %3598 = vmatprep.subr.bf16.mxu0 %v5755_v63  ;;  %3638 = vmatprep.subr.bf16.mxu1 %v4130_v12  ;;  %v5756_v13 = vld [vmem:[#allocation7_spill] sm:$0xff]  ;;  %v4136_v19 = vld [vmem:[%s5688_s4 + $0x210] sm:$0xff]  }
 0x11b   :  { %v3171_v32 = vadd.f32 %v3170_v62, %v3169_v31  ;;  %v4056_v37 = vld [vmem:[%s5692_s3 + $0xa4] ss:$36 sps:$4 sm:$0xff]   ;;  %v5765_v63 = vld [vmem:[#allocation16_spill] sm:$0xff] }
 0x11c   :  { %v971_v35 = vadd.f32 %v3131_v61, %v5305_v41  ;;  %2437 = vmatmul.mubr.bf16.gmra.mrb[116].mxu1 %v2989_v51  ;;  %v5408_v14 = vadd.f32 %v3168_v0, %v968_v60  ;;  %v4053_v0 = vld [vmem:[%s5692_s3 + $0x9c] ss:$36 sps:$4 sm:$0xff]   ;;  %v5764_v61 = vld [vmem:[#allocation15_spill] sm:$0xff] }
 0x11d   :  { %3599 = vmatpush3.bf16.msra.mxu0 %v5756_v13  ;;  %3639 = vmatpush3.bf16.msra.mxu1 %v4131_v52  ;;  %v2206_v13 = vld [vmem:[%s5692_s3 + $0xe0] sm:$0x11] }
 0x11e   :  { %v3132_v8 = vpop.f32.mrb[20].mxu0  ;;  %3600 = vmatprep.subr.bf16.mxu0 %v5757_v58  ;;  %3640 = vmatprep.subr.bf16.mxu1 %v4132_v33  ;;  %v5418_v18 = vadd.f32 %v3171_v32, %v971_v35  ;;  %v4055_v35 = vld [vmem:[%s5692_s3 + $0x98] ss:$36 sps:$4 sm:$0xff]   ;;  %v4058_v33 = vld [vmem:[%s5692_s3 + $0xa0] ss:$36 sps:$4 sm:$0xff]  }
 0x11f   :  { %v3133_v41 = vpop.f32.mrb[21].mxu0  ;;  %v3172_v45 = vpop.f32.mrb[20].mxu1  ;;  %2540 = vmatprep.mubr.bf16.mxu1 %v4046_v34 }
 0x120   :  { %v3134_v26 = vadd.f32 %v3133_v41, %v3132_v8  ;;  %v3135_v2 = vpop.f32.mrb[22].mxu0  ;;  %v3173_v7 = vpop.f32.mrb[21].mxu1  ;;  %v2207_v41 = vld [vmem:[%s5692_s3 + $0xe8] sm:$0x11] }
 0x121   :  { %3601 = vmatpush3.bf16.msra.mxu0 %v5758_v42  ;;  %v3136_v50 = vpop.f32.mrb[23].mxu0  ;;  %v3174_v6 = vadd.f32 %v3173_v7, %v3172_v45  ;;  %v3175_v39 = vpop.f32.mrb[22].mxu1  ;;  %3641 = vmatpush3.bf16.msra.mxu1 %v4133_v17  ;;  %v5766_v45 = vld [vmem:[#allocation17_spill] sm:$0xff]  ;;  %v4139_v42 = vld [vmem:[%s5688_s4 + $0x220] sm:$0xff]  }
 0x122   :  { %v976_v46 = vadd.f32 %v3134_v26, %v5321_v40  ;;  %v3137_v1 = vadd.f32 %v3136_v50, %v3135_v2  ;;  %v3176_v53 = vpop.f32.mrb[23].mxu1  ;;  %3666 = vmatprep.subr.bf16.mxu0 %v5759_v5  ;;  %3790 = vmatprep.subr.bf16.mxu1 %v4134_v3  ;;  %v2992_v50 = vcombine.high %v2206_v13, %v2206_v13 }
 0x123   :  { %v3177_v54 = vadd.f32 %v3176_v53, %v3175_v39  ;;  %v2994_v39 = vcombine.high %v2207_v41, %v2207_v41  ;;  %v4142_v53 = vld [vmem:[%s5688_s4 + $0x228] sm:$0xff]  }
 0x124   :  { %v979_v40 = vadd.f32 %v3137_v1, %v5326_v43  ;;  %2477 = vmatmul.mubr.bf16.vlgmr.msra.gmra.mrb[112].mxu0 %v4041_v47  ;;  %2541 = vmatmul.mubr.bf16.vlgmr.msra.gmra.mrb[120].mxu1 %v4044_v56  ;;  %v5442_v59 = vadd.f32 %v3174_v6, %v976_v46  ;;  %v4138_v56 = vld [vmem:[%s5688_s4 + $0x1e0] sm:$0xff]   ;;  %v4141_v46 = vld [vmem:[%s5688_s4 + $0x1e8] sm:$0xff]  }
 0x125   :  { %3667 = vmatpush3.bf16.msra.mxu0 %v5760_v44  ;;  %3791 = vmatpush3.bf16.msra.mxu1 %v4134_v3 }
 0x126   :  { %v3138_v11 = vpop.f32.mrb[24].mxu0  ;;  %3668 = vmatprep.subr.bf16.mxu0 %v5761_v20  ;;  %2484 = vmatprep.mubr.bf16.mxu0 %v4047_v29  ;;  %v5446_v55 = vadd.f32 %v3177_v54, %v979_v40  ;;  %v2991_v54 = vcombine.low %v2206_v13, %v2206_v13  ;;  %v4143_v20 = vld [vmem:[%s5688_s4 + $0x1a8] sm:$0xff]   ;;  %v4070_v13 = vld [vmem:[%s5692_s3 + $0x60] ss:$36 sps:$4 sm:$0xff]  }
 0x127   :  { %v3139_v15 = vpop.f32.mrb[25].mxu0  ;;  %v3178_v48 = vpop.f32.mrb[24].mxu1  ;;  %3792 = vmatprep.subr.bf16.mxu1 %v4135_v30  ;;  %2548 = vmatprep.mubr.bf16.mxu1 %v4050_v10  ;;  %v2993_v10 = vcombine.low %v2207_v41, %v2207_v41 }
 0x128   :  { %v3140_v43 = vadd.f32 %v3139_v15, %v3138_v11  ;;  %v3141_v9 = vpop.f32.mrb[26].mxu0  ;;  %v3179_v27 = vpop.f32.mrb[25].mxu1 }
 0x129   :  { %3669 = vmatpush3.bf16.msra.mxu0 %v5762_v57  ;;  %v3142_v38 = vpop.f32.mrb[27].mxu0  ;;  %v3180_v4 = vadd.f32 %v3179_v27, %v3178_v48  ;;  %v3181_v21 = vpop.f32.mrb[26].mxu1  ;;  %3793 = vmatpush3.bf16.msra.mxu1 %v4135_v30  ;;  %v4146_v57 = vld [vmem:[%s5688_s4 + $0x1b0] sm:$0xff]  }
 0x12a   :  { %v984_v25 = vadd.f32 %v3140_v43, %v5349_v49  ;;  %v3143_v16 = vadd.f32 %v3142_v38, %v3141_v9  ;;  %v3182_v51 = vpop.f32.mrb[27].mxu1  ;;  %3670 = vmatprep.subr.bf16.mxu0 %v5763_v24  ;;  %3794 = vmatprep.subr.bf16.mxu1 %v4136_v19  ;;  %v4144_v43 = vld [vmem:[%s5688_s4 + $0x1f0] sm:$0xff]   ;;  %v4065_v9 = vld [vmem:[%s5692_s3 + $0x1c] ss:$36 sps:$4 sm:$0xff]   ;;  %v4067_v24 = vld [vmem:[%s5692_s3 + $0x68] ss:$36 sps:$4 sm:$0xff]  }
 0x12b   :  { %v3183_v31 = vadd.f32 %v3182_v51, %v3181_v21  ;;  %v4147_v38 = vld [vmem:[%s5688_s4 + $0x1f8] sm:$0xff]  }
 0x12c   :  { %v987_v49 = vadd.f32 %v3143_v16, %v5358_v22  ;;  %2485 = vmatmul.mubr.bf16.gmra.mrb[116].mxu0 %v4049_v36  ;;  %2549 = vmatmul.mubr.bf16.gmra.mrb[124].mxu1 %v4052_v23  ;;  %v5470_v60 = vadd.f32 %v3180_v4, %v984_v25  ;;  %v4137_v22 = vld [vmem:[%s5688_s4 + $0x218] sm:$0xff]  }
 0x12d   :  { %3671 = vmatpush3.bf16.msra.mxu0 %v5764_v61  ;;  %3795 = vmatpush3.bf16.msra.mxu1 %v4136_v19  ;;  %v4148_v4 = vld [vmem:[%s5688_s4 + $0x238] sm:$0xff]  }
 0x12e   :  { %v3144_v62 = vpop.f32.mrb[28].mxu0  ;;  %3672 = vmatprep.subr.bf16.mxu0 %v5765_v63  ;;  %2492 = vmatprep.mubr.bf16.mxu0 %v4053_v0  ;;  %v5474_v12 = vadd.f32 %v3183_v31, %v987_v49  ;;  %v4063_v51 = vld [vmem:[%s5692_s3 + $0x18] ss:$36 sps:$4 sm:$0xff]   ;;  %v4068_v49 = vld [vmem:[%s5692_s3 + $0x64] ss:$36 sps:$4 sm:$0xff]  }
 0x12f   :  { %v3145_v32 = vpop.f32.mrb[29].mxu0  ;;  %v3184_v34 = vpop.f32.mrb[28].mxu1  ;;  %3796 = vmatprep.subr.bf16.mxu1 %v4137_v22  ;;  %2556 = vmatprep.mubr.bf16.mxu1 %v4056_v37  ;;  %v4149_v37 = vld [vmem:[%s5688_s4 + $0x1b8] sm:$0xff]   ;;  %v4074_v63 = vld [vmem:[%s5692_s3 + $0xb0] ss:$36 sps:$4 sm:$0xff]  }
 0x130   :  { %v3146_v52 = vadd.f32 %v3145_v32, %v3144_v62  ;;  %v3147_v8 = vpop.f32.mrb[30].mxu0  ;;  %v3185_v58 = vpop.f32.mrb[29].mxu1 }
 0x131   :  { %3673 = vmatpush3.bf16.msra.mxu0 %v5766_v45  ;;  %v3148_v26 = vpop.f32.mrb[31].mxu0  ;;  %v3186_v2 = vadd.f32 %v3185_v58, %v3184_v34  ;;  %3797 = vmatpush3.bf16.msra.mxu1 %v4137_v22  ;;  %v3187_v7 = vpop.f32.mrb[30].mxu1  ;;  %v4075_v8 = vld [vmem:[%s5692_s3 + $0xf8] ss:$0 sps:$4 sm:$0x11]  }
 0x132   :  { %v992_v47 = vadd.f32 %v3146_v52, %v5379_v28  ;;  %3674 = vmatprep.subr.bf16.mxu0 %v4138_v56  ;;  %3798 = vmatprep.subr.bf16.mxu1 %v4139_v42  ;;  %v3188_v6 = vpop.f32.mrb[31].mxu1  ;;  %v4140_v28 = vld [vmem:[%s5688_s4 + $0x1a0] sm:$0xff]   ;;  %v2208_v26 = vld [vmem:[%s5692_s3 + $0xf0] sm:$0x11]  ;;  %v4073_v7 = vld [vmem:[%s5692_s3 + $0xa8] ss:$36 sps:$4 sm:$0xff]  }
 0x134   :  { %2493 = vmatmul.mubr.bf16.gmra.mrb[120].mxu0 %v4055_v35  ;;  %2557 = vmatmul.mubr.bf16.gmra.mrb[128].mxu1 %v4058_v33  ;;  %v1056_v17 = vadd.f32 %v3186_v2, %v992_v47 }
 0x135   :  { %3675 = vmatpush3.bf16.msra.mxu0 %v4140_v28  ;;  %3799 = vmatpush3.bf16.msra.mxu1 %v4139_v42 }
 0x136   :  { %3676 = vmatprep.subr.bf16.mxu0 %v4141_v46  ;;  %2500 = vmatprep.mubr.bf16.mxu0 %v2992_v50  ;;  %v2996_v50 = vcombine.high %v2208_v26, %v2208_v26 }
 0x137   :  { %v3736_v1 = vpop.f32.mrb[32].mxu0  ;;  %3800 = vmatprep.subr.bf16.mxu1 %v4142_v53  ;;  %2564 = vmatprep.mubr.bf16.mxu1 %v2994_v39  ;;  %v3218_v5 = vpop.f32.mrb[32].mxu1 }
 0x138   :  { %v5509_v3 = vadd.f32 %v3736_v1, %v5442_v59  ;;  %v1095_v29 = vpop.f32.mrb[33].mxu0  ;;  %v3219_v40 = vpop.f32.mrb[33].mxu1  ;;  %v2995_v1 = vcombine.low %v2208_v26, %v2208_v26 }
 0x139   :  { %v5512_v44 = vadd.f32 %v1095_v29, %v5408_v14  ;;  %v3737_v11 = vpop.f32.mrb[34].mxu0  ;;  %3677 = vmatpush3.bf16.msra.mxu0 %v4143_v20  ;;  %3801 = vmatpush3.bf16.msra.mxu1 %v4142_v53  ;;  %v5517_v15 = vadd.f32 %v3219_v40, %v3218_v5  ;;  %v3221_v48 = vpop.f32.mrb[34].mxu1  ;;  %v4145_v14 = vld [vmem:[%s5688_s4 + $0x230] sm:$0xff]  }
 0x13a   :  { %v5520_v59 = vadd.f32 %v3737_v11, %v5446_v55  ;;  %v1098_v30 = vpop.f32.mrb[35].mxu0  ;;  %3678 = vmatprep.subr.bf16.mxu0 %v4144_v43  ;;  %3802 = vmatprep.subr.bf16.mxu1 %v4145_v14  ;;  %v3222_v27 = vpop.f32.mrb[35].mxu1  ;;  %v4066_v55 = vld [vmem:[%s5692_s3 + $0x20] ss:$36 sps:$4 sm:$0xff]  }
 0x13b   :  { %v5532_v36 = vadd.f32 %v1098_v30, %v5418_v18  ;;  %v5537_v23 = vadd.f32 %v3222_v27, %v3221_v48 }
 0x13c   :  { %2501 = vmatmul.mubr.bf16.gmra.mrb[124].mxu0 %v2991_v54  ;;  %2565 = vmatmul.mubr.bf16.gmra.mrb[132].mxu1 %v2993_v10 }
 0x13d   :  { %3679 = vmatpush3.bf16.msra.mxu0 %v4146_v57  ;;  %3803 = vmatpush3.bf16.msra.mxu1 %v4145_v14 }
 0x13e   :  { %3680 = vmatprep.subr.bf16.mxu0 %v4147_v38  ;;  %2604 = vmatprep.mubr.bf16.mxu0 %v4065_v9 }
 0x13f   :  { %v3740_v18 = vpop.f32.mrb[36].mxu0  ;;  %3804 = vmatprep.subr.bf16.mxu1 %v4148_v4  ;;  %3806 = vmatprep.mubr.bf16.mxu1 %v4066_v55  ;;  %v3224_v21 = vpop.f32.mrb[36].mxu1 }
 0x140   :  { %v5548_v25 = vadd.f32 %v3740_v18, %v1056_v17  ;;  %v1111_v16 = vpop.f32.mrb[37].mxu0  ;;  %v3225_v19 = vpop.f32.mrb[37].mxu1 }
 0x141   :  { %v5557_v0 = vadd.f32 %v1111_v16, %v5470_v60  ;;  %v3741_v31 = vpop.f32.mrb[38].mxu0  ;;  %3681 = vmatpush3.bf16.msra.mxu0 %v4149_v37  ;;  %3805 = vmatpush3.bf16.msra.mxu1 %v4148_v4  ;;  %v3226_v61 = vadd.f32 %v3225_v19, %v3224_v21  ;;  %v3227_v62 = vpop.f32.mrb[38].mxu1 }
 0x142   :  { %v1114_v32 = vpop.f32.mrb[39].mxu0  ;;  %v3228_v60 = vpop.f32.mrb[39].mxu1 }
 0x143   :  { %v5569_v34 = vadd.f32 %v1114_v32, %v5474_v12  ;;  %v3229_v35 = vadd.f32 %v3228_v60, %v3227_v62  ;;  %v4071_v12 = vld [vmem:[%s5692_s3 + $0xac] ss:$36 sps:$4 sm:$0xff]  }
 0x144   :  { %2605 = vmatmul.mubr.bf16.vlgmr.msra.gmra.mrb[128].mxu0 %v4063_v51  ;;  %3807 = vmatmul.mubr.bf16.vlgmr.msra.gmra.mrb[136].mxu1 %v4067_v24 }
 0x145   :  { %2612 = vmatprep.mubr.bf16.mxu0 %v4068_v49  ;;  %3810 = vmatprep.mubr.bf16.mxu1 %v4074_v63 }
 0x147   :  { %v3230_v22 = vpop.f32.mrb[40].mxu1 }
 0x148   :  { %v3231_v52 = vpop.f32.mrb[41].mxu1 }
 0x149   :  { %v3232_v58 = vadd.f32 %v3231_v52, %v3230_v22  ;;  %v3233_v33 = vpop.f32.mrb[42].mxu1 }
 0x14a   :  { %v3234_v41 = vpop.f32.mrb[43].mxu1 }
 0x14b   :  { %v3235_v45 = vadd.f32 %v3234_v41, %v3233_v33 }
 0x14c   :  { %2613 = vmatmul.mubr.bf16.gmra.mrb[132].mxu0 %v4070_v13  ;;  %3811 = vmatmul.mubr.bf16.gmra.mrb[140].mxu1 %v4075_v8 }
 0x14d   :  { %2620 = vmatprep.mubr.bf16.mxu0 %v4071_v12 }
 0x14f   :  { %v3236_v2 = vpop.f32.mrb[44].mxu1 }
 0x150   :  { %v3237_v47 = vpop.f32.mrb[45].mxu1 }
 0x151   :  { %v5586_v56 = vadd.f32 %v3237_v47, %v3236_v2  ;;  %v3239_v42 = vpop.f32.mrb[46].mxu1 }
 0x152   :  { %v3240_v6 = vpop.f32.mrb[47].mxu1 }
 0x154   :  { %2621 = vmatmul.mubr.bf16.gmra.mrb[136].mxu0 %v4073_v7 }
 0x155   :  { %2628 = vmatprep.mubr.bf16.mxu0 %v2996_v50 }
 0x157   :  { %v3258_v39 = vpop.f32.mrb[40].mxu0  ;;  %v3298_v17 = vpop.f32.mrb[48].mxu1 }
 0x158   :  { %v3259_v28 = vpop.f32.mrb[41].mxu0  ;;  %v3299_v46 = vpop.f32.mrb[49].mxu1 }
 0x159   :  { %v3260_v53 = vadd.f32 %v3259_v28, %v3258_v39  ;;  %v3261_v5 = vpop.f32.mrb[42].mxu0  ;;  %v3300_v29 = vadd.f32 %v3299_v46, %v3298_v17  ;;  %v3301_v54 = vpop.f32.mrb[50].mxu1 }
 0x15a   :  { %v3262_v10 = vpop.f32.mrb[43].mxu0  ;;  %v3302_v40 = vpop.f32.mrb[51].mxu1 }
 0x15b   :  { %v1429_v11 = vadd.f32 %v3260_v53, %v5517_v15  ;;  %v3263_v20 = vadd.f32 %v3262_v10, %v3261_v5  ;;  %v3303_v48 = vadd.f32 %v3302_v40, %v3301_v54 }
 0x15c   :  { %2629 = vmatmul.mubr.bf16.gmra.mrb[140].mxu0 %v2995_v1 }
 0x15d   :  { %v1432_v30 = vadd.f32 %v3263_v20, %v5537_v23  ;;  %v1493_v43 = vadd.f32 %v3300_v29, %v1429_v11 }
 0x15f   :  { %v1496_v14 = vadd.f32 %v3303_v48, %v1432_v30  ;;  %v3264_v9 = vpop.f32.mrb[44].mxu0  ;;  %v3304_v27 = vpop.f32.mrb[52].mxu1 }
 0x160   :  { %v3265_v55 = vpop.f32.mrb[45].mxu0  ;;  %v3305_v57 = vpop.f32.mrb[53].mxu1 }
 0x161   :  { %v3266_v38 = vadd.f32 %v3265_v55, %v3264_v9  ;;  %v3267_v18 = vpop.f32.mrb[46].mxu0  ;;  %v3306_v4 = vadd.f32 %v3305_v57, %v3304_v27  ;;  %v3307_v21 = vpop.f32.mrb[54].mxu1 }
 0x162   :  { %v3268_v16 = vpop.f32.mrb[47].mxu0  ;;  %v3308_v51 = vpop.f32.mrb[55].mxu1 }
 0x163   :  { %v1437_v24 = vadd.f32 %v3266_v38, %v3226_v61  ;;  %v3269_v19 = vadd.f32 %v3268_v16, %v3267_v18  ;;  %v3309_v15 = vadd.f32 %v3308_v51, %v3307_v21 }
 0x165   :  { %v1440_v31 = vadd.f32 %v3269_v19, %v3229_v35  ;;  %v1501_v37 = vadd.f32 %v3306_v4, %v1437_v24 }
 0x167   :  { %v1504_v49 = vadd.f32 %v3309_v15, %v1440_v31  ;;  %v3270_v62 = vpop.f32.mrb[48].mxu0  ;;  %v3310_v23 = vpop.f32.mrb[56].mxu1 }
 0x168   :  { %v3271_v63 = vpop.f32.mrb[49].mxu0  ;;  %v3311_v32 = vpop.f32.mrb[57].mxu1 }
 0x169   :  { %v3272_v60 = vadd.f32 %v3271_v63, %v3270_v62  ;;  %v3273_v22 = vpop.f32.mrb[50].mxu0  ;;  %v3312_v13 = vadd.f32 %v3311_v32, %v3310_v23  ;;  %v3313_v52 = vpop.f32.mrb[58].mxu1 }
 0x16a   :  { %v3274_v8 = vpop.f32.mrb[51].mxu0  ;;  %v3314_v33 = vpop.f32.mrb[59].mxu1 }
 0x16b   :  { %v1445_v12 = vadd.f32 %v3272_v60, %v3232_v58  ;;  %v3275_v41 = vadd.f32 %v3274_v8, %v3273_v22  ;;  %v3315_v26 = vadd.f32 %v3314_v33, %v3313_v52 }
 0x16d   :  { %v1448_v2 = vadd.f32 %v3275_v41, %v3235_v45  ;;  %v1509_v61 = vadd.f32 %v3312_v13, %v1445_v12 }
 0x16f   :  { %v1512_v7 = vadd.f32 %v3315_v26, %v1448_v2  ;;  %v3276_v47 = vpop.f32.mrb[52].mxu0  ;;  %v3316_v35 = vpop.f32.mrb[60].mxu1 }
 0x170   :  { %v3277_v42 = vpop.f32.mrb[53].mxu0  ;;  %v3317_v50 = vpop.f32.mrb[61].mxu1 }
 0x171   :  { %v3278_v6 = vadd.f32 %v3277_v42, %v3276_v47  ;;  %v3279_v39 = vpop.f32.mrb[54].mxu0  ;;  %v3318_v17 = vadd.f32 %v3317_v50, %v3316_v35  ;;  %v3319_v28 = vpop.f32.mrb[62].mxu1 }
 0x172   :  { %v3280_v46 = vpop.f32.mrb[55].mxu0  ;;  %v3320_v1 = vpop.f32.mrb[63].mxu1 }
 0x173   :  { %v1453_v53 = vadd.f32 %v3278_v6, %v5586_v56 }
 0x175   :  { %v1517_v5 = vadd.f32 %v3318_v17, %v1453_v53 }
 0x177   :  { %v3338_v29 = vpop.f32.mrb[56].mxu0  ;;  %v3760_v58 = vpop.f32.mrb[64].mxu1 }
 0x178   :  { %v3339_v54 = vpop.f32.mrb[57].mxu0  ;;  %v1620_v10 = vpop.f32.mrb[65].mxu1 }
 0x179   :  { %v3340_v45 = vadd.f32 %v3339_v54, %v3338_v29  ;;  %v3341_v40 = vpop.f32.mrb[58].mxu0  ;;  %v3761_v11 = vpop.f32.mrb[66].mxu1 }
 0x17a   :  { %v3342_v20 = vpop.f32.mrb[59].mxu0  ;;  %v1623_v48 = vpop.f32.mrb[67].mxu1 }
 0x17b   :  { %v3343_v30 = vadd.f32 %v3342_v20, %v3341_v40  ;;  %v1557_v9 = vadd.f32 %v3340_v45, %v1493_v43 }
 0x17d   :  { %v5591_v27 = vadd.f32 %v1620_v10, %v1557_v9  ;;  %v1560_v55 = vadd.f32 %v3343_v30, %v1496_v14 }
 0x17f   :  { %v2700_v57 = vmax.f32 %v5512_v44, %v5591_v27  ;;  %v5595_v38 = vadd.f32 %v1623_v48, %v1560_v55  ;;  %v3344_v56 = vpop.f32.mrb[60].mxu0  ;;  %v3764_v18 = vpop.f32.mrb[68].mxu1 }
 0x180   :  { %v3345_v4 = vpop.f32.mrb[61].mxu0  ;;  %v1636_v21 = vpop.f32.mrb[69].mxu1 }
 0x181   :  { %v2701_v16 = vmax.f32 %v5532_v36, %v5595_v38  ;;  %v3346_v51 = vadd.f32 %v3345_v4, %v3344_v56  ;;  %v3347_v24 = vpop.f32.mrb[62].mxu0  ;;  %v3765_v19 = vpop.f32.mrb[70].mxu1 }
 0x182   :  { %v3348_v15 = vpop.f32.mrb[63].mxu0  ;;  %v1639_v43 = vpop.f32.mrb[71].mxu1 }
 0x183   :  { %v1565_v31 = vadd.f32 %v3346_v51, %v1501_v37  ;;  %v3349_v62 = vadd.f32 %v3348_v15, %v3347_v24 }
 0x185   :  { %v5599_v14 = vadd.f32 %v3760_v58, %v1565_v31  ;;  %v1568_v23 = vadd.f32 %v3349_v62, %v1504_v49 }
 0x187   :  { %v2702_v63 = vmax.f32 %v5509_v3, %v5599_v14  ;;  %v5603_v32 = vadd.f32 %v3761_v11, %v1568_v23  ;;  %v3350_v60 = vpop.f32.mrb[64].mxu0 }
 0x188   :  { %v3351_v22 = vpop.f32.mrb[65].mxu0 }
 0x189   :  { %v2703_v13 = vmax.f32 %v5520_v59, %v5603_v32  ;;  %v3352_v52 = vadd.f32 %v3351_v22, %v3350_v60  ;;  %v3353_v8 = vpop.f32.mrb[66].mxu0 }
 0x18a   :  { %v3354_v33 = vpop.f32.mrb[67].mxu0 }
 0x18b   :  { %v3355_v12 = vadd.f32 %v3354_v33, %v3353_v8  ;;  %v1573_v41 = vadd.f32 %v3352_v52, %v1509_v61 }
 0x18d   :  { %v5607_v37 = vadd.f32 %v1636_v21, %v1573_v41  ;;  %v1576_v26 = vadd.f32 %v3355_v12, %v1512_v7 }
 0x18f   :  { %v2704_v49 = vmax.f32 %v5557_v0, %v5607_v37  ;;  %v5611_v2 = vadd.f32 %v1639_v43, %v1576_v26  ;;  %v3356_v47 = vpop.f32.mrb[68].mxu0 }
 0x190   :  { %v3357_v35 = vpop.f32.mrb[69].mxu0 }
 0x191   :  { %v2705_v42 = vmax.f32 %v5569_v34, %v5611_v2  ;;  %v3358_v50 = vadd.f32 %v3357_v35, %v3356_v47  ;;  %v3359_v6 = vpop.f32.mrb[70].mxu0 }
 0x192   :  { %v3360_v39 = vpop.f32.mrb[71].mxu0 }
 0x193   :  { %v1581_v17 = vadd.f32 %v3358_v50, %v1517_v5 }
 0x195   :  { %v5615_v28 = vadd.f32 %v3764_v18, %v1581_v17 }
 0x197   :  { %v2706_v61 = vmax.f32 %v5548_v25, %v5615_v28  ;;  %v3390_v7 = vpop.f32.mrb[72].mxu0  ;;  %v3430_v46 = vpop.f32.mrb[72].mxu1 }
 0x198   :  { %v3391_v1 = vpop.f32.mrb[73].mxu0  ;;  %v3431_v53 = vpop.f32.mrb[73].mxu1 }
 0x199   :  { %v3392_v29 = vadd.f32 %v3391_v1, %v3390_v7  ;;  %v3432_v58 = vadd.f32 %v3431_v53, %v3430_v46  ;;  %v3393_v54 = vpop.f32.mrb[74].mxu0  ;;  %v3433_v10 = vpop.f32.mrb[74].mxu1 }
 0x19a   :  { %v3394_v45 = vpop.f32.mrb[75].mxu0  ;;  %v3434_v40 = vpop.f32.mrb[75].mxu1 }
 0x19b   :  { %v1954_v11 = vadd.f32 %v3432_v58, %v3392_v29  ;;  %v3395_v20 = vadd.f32 %v3394_v45, %v3393_v54  ;;  %v3435_v48 = vadd.f32 %v3434_v40, %v3433_v10 }
 0x19d   :  { %v1957_v30 = vadd.f32 %v3435_v48, %v3395_v20 }
 0x19f   :  { %v3396_v5 = vpop.f32.mrb[76].mxu0  ;;  %v3436_v9 = vpop.f32.mrb[76].mxu1 }
 0x1a0   :  { %v3397_v55 = vpop.f32.mrb[77].mxu0  ;;  %v3437_v56 = vpop.f32.mrb[77].mxu1 }
 0x1a1   :  { %v3398_v18 = vadd.f32 %v3397_v55, %v3396_v5  ;;  %v3438_v4 = vadd.f32 %v3437_v56, %v3436_v9  ;;  %v3399_v21 = vpop.f32.mrb[78].mxu0  ;;  %v3439_v51 = vpop.f32.mrb[78].mxu1 }
 0x1a2   :  { %v3400_v24 = vpop.f32.mrb[79].mxu0  ;;  %v3440_v19 = vpop.f32.mrb[79].mxu1 }
 0x1a3   :  { %v1962_v15 = vadd.f32 %v3438_v4, %v3398_v18  ;;  %v3401_v43 = vadd.f32 %v3400_v24, %v3399_v21  ;;  %v3441_v31 = vadd.f32 %v3440_v19, %v3439_v51 }
 0x1a5   :  { %v1965_v62 = vadd.f32 %v3441_v31, %v3401_v43 }
 0x1a7   :  { %v3402_v23 = vpop.f32.mrb[80].mxu0  ;;  %v3442_v60 = vpop.f32.mrb[80].mxu1 }
 0x1a8   :  { %v3403_v22 = vpop.f32.mrb[81].mxu0  ;;  %v3443_v52 = vpop.f32.mrb[81].mxu1 }
 0x1a9   :  { %v3404_v8 = vadd.f32 %v3403_v22, %v3402_v23  ;;  %v3444_v33 = vadd.f32 %v3443_v52, %v3442_v60  ;;  %v3405_v12 = vpop.f32.mrb[82].mxu0  ;;  %v3445_v41 = vpop.f32.mrb[82].mxu1 }
 0x1aa   :  { %v3406_v26 = vpop.f32.mrb[83].mxu0  ;;  %v3446_v47 = vpop.f32.mrb[83].mxu1 }
 0x1ab   :  { %v1970_v35 = vadd.f32 %v3444_v33, %v3404_v8  ;;  %v3407_v50 = vadd.f32 %v3406_v26, %v3405_v12  ;;  %v3447_v6 = vadd.f32 %v3446_v47, %v3445_v41 }
 0x1ad   :  { %v1973_v39 = vadd.f32 %v3447_v6, %v3407_v50 }
 0x1af   :  { %v3408_v17 = vpop.f32.mrb[84].mxu0  ;;  %v3448_v7 = vpop.f32.mrb[84].mxu1 }
 0x1b0   :  { %v3409_v46 = vpop.f32.mrb[85].mxu0  ;;  %v3449_v1 = vpop.f32.mrb[85].mxu1 }
 0x1b1   :  { %v3410_v53 = vadd.f32 %v3409_v46, %v3408_v17  ;;  %v3450_v29 = vadd.f32 %v3449_v1, %v3448_v7  ;;  %v3411_v58 = vpop.f32.mrb[86].mxu0  ;;  %v3451_v54 = vpop.f32.mrb[86].mxu1 }
 0x1b2   :  { %v3412_v10 = vpop.f32.mrb[87].mxu0  ;;  %v3452_v45 = vpop.f32.mrb[87].mxu1 }
 0x1b3   :  { %v1978_v40 = vadd.f32 %v3450_v29, %v3410_v53 }
 0x1b7   :  { %v3470_v20 = vpop.f32.mrb[88].mxu0  ;;  %v3510_v48 = vpop.f32.mrb[88].mxu1 }
 0x1b8   :  { %v3471_v5 = vpop.f32.mrb[89].mxu0  ;;  %v3511_v9 = vpop.f32.mrb[89].mxu1 }
 0x1b9   :  { %v3472_v55 = vadd.f32 %v3471_v5, %v3470_v20  ;;  %v3473_v56 = vpop.f32.mrb[90].mxu0  ;;  %v3512_v18 = vadd.f32 %v3511_v9, %v3510_v48  ;;  %v3513_v4 = vpop.f32.mrb[90].mxu1 }
 0x1ba   :  { %v3474_v21 = vpop.f32.mrb[91].mxu0  ;;  %v3514_v51 = vpop.f32.mrb[91].mxu1 }
 0x1bb   :  { %v2018_v24 = vadd.f32 %v3472_v55, %v1954_v11  ;;  %v3475_v19 = vadd.f32 %v3474_v21, %v3473_v56  ;;  %v3515_v43 = vadd.f32 %v3514_v51, %v3513_v4 }
 0x1bd   :  { %v2021_v31 = vadd.f32 %v3475_v19, %v1957_v30  ;;  %v2082_v23 = vadd.f32 %v3512_v18, %v2018_v24 }
 0x1bf   :  { %v3476_v60 = vpop.f32.mrb[92].mxu0  ;;  %v3516_v22 = vpop.f32.mrb[92].mxu1  ;;  %v2085_v52 = vadd.f32 %v3515_v43, %v2021_v31 }
 0x1c0   :  { %v3477_v8 = vpop.f32.mrb[93].mxu0  ;;  %v3517_v33 = vpop.f32.mrb[93].mxu1 }
 0x1c1   :  { %v3478_v12 = vadd.f32 %v3477_v8, %v3476_v60  ;;  %v3479_v41 = vpop.f32.mrb[94].mxu0  ;;  %v3518_v26 = vadd.f32 %v3517_v33, %v3516_v22  ;;  %v3519_v47 = vpop.f32.mrb[94].mxu1 }
 0x1c2   :  { %v3480_v50 = vpop.f32.mrb[95].mxu0  ;;  %v3520_v6 = vpop.f32.mrb[95].mxu1 }
 0x1c3   :  { %v2026_v17 = vadd.f32 %v3478_v12, %v1962_v15  ;;  %v3481_v7 = vadd.f32 %v3480_v50, %v3479_v41  ;;  %v3521_v46 = vadd.f32 %v3520_v6, %v3519_v47 }
 0x1c5   :  { %v2029_v1 = vadd.f32 %v3481_v7, %v1965_v62  ;;  %v2090_v11 = vadd.f32 %v3518_v26, %v2026_v17 }
 0x1c7   :  { %v3482_v53 = vpop.f32.mrb[96].mxu0  ;;  %v3522_v29 = vpop.f32.mrb[96].mxu1  ;;  %v2093_v30 = vadd.f32 %v3521_v46, %v2029_v1 }
 0x1c8   :  { %v3483_v58 = vpop.f32.mrb[97].mxu0  ;;  %v3523_v54 = vpop.f32.mrb[97].mxu1 }
 0x1c9   :  { %v3484_v10 = vadd.f32 %v3483_v58, %v3482_v53  ;;  %v3485_v45 = vpop.f32.mrb[98].mxu0  ;;  %v3524_v20 = vadd.f32 %v3523_v54, %v3522_v29  ;;  %v3525_v48 = vpop.f32.mrb[98].mxu1 }
 0x1ca   :  { %v3486_v5 = vpop.f32.mrb[99].mxu0  ;;  %v3526_v9 = vpop.f32.mrb[99].mxu1 }
 0x1cb   :  { %v2034_v55 = vadd.f32 %v3484_v10, %v1970_v35  ;;  %v3487_v56 = vadd.f32 %v3486_v5, %v3485_v45  ;;  %v3527_v18 = vadd.f32 %v3526_v9, %v3525_v48 }
 0x1cd   :  { %v2037_v4 = vadd.f32 %v3487_v56, %v1973_v39  ;;  %v2098_v15 = vadd.f32 %v3524_v20, %v2034_v55 }
 0x1cf   :  { %v3488_v21 = vpop.f32.mrb[100].mxu0  ;;  %v3528_v51 = vpop.f32.mrb[100].mxu1  ;;  %v2101_v62 = vadd.f32 %v3527_v18, %v2037_v4 }
 0x1d0   :  { %v3489_v24 = vpop.f32.mrb[101].mxu0  ;;  %v3529_v19 = vpop.f32.mrb[101].mxu1 }
 0x1d1   :  { %v3490_v43 = vadd.f32 %v3489_v24, %v3488_v21  ;;  %v3491_v31 = vpop.f32.mrb[102].mxu0  ;;  %v3530_v60 = vadd.f32 %v3529_v19, %v3528_v51  ;;  %v3531_v22 = vpop.f32.mrb[102].mxu1 }
 0x1d2   :  { %v3492_v8 = vpop.f32.mrb[103].mxu0  ;;  %v3532_v33 = vpop.f32.mrb[103].mxu1 }
 0x1d3   :  { %v2042_v12 = vadd.f32 %v3490_v43, %v1978_v40 }
 0x1d5   :  { %v2106_v41 = vadd.f32 %v3530_v60, %v2042_v12 }
 0x1d7   :  { %v3784_v26 = vpop.f32.mrb[104].mxu0  ;;  %v3562_v47 = vpop.f32.mrb[104].mxu1 }
 0x1d8   :  { %v5619_v35 = vadd.f32 %v3784_v26, %v2090_v11  ;;  %v2145_v50 = vpop.f32.mrb[105].mxu0  ;;  %v3563_v39 = vpop.f32.mrb[105].mxu1 }
 0x1d9   :  { %v5621_v6 = vadd.f32 %v2145_v50, %v2082_v23  ;;  %v3785_v17 = vpop.f32.mrb[106].mxu0  ;;  %v3564_v7 = vadd.f32 %v3563_v39, %v3562_v47  ;;  %v3565_v46 = vpop.f32.mrb[106].mxu1 }
 0x1da   :  { %v5623_v1 = vadd.f32 %v3785_v17, %v2093_v30  ;;  %v2148_v53 = vpop.f32.mrb[107].mxu0  ;;  %v3566_v29 = vpop.f32.mrb[107].mxu1 }
 0x1db   :  { %v5625_v58 = vadd.f32 %v2148_v53, %v2085_v52  ;;  %v3567_v54 = vadd.f32 %v3566_v29, %v3565_v46 }
 0x1df   :  { %v3788_v40 = vpop.f32.mrb[108].mxu0  ;;  %v3568_v10 = vpop.f32.mrb[108].mxu1 }
 0x1e0   :  { %v5627_v45 = vadd.f32 %v3788_v40, %v2106_v41  ;;  %v2161_v11 = vpop.f32.mrb[109].mxu0  ;;  %v3569_v20 = vpop.f32.mrb[109].mxu1 }
 0x1e1   :  { %v5629_v48 = vadd.f32 %v2161_v11, %v2098_v15  ;;  %v3789_v23 = vpop.f32.mrb[110].mxu0  ;;  %v3570_v5 = vadd.f32 %v3569_v20, %v3568_v10  ;;  %v3571_v9 = vpop.f32.mrb[110].mxu1 }
 0x1e2   :  { %v2164_v55 = vpop.f32.mrb[111].mxu0  ;;  %v3572_v56 = vpop.f32.mrb[111].mxu1 }
 0x1e3   :  { %v5631_v30 = vadd.f32 %v2164_v55, %v2101_v62  ;;  %v3573_v18 = vadd.f32 %v3572_v56, %v3571_v9 }
 0x1e7   :  { %v3574_v4 = vpop.f32.mrb[112].mxu1 }
 0x1e8   :  { %v3575_v52 = vpop.f32.mrb[113].mxu1 }
 0x1e9   :  { %v3576_v21 = vadd.f32 %v3575_v52, %v3574_v4  ;;  %v3577_v51 = vpop.f32.mrb[114].mxu1 }
 0x1ea   :  { %v3578_v24 = vpop.f32.mrb[115].mxu1 }
 0x1eb   :  { %v3579_v19 = vadd.f32 %v3578_v24, %v3577_v51 }
 0x1ef   :  { %v3580_v43 = vpop.f32.mrb[116].mxu1 }
 0x1f0   :  { %v3581_v31 = vpop.f32.mrb[117].mxu1 }
 0x1f1   :  { %v3582_v60 = vadd.f32 %v3581_v31, %v3580_v43  ;;  %v3583_v22 = vpop.f32.mrb[118].mxu1 }
 0x1f2   :  { %v3584_v15 = vpop.f32.mrb[119].mxu1 }
 0x1f7   :  { %v3602_v8 = vpop.f32.mrb[112].mxu0  ;;  %v3642_v33 = vpop.f32.mrb[120].mxu1 }
 0x1f8   :  { %v3603_v12 = vpop.f32.mrb[113].mxu0  ;;  %v3643_v41 = vpop.f32.mrb[121].mxu1 }
 0x1f9   :  { %v3604_v26 = vadd.f32 %v3603_v12, %v3602_v8  ;;  %v3605_v47 = vpop.f32.mrb[114].mxu0  ;;  %v3644_v62 = vadd.f32 %v3643_v41, %v3642_v33  ;;  %v3645_v50 = vpop.f32.mrb[122].mxu1 }
 0x1fa   :  { %v3606_v39 = vpop.f32.mrb[115].mxu0  ;;  %v3646_v17 = vpop.f32.mrb[123].mxu1 }
 0x1fb   :  { %v2479_v46 = vadd.f32 %v3604_v26, %v3564_v7  ;;  %v3607_v53 = vadd.f32 %v3606_v39, %v3605_v47  ;;  %v3647_v29 = vadd.f32 %v3646_v17, %v3645_v50 }
 0x1fd   :  { %v2482_v40 = vadd.f32 %v3607_v53, %v3567_v54  ;;  %v2543_v10 = vadd.f32 %v3644_v62, %v2479_v46 }
 0x1ff   :  { %v2546_v11 = vadd.f32 %v3647_v29, %v2482_v40  ;;  %v3608_v20 = vpop.f32.mrb[116].mxu0  ;;  %v3648_v23 = vpop.f32.mrb[124].mxu1 }
 0x200   :  { %v3609_v9 = vpop.f32.mrb[117].mxu0  ;;  %v3649_v55 = vpop.f32.mrb[125].mxu1 }
 0x201   :  { %v3610_v56 = vadd.f32 %v3609_v9, %v3608_v20  ;;  %v3611_v4 = vpop.f32.mrb[118].mxu0  ;;  %v3650_v52 = vadd.f32 %v3649_v55, %v3648_v23  ;;  %v3651_v51 = vpop.f32.mrb[126].mxu1 }
 0x202   :  { %v3612_v24 = vpop.f32.mrb[119].mxu0  ;;  %v3652_v43 = vpop.f32.mrb[127].mxu1 }
 0x203   :  { %v2487_v31 = vadd.f32 %v3610_v56, %v3570_v5  ;;  %v3613_v22 = vadd.f32 %v3612_v24, %v3611_v4  ;;  %v3653_v15 = vadd.f32 %v3652_v43, %v3651_v51 }
 0x205   :  { %v2490_v8 = vadd.f32 %v3613_v22, %v3573_v18  ;;  %v2551_v7 = vadd.f32 %v3650_v52, %v2487_v31 }
 0x207   :  { %v5633_v33 = vadd.f32 %v3653_v15, %v2490_v8  ;;  %v3614_v54 = vpop.f32.mrb[120].mxu0  ;;  %v3654_v12 = vpop.f32.mrb[128].mxu1 }
 0x208   :  { %v3615_v41 = vpop.f32.mrb[121].mxu0  ;;  %v3655_v26 = vpop.f32.mrb[129].mxu1 }
 0x209   :  { %v3616_v47 = vadd.f32 %v3615_v41, %v3614_v54  ;;  %v3617_v62 = vpop.f32.mrb[122].mxu0  ;;  %v3656_v50 = vadd.f32 %v3655_v26, %v3654_v12  ;;  %v3657_v39 = vpop.f32.mrb[130].mxu1 }
 0x20a   :  { %v3618_v17 = vpop.f32.mrb[123].mxu0  ;;  %v3658_v46 = vpop.f32.mrb[131].mxu1 }
 0x20b   :  { %v2495_v53 = vadd.f32 %v3616_v47, %v3576_v21  ;;  %v3619_v29 = vadd.f32 %v3618_v17, %v3617_v62  ;;  %v3659_v40 = vadd.f32 %v3658_v46, %v3657_v39 }
 0x20d   :  { %v2498_v5 = vadd.f32 %v3619_v29, %v3579_v19  ;;  %v5635_v20 = vadd.f32 %v3656_v50, %v2495_v53 }
 0x20f   :  { %v5637_v18 = vadd.f32 %v3659_v40, %v2498_v5  ;;  %v3620_v23 = vpop.f32.mrb[124].mxu0  ;;  %v3660_v9 = vpop.f32.mrb[132].mxu1  ;;  %v2998_v5 = vld [vmem:[%s5693_s5] ss:$0 sm:$0xff] }
 0x210   :  { %v3621_v55 = vpop.f32.mrb[125].mxu0  ;;  %v3661_v56 = vpop.f32.mrb[133].mxu1 }
 0x211   :  { %v3622_v4 = vadd.f32 %v3621_v55, %v3620_v23  ;;  %v3623_v52 = vpop.f32.mrb[126].mxu0  ;;  %v3662_v51 = vadd.f32 %v3661_v56, %v3660_v9  ;;  %v3663_v24 = vpop.f32.mrb[134].mxu1 }
 0x212   :  { %v3624_v43 = vpop.f32.mrb[127].mxu0  ;;  %v3664_v31 = vpop.f32.mrb[135].mxu1 }
 0x213   :  { %v2503_v22 = vadd.f32 %v3622_v4, %v3582_v60 }
 0x215   :  { %v5639_v15 = vadd.f32 %v3662_v51, %v2503_v22 }
 0x217   :  { %v3682_v21 = vpop.f32.mrb[128].mxu0  ;;  %v3808_v8 = vpop.f32.mrb[136].mxu1 }
 0x218   :  { %v3683_v19 = vpop.f32.mrb[129].mxu0  ;;  %v2670_v54 = vpop.f32.mrb[137].mxu1 }
 0x219   :  { %v3684_v12 = vadd.f32 %v3683_v19, %v3682_v21  ;;  %v3685_v41 = vpop.f32.mrb[130].mxu0  ;;  %v3809_v26 = vpop.f32.mrb[138].mxu1 }
 0x21a   :  { %v3686_v47 = vpop.f32.mrb[131].mxu0  ;;  %v2673_v62 = vpop.f32.mrb[139].mxu1 }
 0x21b   :  { %v3687_v50 = vadd.f32 %v3686_v47, %v3685_v41  ;;  %v2607_v39 = vadd.f32 %v3684_v12, %v2543_v10 }
 0x21d   :  { %v2671_v17 = vadd.f32 %v2670_v54, %v2607_v39  ;;  %v2610_v46 = vadd.f32 %v3687_v50, %v2546_v11 }
 0x21f   :  { %v2707_v53 = vmax.f32 %v5621_v6, %v2671_v17  ;;  %v2674_v29 = vadd.f32 %v2673_v62, %v2610_v46  ;;  %v3688_v40 = vpop.f32.mrb[132].mxu0  ;;  %v3812_v60 = vpop.f32.mrb[140].mxu1 }
 0x220   :  { %v3689_v23 = vpop.f32.mrb[133].mxu0  ;;  %v2686_v9 = vpop.f32.mrb[141].mxu1 }
 0x221   :  { %v2714_v55 = vmax.f32 %v2700_v57, %v2707_v53  ;;  %v2708_v56 = vmax.f32 %v5625_v58, %v2674_v29  ;;  %v3690_v10 = vadd.f32 %v3689_v23, %v3688_v40  ;;  %v3691_v4 = vpop.f32.mrb[134].mxu0  ;;  %v3813_v11 = vpop.f32.mrb[142].mxu1 }
 0x222   :  { %v3692_v52 = vpop.f32.mrb[135].mxu0  ;;  %v2689_v6 = vpop.f32.mrb[143].mxu1 }
 0x223   :  { %v2728_v51 = vadd.f32 %v2998_v5, %v2714_v55  ;;  %v2715_v24 = vmax.f32 %v2701_v16, %v2708_v56  ;;  %v2615_v43 = vadd.f32 %v3690_v10, %v2551_v7  ;;  %v3693_v31 = vadd.f32 %v3692_v52, %v3691_v4 }
 0x225   :  { %v2729_v22 = vadd.f32 %v2998_v5, %v2715_v24  ;;  %v2679_v21 = vadd.f32 %v3808_v8, %v2615_v43  ;;  %v2618_v19 = vadd.f32 %v3693_v31, %v5633_v33  ;;  %v2735_v44 = vmax.f32 %v2728_v51, 0.0 }
 0x227   :  { %v2736_v27 = vmax.f32 %v2729_v22, 0.0  ;;  %v2709_v57 = vmax.f32 %v5619_v35, %v2679_v21  ;;  %v2682_v58 = vadd.f32 %v3809_v26, %v2618_v19  ;;  %v3694_v54 = vpop.f32.mrb[136].mxu0 }
 0x228   :  { %v3695_v12 = vpop.f32.mrb[137].mxu0 }
 0x229   :  { %v3016_v41 = vpack.c.bf16 %v2736_v27, %v2735_v44  ;;  %v2716_v47 = vmax.f32 %v2702_v63, %v2709_v57  ;;  %v2710_v36 = vmax.f32 %v5623_v1, %v2682_v58  ;;  %v3696_v38 = vadd.f32 %v3695_v12, %v3694_v54  ;;  %v3697_v16 = vpop.f32.mrb[138].mxu0 }
 0x22a   :  { %v3698_v7 = vpop.f32.mrb[139].mxu0 }
 0x22b   :  { %3017 = vst [vmem:[%s5694_s6] sm:$0xff] %v3016_v41   ;;  %v2730_v33 = vadd.f32 %v2998_v5, %v2716_v47  ;;  %v2717_v35 = vmax.f32 %v2703_v13, %v2710_v36  ;;  %v3699_v8 = vadd.f32 %v3698_v7, %v3697_v16  ;;  %v2623_v26 = vadd.f32 %v3696_v38, %v5635_v20 }
 0x22d   :  { %v2731_v62 = vadd.f32 %v2998_v5, %v2717_v35  ;;  %v2687_v3 = vadd.f32 %v2686_v9, %v2623_v26  ;;  %v2626_v14 = vadd.f32 %v3699_v8, %v5637_v18  ;;  %v2737_v63 = vmax.f32 %v2730_v33, 0.0 }
 0x22f   :  { %v2738_v1 = vmax.f32 %v2731_v62, 0.0  ;;  %v2711_v50 = vmax.f32 %v5629_v48, %v2687_v3  ;;  %v2690_v39 = vadd.f32 %v2689_v6, %v2626_v14  ;;  %v3700_v17 = vpop.f32.mrb[140].mxu0 }
 0x230   :  { %v3701_v46 = vpop.f32.mrb[141].mxu0 }
 0x231   :  { %v3021_v53 = vpack.c.bf16 %v2738_v1, %v2737_v63  ;;  %v2718_v59 = vmax.f32 %v2704_v49, %v2711_v50  ;;  %v2712_v32 = vmax.f32 %v5631_v30, %v2690_v39  ;;  %v3702_v13 = vadd.f32 %v3701_v46, %v3700_v17  ;;  %v3703_v20 = vpop.f32.mrb[142].mxu0 }
 0x232   :  { %v3704_v29 = vpop.f32.mrb[143].mxu0 }
 0x233   :  { %3028 = vst [vmem:[%s5694_s6 + $0x8] sm:$0xff] %v3021_v53   ;;  %v2732_v18 = vadd.f32 %v2998_v5, %v2718_v59  ;;  %v2719_v48 = vmax.f32 %v2705_v42, %v2712_v32  ;;  %v2631_v40 = vadd.f32 %v3702_v13, %v5639_v15 }
 0x235   :  { %v2733_v23 = vadd.f32 %v2998_v5, %v2719_v48  ;;  %v2695_v9 = vadd.f32 %v3812_v60, %v2631_v40  ;;  %v2739_v0 = vmax.f32 %v2732_v18, 0.0 }
 0x237   :  { %v2740_v37 = vmax.f32 %v2733_v23, 0.0  ;;  %v2713_v49 = vmax.f32 %v5627_v45, %v2695_v9 }
 0x239   :  { %v3026_v30 = vpack.c.bf16 %v2740_v37, %v2739_v0  ;;  %v2720_v55 = vmax.f32 %v2706_v61, %v2713_v49 }
 0x23b   :  { %3029 = vst [vmem:[%s5694_s6 + $0x10] sm:$0xff] %v3026_v30   ;;  %v2734_v56 = vadd.f32 %v2998_v5, %v2720_v55 }
 0x23d   :  { %v2741_v34 = vmax.f32 %v2734_v56, 0.0 }
 0x23f   :  { %v3012_v2 = vpack.c.bf16 %v2741_v34, %v2741_v34 }
 0x241   :  { %2777 = vst [vmem:[%s5694_s6 + $0x18] sm:$0x1] %v3012_v2 }

// kernel: model_forward.5
= control target key start
LH: loop header
LB: loop body
LE: loop exit
PB: predicated region body
PF: predicated region fallthrough
CT: control target
= control target key end

     0   :  { %v447_v27 = vlaneseq  ;;  %v3409_v35 = vmov 1966171168   ;;  %s4210_s0 = inlined_call_operand.vmem [shape: bf16[2,3200], index: 0, kind: input, shape index: {}]   ;;  %s4211_s1 = inlined_call_operand.vmem [shape: bf16[3200,128], index: 1, kind: input, shape index: {}]   ;;  %s4212_s2 = inlined_call_operand.vmem [shape: f32[1,128], index: 2, kind: input, shape index: {}]   ;;  %s4213_s3 = inlined_call_operand.vmem [shape: f32[128,50], index: 3, kind: input, shape index: {}]   ;;  %s4214_s4 = inlined_call_operand.vmem [shape: f32[1,50], index: 4, kind: input, shape index: {}]   ;;  %s4215_s5 = inlined_call_operand.vmem [shape: f32[50,10], index: 5, kind: input, shape index: {}]   ;;  %s4216_s6 = inlined_call_operand.vmem [shape: f32[1,10], index: 6, kind: input, shape index: {}]   ;;  %s4217_s7 = inlined_call_operand.hbm [shape: f32[2,10], index: 7, kind: output, shape index: {}]  }
   0x1   :  { %v3178_v0 = vld [vmem:[%s4211_s1 + $0x40] sm:$0xff]   ;;  %v3182_v4 = vld [vmem:[%s4211_s1 + $0x48] sm:$0xff]   ;;  %v3186_v8 = vld [vmem:[%s4211_s1 + $0x50] sm:$0xff]   ;;  %v445_v36 = vunpack.c.l.s4 %v3409_v35 }
   0x2   :  { %v3179_v1 = vld [vmem:[%s4211_s1] sm:$0xff]   ;;  %2770 = vmatprep.subr.bf16.mxu0 %v3178_v0  ;;  %v3183_v5 = vld [vmem:[%s4211_s1 + $0x8] sm:$0xff]   ;;  %v3187_v9 = vld [vmem:[%s4211_s1 + $0x10] sm:$0xff]   ;;  %v448_v32 = vshrl.u32 %v447_v27, 7 }
   0x3   :  { %v3180_v2 = vld [vmem:[%s4211_s1 + $0xc0] sm:$0xff]   ;;  %2771 = vmatpush3.bf16.msra.mxu0 %v3179_v1  ;;  %v3184_v6 = vld [vmem:[%s4211_s1 + $0xc8] sm:$0xff]   ;;  %v3188_v10 = vld [vmem:[%s4211_s1 + $0xd0] sm:$0xff]   ;;  %v446_v39 = vunpack.c.0.s8 %v445_v36 }
   0x4   :  { %v3181_v3 = vld [vmem:[%s4211_s1 + $0x80] sm:$0xff]   ;;  %2792 = vmatprep.subr.bf16.mxu1 %v3180_v2  ;;  %2772 = vmatprep.subr.bf16.mxu0 %v3182_v4  ;;  %v3185_v7 = vld [vmem:[%s4211_s1 + $0x88] sm:$0xff]   ;;  %v3189_v11 = vld [vmem:[%s4211_s1 + $0x90] sm:$0xff]  }
   0x5   :  { %2793 = vmatpush3.bf16.msra.mxu1 %v3181_v3  ;;  %v3190_v12 = vld [vmem:[%s4211_s1 + $0x58] sm:$0xff]   ;;  %v3194_v16 = vld [vmem:[%s4211_s1 + $0x60] sm:$0xff]   ;;  %v3198_v20 = vld [vmem:[%s4211_s1 + $0x68] sm:$0xff]   ;;  %v3559_v41 = vsub.s32 %v446_v39, %v448_v32 }
   0x6   :  { %2794 = vmatprep.subr.bf16.mxu1 %v3184_v6  ;;  %v3191_v13 = vld [vmem:[%s4211_s1 + $0x18] sm:$0xff]   ;;  %v3195_v17 = vld [vmem:[%s4211_s1 + $0x20] sm:$0xff]   ;;  %v3199_v21 = vld [vmem:[%s4211_s1 + $0x28] sm:$0xff]  }
   0x7   :  { %2773 = vmatpush3.bf16.msra.mxu0 %v3183_v5  ;;  %v3192_v14 = vld [vmem:[%s4211_s1 + $0xd8] sm:$0xff]   ;;  %v3196_v18 = vld [vmem:[%s4211_s1 + $0xe0] sm:$0xff]   ;;  %v3200_v22 = vld [vmem:[%s4211_s1 + $0xe8] sm:$0xff]  }
   0x8   :  { %2774 = vmatprep.subr.bf16.mxu0 %v3186_v8  ;;  %v3193_v15 = vld [vmem:[%s4211_s1 + $0x98] sm:$0xff]   ;;  %v3197_v19 = vld [vmem:[%s4211_s1 + $0xa0] sm:$0xff]   ;;  %v3201_v23 = vld [vmem:[%s4211_s1 + $0xa8] sm:$0xff]  }
   0x9   :  { %2795 = vmatpush3.bf16.msra.mxu1 %v3185_v7  ;;  %v3202_v24 = vld [vmem:[%s4211_s1 + $0x70] sm:$0xff]   ;;  %v3206_v29 = vld [vmem:[%s4211_s1 + $0x78] sm:$0xff]   ;;  %v28_v33 = vld [vmem:[%s4210_s0] sm:$0xff] }
   0xa   :  { %2796 = vmatprep.subr.bf16.mxu1 %v3188_v10  ;;  %v3203_v25 = vld [vmem:[%s4211_s1 + $0x30] sm:$0xff]   ;;  %v3207_v30 = vld [vmem:[%s4211_s1 + $0x38] sm:$0xff]   ;;  %v3211_v37 = vld [vmem:[%s4211_s1 + $0x140] sm:$0xff]   ;;  %v443_v38 = vcombine.high %v28_v33, %v28_v33  ;;  %v450_v42 = vrot.slane %v28_v33, %v3559_v41 }
   0xb   :  { %2775 = vmatpush3.bf16.msra.mxu0 %v3187_v9  ;;  %v3204_v26 = vld [vmem:[%s4211_s1 + $0xf0] sm:$0xff]   ;;  %v3208_v31 = vld [vmem:[%s4211_s1 + $0xf8] sm:$0xff]   ;;  %v3213_v40 = vld [vmem:[%s4211_s1 + $0x1c0] sm:$0xff]  }
   0xc   :  { %2776 = vmatprep.subr.bf16.mxu0 %v3190_v12  ;;  %v3205_v28 = vld [vmem:[%s4211_s1 + $0xb0] sm:$0xff]   ;;  %v3210_v34 = vld [vmem:[%s4211_s1 + $0xb8] sm:$0xff]   ;;  %v3563_v43 = vrot.slane %v443_v38, %v3559_v41  ;;  %v458_v44 = vcombine.high %v450_v42, %v450_v42  ;;  %v466_v45 = vrot.slane %v450_v42, %v3559_v41  ;;  %v3212_v48 = vld [vmem:[%s4211_s1 + $0x100] sm:$0xff]  }
   0xd   :  { %2797 = vmatpush3.bf16.msra.mxu1 %v3189_v11  ;;  %v3215_v51 = vld [vmem:[%s4211_s1 + $0x148] sm:$0xff]   ;;  %v3214_v53 = vld [vmem:[%s4211_s1 + $0x180] sm:$0xff]   ;;  %v3219_v57 = vld [vmem:[%s4211_s1 + $0x150] sm:$0xff]  }
   0xe   :  { %2798 = vmatprep.subr.bf16.mxu1 %v3192_v14  ;;  %v459_v46 = vcombine.high %v3563_v43, %v3563_v43  ;;  %v480_v47 = vrot.slane %v458_v44, %v3559_v41  ;;  %v488_v50 = vcombine.high %v466_v45, %v466_v45  ;;  %v3217_v54 = vld [vmem:[%s4211_s1 + $0x1c8] sm:$0xff]   ;;  %v3221_v59 = vld [vmem:[%s4211_s1 + $0x1d0] sm:$0xff]   ;;  %v3223_v61 = vld [vmem:[%s4211_s1 + $0x158] sm:$0xff]  }
   0xf   :  { %2777 = vmatpush3.bf16.msra.mxu0 %v3191_v13  ;;  %v3216_v56 = vld [vmem:[%s4211_s1 + $0x108] sm:$0xff]   ;;  %v3220_v60 = vld [vmem:[%s4211_s1 + $0x110] sm:$0xff]   ;;  %v3225_v63 = vld [vmem:[%s4211_s1 + $0x1d8] sm:$0xff]  }
  0x10   :  { %2778 = vmatprep.subr.bf16.mxu0 %v3194_v16  ;;  %v487_v49 = vrot.slane %v459_v46, %v3559_v41  ;;  %1861 = vmatprep.mubr.bf16.mxu0 %v480_v47  ;;  %v490_v52 = vcombine.high %v480_v47, %v480_v47  ;;  %v3218_v58 = vld [vmem:[%s4211_s1 + $0x188] sm:$0xff]   ;;  %v3222_v62 = vld [vmem:[%s4211_s1 + $0x190] sm:$0xff]   ;;  %v3224_v0 = vld [vmem:[%s4211_s1 + $0x118] sm:$0xff]  }
  0x11   :  { %2799 = vmatpush3.bf16.msra.mxu1 %v3193_v15  ;;  %v3227_v1 = vld [vmem:[%s4211_s1 + $0x160] sm:$0xff]   ;;  %v3226_v2 = vld [vmem:[%s4211_s1 + $0x198] sm:$0xff]   ;;  %v3231_v5 = vld [vmem:[%s4211_s1 + $0x168] sm:$0xff]  }
  0x12   :  { %2800 = vmatprep.subr.bf16.mxu1 %v3196_v18  ;;  %v491_v55 = vcombine.high %v487_v49, %v487_v49  ;;  %1901 = vmatprep.mubr.bf16.mxu1 %v490_v52  ;;  %v3229_v3 = vld [vmem:[%s4211_s1 + $0x1e0] sm:$0xff]   ;;  %v3233_v7 = vld [vmem:[%s4211_s1 + $0x1e8] sm:$0xff]   ;;  %v3235_v9 = vld [vmem:[%s4211_s1 + $0x170] sm:$0xff]  }
  0x13   :  { %2779 = vmatpush3.bf16.msra.mxu0 %v3195_v17  ;;  %v3228_v4 = vld [vmem:[%s4211_s1 + $0x120] sm:$0xff]   ;;  %v3232_v8 = vld [vmem:[%s4211_s1 + $0x128] sm:$0xff]   ;;  %v3237_v11 = vld [vmem:[%s4211_s1 + $0x1f0] sm:$0xff]   ;;  %v473_v17 = vrot.slane %v3563_v43, %v3559_v41 }
  0x14   :  { %2780 = vmatprep.subr.bf16.mxu0 %v3198_v20  ;;  %v3230_v6 = vld [vmem:[%s4211_s1 + $0x1a0] sm:$0xff]   ;;  %v3234_v10 = vld [vmem:[%s4211_s1 + $0x1a8] sm:$0xff]   ;;  %v3236_v12 = vld [vmem:[%s4211_s1 + $0x130] sm:$0xff]  }
  0x15   :  { %2801 = vmatpush3.bf16.msra.mxu1 %v3197_v19  ;;  %v3239_v13 = vld [vmem:[%s4211_s1 + $0x178] sm:$0xff]   ;;  %v3238_v14 = vld [vmem:[%s4211_s1 + $0x1b0] sm:$0xff]   ;;  %v3243_v18 = vld [vmem:[%s4211_s1 + $0x240] sm:$0xff]  }
  0x16   :  { %2802 = vmatprep.subr.bf16.mxu1 %v3200_v22  ;;  %v3241_v15 = vld [vmem:[%s4211_s1 + $0x1f8] sm:$0xff]   ;;  %v3245_v20 = vld [vmem:[%s4211_s1 + $0x2c0] sm:$0xff]   ;;  %v489_v22 = vcombine.high %v473_v17, %v473_v17  ;;  %v3251_v27 = vld [vmem:[%s4211_s1 + $0x250] sm:$0xff]  }
  0x17   :  { %2781 = vmatpush3.bf16.msra.mxu0 %v3199_v21  ;;  %v3240_v16 = vld [vmem:[%s4211_s1 + $0x138] sm:$0xff]   ;;  %v3244_v21 = vld [vmem:[%s4211_s1 + $0x200] sm:$0xff]   ;;  %v3254_v32 = vld [vmem:[%s4211_s1 + $0x290] sm:$0xff]  }
  0x18   :  { %2782 = vmatprep.subr.bf16.mxu0 %v3202_v24  ;;  %v3242_v19 = vld [vmem:[%s4211_s1 + $0x1b8] sm:$0xff]   ;;  %v3246_v24 = vld [vmem:[%s4211_s1 + $0x280] sm:$0xff]   ;;  %v3263_v39 = vld [vmem:[%s4211_s1 + $0x268] sm:$0xff]  }
  0x19   :  { %2803 = vmatpush3.bf16.msra.mxu1 %v3201_v23  ;;  %v3247_v23 = vld [vmem:[%s4211_s1 + $0x248] sm:$0xff]   ;;  %v3257_v33 = vld [vmem:[%s4211_s1 + $0x2d8] sm:$0xff]   ;;  %v3259_v35 = vld [vmem:[%s4211_s1 + $0x260] sm:$0xff]  }
  0x1a   :  { %2804 = vmatprep.subr.bf16.mxu1 %v3204_v26  ;;  %v3248_v26 = vld [vmem:[%s4211_s1 + $0x208] sm:$0xff]   ;;  %v3258_v36 = vld [vmem:[%s4211_s1 + $0x298] sm:$0xff]   ;;  %v3260_v38 = vld [vmem:[%s4211_s1 + $0x220] sm:$0xff]  }
  0x1b   :  { %2783 = vmatpush3.bf16.msra.mxu0 %v3203_v25  ;;  %v3249_v25 = vld [vmem:[%s4211_s1 + $0x2c8] sm:$0xff]   ;;  %v3267_v44 = vld [vmem:[%s4211_s1 + $0x270] sm:$0xff]  }
  0x1c   :  { %2784 = vmatprep.subr.bf16.mxu0 %v3206_v29  ;;  %v3253_v29 = vld [vmem:[%s4211_s1 + $0x2d0] sm:$0xff]   ;;  %v3265_v42 = vld [vmem:[%s4211_s1 + $0x2e8] sm:$0xff]  }
  0x1d   :  { %2805 = vmatpush3.bf16.msra.mxu1 %v3205_v28  ;;  %v3250_v28 = vld [vmem:[%s4211_s1 + $0x288] sm:$0xff]  }
  0x1e   :  { %2806 = vmatprep.subr.bf16.mxu1 %v3208_v31  ;;  %v3255_v31 = vld [vmem:[%s4211_s1 + $0x258] sm:$0xff]   ;;  %v3264_v43 = vld [vmem:[%s4211_s1 + $0x228] sm:$0xff]  }
  0x1f   :  { %2785 = vmatpush3.bf16.msra.mxu0 %v3207_v30  ;;  %v3252_v30 = vld [vmem:[%s4211_s1 + $0x210] sm:$0xff]   ;;  %v3266_v46 = vld [vmem:[%s4211_s1 + $0x2a8] sm:$0xff]  }
  0x20   :  { %2814 = vmatprep.subr.bf16.mxu0 %v3211_v37  ;;  %v3261_v37 = vld [vmem:[%s4211_s1 + $0x2e0] sm:$0xff]  }
  0x21   :  { %2807 = vmatpush3.bf16.msra.mxu1 %v3210_v34  ;;  %v3256_v34 = vld [vmem:[%s4211_s1 + $0x218] sm:$0xff]  }
  0x22   :  { %2836 = vmatprep.subr.bf16.mxu1 %v3213_v40  ;;  %1862 = vmatmul.mubr.bf16.vlgmr.msra.gmra.mrb[0].mxu0 %v466_v45  ;;  %v3262_v40 = vld [vmem:[%s4211_s1 + $0x2a0] sm:$0xff]   ;;  %v29_v45 = vld [vmem:[%s4210_s0 + $0x8] sm:$0xff] }
  0x23   :  { %2815 = vmatpush3.bf16.msra.mxu0 %v3212_v48  ;;  %1941 = vmatprep.mubr.bf16.mxu0 %v487_v49  ;;  %v499_v47 = vrot.slane %v29_v45, %v3559_v41  ;;  %v492_v48 = vcombine.high %v29_v45, %v29_v45  ;;  %v3269_v49 = vld [vmem:[%s4211_s1 + $0x2f0] sm:$0xff]  }
  0x24   :  { %1902 = vmatmul.mubr.bf16.vlgmr.msra.gmra.mrb[0].mxu1 %v488_v50  ;;  %2816 = vmatprep.subr.bf16.mxu0 %v3215_v51  ;;  %v3268_v50 = vld [vmem:[%s4211_s1 + $0x230] sm:$0xff]  }
  0x25   :  { %2837 = vmatpush3.bf16.msra.mxu1 %v3214_v53  ;;  %1981 = vmatprep.mubr.bf16.mxu1 %v491_v55  ;;  %v507_v51 = vcombine.high %v499_v47, %v499_v47  ;;  %v3748_v52 = vrot.slane %v492_v48, %v3559_v41  ;;  %v3271_v53 = vld [vmem:[%s4211_s1 + $0x278] sm:$0xff]   ;;  %v3318_v45 = vld [vmem:[%s4211_s1 + $0x4d0] sm:$0xff]  }
  0x26   :  { %2838 = vmatprep.subr.bf16.mxu1 %v3217_v54  ;;  %v3270_v54 = vld [vmem:[%s4211_s1 + $0x2b0] sm:$0xff]  }
  0x27   :  { %2817 = vmatpush3.bf16.msra.mxu0 %v3216_v56  ;;  %v529_v55 = vrot.slane %v507_v51, %v3559_v41  ;;  %v508_v56 = vcombine.high %v3748_v52, %v3748_v52  ;;  %v3319_v48 = vld [vmem:[%s4211_s1 + $0x490] sm:$0xff]   ;;  %v3324_v51 = vld [vmem:[%s4211_s1 + $0x460] sm:$0xff]  }
  0x28   :  { %2818 = vmatprep.subr.bf16.mxu0 %v3219_v57  ;;  %v3273_v57 = vld [vmem:[%s4211_s1 + $0x2f8] sm:$0xff]  }
  0x29   :  { %2839 = vmatpush3.bf16.msra.mxu1 %v3218_v58  ;;  %v3272_v58 = vld [vmem:[%s4211_s1 + $0x238] sm:$0xff]  }
  0x2a   :  { %2840 = vmatprep.subr.bf16.mxu1 %v3221_v59  ;;  %v539_v59 = vcombine.high %v529_v55, %v529_v55 }
  0x2b   :  { %2819 = vmatpush3.bf16.msra.mxu0 %v3220_v60  ;;  %v515_v60 = vrot.slane %v499_v47, %v3559_v41  ;;  %v3320_v47 = vld [vmem:[%s4211_s1 + $0x458] sm:$0xff]  }
  0x2c   :  { %2820 = vmatprep.subr.bf16.mxu0 %v3223_v61  ;;  %v3275_v61 = vld [vmem:[%s4211_s1 + $0x340] sm:$0xff]  }
  0x2d   :  { %2841 = vmatpush3.bf16.msra.mxu1 %v3222_v62  ;;  %v3274_v62 = vld [vmem:[%s4211_s1 + $0x2b8] sm:$0xff]  }
  0x2e   :  { %2842 = vmatprep.subr.bf16.mxu1 %v3225_v63  ;;  %v536_v63 = vrot.slane %v508_v56, %v3559_v41  ;;  %v3327_v56 = vld [vmem:[%s4211_s1 + $0x4a0] sm:$0xff]  }
  0x2f   :  { %2821 = vmatpush3.bf16.msra.mxu0 %v3224_v0  ;;  %v3277_v0 = vld [vmem:[%s4211_s1 + $0x3c0] sm:$0xff]  }
  0x30   :  { %2822 = vmatprep.subr.bf16.mxu0 %v3227_v1  ;;  %v3276_v1 = vld [vmem:[%s4211_s1 + $0x300] sm:$0xff]  }
  0x31   :  { %2843 = vmatpush3.bf16.msra.mxu1 %v3226_v2  ;;  %v537_v2 = vcombine.high %v515_v60, %v515_v60 }
  0x32   :  { %2844 = vmatprep.subr.bf16.mxu1 %v3229_v3  ;;  %v3279_v3 = vld [vmem:[%s4211_s1 + $0x348] sm:$0xff]  }
  0x33   :  { %2823 = vmatpush3.bf16.msra.mxu0 %v3228_v4  ;;  %v3278_v4 = vld [vmem:[%s4211_s1 + $0x380] sm:$0xff]  }
  0x34   :  { %2824 = vmatprep.subr.bf16.mxu0 %v3231_v5  ;;  %v540_v5 = vcombine.high %v536_v63, %v536_v63 }
  0x35   :  { %2845 = vmatpush3.bf16.msra.mxu1 %v3230_v6  ;;  %v3281_v6 = vld [vmem:[%s4211_s1 + $0x3c8] sm:$0xff]  }
  0x36   :  { %2846 = vmatprep.subr.bf16.mxu1 %v3233_v7  ;;  %v3280_v7 = vld [vmem:[%s4211_s1 + $0x308] sm:$0xff]  }
  0x37   :  { %2825 = vmatpush3.bf16.msra.mxu0 %v3232_v8  ;;  %v3283_v8 = vld [vmem:[%s4211_s1 + $0x350] sm:$0xff]  }
  0x38   :  { %2826 = vmatprep.subr.bf16.mxu0 %v3235_v9  ;;  %v3282_v9 = vld [vmem:[%s4211_s1 + $0x388] sm:$0xff]  }
  0x39   :  { %2847 = vmatpush3.bf16.msra.mxu1 %v3234_v10  ;;  %v3285_v10 = vld [vmem:[%s4211_s1 + $0x3d0] sm:$0xff]  }
  0x3a   :  { %2848 = vmatprep.subr.bf16.mxu1 %v3237_v11  ;;  %v3284_v11 = vld [vmem:[%s4211_s1 + $0x310] sm:$0xff]  }
  0x3b   :  { %2827 = vmatpush3.bf16.msra.mxu0 %v3236_v12  ;;  %v3287_v12 = vld [vmem:[%s4211_s1 + $0x358] sm:$0xff]  }
  0x3c   :  { %2828 = vmatprep.subr.bf16.mxu0 %v3239_v13  ;;  %v3286_v13 = vld [vmem:[%s4211_s1 + $0x390] sm:$0xff]  }
  0x3d   :  { %2849 = vmatpush3.bf16.msra.mxu1 %v3238_v14  ;;  %v3289_v14 = vld [vmem:[%s4211_s1 + $0x3d8] sm:$0xff]  }
  0x3e   :  { %2850 = vmatprep.subr.bf16.mxu1 %v3241_v15  ;;  %v3288_v15 = vld [vmem:[%s4211_s1 + $0x318] sm:$0xff]  }
  0x3f   :  { %2829 = vmatpush3.bf16.msra.mxu0 %v3240_v16  ;;  %v3291_v16 = vld [vmem:[%s4211_s1 + $0x360] sm:$0xff]  }
  0x40   :  { %2858 = vmatprep.subr.bf16.mxu0 %v3243_v18  ;;  %v3293_v18 = vld [vmem:[%s4211_s1 + $0x3e0] sm:$0xff]  }
  0x41   :  { %2851 = vmatpush3.bf16.msra.mxu1 %v3242_v19  ;;  %v3292_v19 = vld [vmem:[%s4211_s1 + $0x320] sm:$0xff]  }
  0x42   :  { %1942 = vmatmul.mubr.bf16.vlgmr.msra.gmra.mrb[4].mxu0 %v473_v17  ;;  %2880 = vmatprep.subr.bf16.mxu1 %v3245_v20  ;;  %v3290_v17 = vld [vmem:[%s4211_s1 + $0x398] sm:$0xff]   ;;  %v3295_v20 = vld [vmem:[%s4211_s1 + $0x368] sm:$0xff]  }
  0x43   :  { %2859 = vmatpush3.bf16.msra.mxu0 %v3244_v21  ;;  %2021 = vmatprep.mubr.bf16.mxu0 %v529_v55  ;;  %v3294_v21 = vld [vmem:[%s4211_s1 + $0x3a0] sm:$0xff]   ;;  %v3328_v55 = vld [vmem:[%s4211_s1 + $0x468] sm:$0xff]  }
  0x44   :  { %1982 = vmatmul.mubr.bf16.vlgmr.msra.gmra.mrb[4].mxu1 %v489_v22  ;;  %2860 = vmatprep.subr.bf16.mxu0 %v3247_v23  ;;  %v3297_v22 = vld [vmem:[%s4211_s1 + $0x3e8] sm:$0xff]  }
  0x45   :  { %2881 = vmatpush3.bf16.msra.mxu1 %v3246_v24  ;;  %2061 = vmatprep.mubr.bf16.mxu1 %v539_v59  ;;  %v3296_v23 = vld [vmem:[%s4211_s1 + $0x328] sm:$0xff]   ;;  %v3299_v24 = vld [vmem:[%s4211_s1 + $0x370] sm:$0xff]  }
  0x46   :  { %2882 = vmatprep.subr.bf16.mxu1 %v3249_v25  ;;  %v3298_v25 = vld [vmem:[%s4211_s1 + $0x3a8] sm:$0xff]   ;;  %v3332_v59 = vld [vmem:[%s4211_s1 + $0x470] sm:$0xff]  }
  0x47   :  { %2861 = vmatpush3.bf16.msra.mxu0 %v3248_v26  ;;  %v3301_v26 = vld [vmem:[%s4211_s1 + $0x3f0] sm:$0xff]  }
  0x48   :  { %2862 = vmatprep.subr.bf16.mxu0 %v3251_v27  ;;  %v3300_v27 = vld [vmem:[%s4211_s1 + $0x330] sm:$0xff]  }
  0x49   :  { %2883 = vmatpush3.bf16.msra.mxu1 %v3250_v28  ;;  %v3303_v28 = vld [vmem:[%s4211_s1 + $0x378] sm:$0xff]  }
  0x4a   :  { %2884 = vmatprep.subr.bf16.mxu1 %v3253_v29  ;;  %v3302_v29 = vld [vmem:[%s4211_s1 + $0x3b0] sm:$0xff]  }
  0x4b   :  { %2863 = vmatpush3.bf16.msra.mxu0 %v3252_v30  ;;  %v3305_v30 = vld [vmem:[%s4211_s1 + $0x3f8] sm:$0xff]  }
  0x4c   :  { %2864 = vmatprep.subr.bf16.mxu0 %v3255_v31  ;;  %v3304_v31 = vld [vmem:[%s4211_s1 + $0x338] sm:$0xff]  }
  0x4d   :  { %2885 = vmatpush3.bf16.msra.mxu1 %v3254_v32  ;;  %v522_v32 = vrot.slane %v3748_v52, %v3559_v41  ;;  %v3323_v52 = vld [vmem:[%s4211_s1 + $0x498] sm:$0xff]  }
  0x4e   :  { %2886 = vmatprep.subr.bf16.mxu1 %v3257_v33  ;;  %v3308_v33 = vld [vmem:[%s4211_s1 + $0x440] sm:$0xff]  }
  0x4f   :  { %2865 = vmatpush3.bf16.msra.mxu0 %v3256_v34  ;;  %v3307_v34 = vld [vmem:[%s4211_s1 + $0x3b8] sm:$0xff]  }
  0x50   :  { %2866 = vmatprep.subr.bf16.mxu0 %v3259_v35  ;;  %v3310_v35 = vld [vmem:[%s4211_s1 + $0x4c0] sm:$0xff]  }
  0x51   :  { %2887 = vmatpush3.bf16.msra.mxu1 %v3258_v36  ;;  %v3309_v36 = vld [vmem:[%s4211_s1 + $0x400] sm:$0xff]  }
  0x52   :  { %2888 = vmatprep.subr.bf16.mxu1 %v3261_v37  ;;  %v538_v37 = vcombine.high %v522_v32, %v522_v32 }
  0x53   :  { %2867 = vmatpush3.bf16.msra.mxu0 %v3260_v38  ;;  %v3312_v38 = vld [vmem:[%s4211_s1 + $0x448] sm:$0xff]  }
  0x54   :  { %2868 = vmatprep.subr.bf16.mxu0 %v3263_v39  ;;  %v3311_v39 = vld [vmem:[%s4211_s1 + $0x480] sm:$0xff]  }
  0x55   :  { %2889 = vmatpush3.bf16.msra.mxu1 %v3262_v40  ;;  %v3314_v40 = vld [vmem:[%s4211_s1 + $0x4c8] sm:$0xff]  }
  0x56   :  { %2890 = vmatprep.subr.bf16.mxu1 %v3265_v42  ;;  %v3313_v42 = vld [vmem:[%s4211_s1 + $0x408] sm:$0xff]  }
  0x57   :  { %2869 = vmatpush3.bf16.msra.mxu0 %v3264_v43  ;;  %v3316_v43 = vld [vmem:[%s4211_s1 + $0x450] sm:$0xff]  }
  0x58   :  { %2870 = vmatprep.subr.bf16.mxu0 %v3267_v44  ;;  %v3315_v44 = vld [vmem:[%s4211_s1 + $0x488] sm:$0xff]  }
  0x59   :  { %2891 = vmatpush3.bf16.msra.mxu1 %v3266_v46  ;;  %v3317_v46 = vld [vmem:[%s4211_s1 + $0x410] sm:$0xff]  }
  0x5a   :  { %2892 = vmatprep.subr.bf16.mxu1 %v3269_v49  ;;  %v3322_v49 = vld [vmem:[%s4211_s1 + $0x4d8] sm:$0xff]  }
  0x5b   :  { %2871 = vmatpush3.bf16.msra.mxu0 %v3268_v50  ;;  %v3321_v50 = vld [vmem:[%s4211_s1 + $0x418] sm:$0xff]  }
  0x5c   :  { %2872 = vmatprep.subr.bf16.mxu0 %v3271_v53  ;;  %v3326_v53 = vld [vmem:[%s4211_s1 + $0x4e0] sm:$0xff]  }
  0x5d   :  { %2893 = vmatpush3.bf16.msra.mxu1 %v3270_v54  ;;  %v3325_v54 = vld [vmem:[%s4211_s1 + $0x420] sm:$0xff]  }
  0x5e   :  { %2894 = vmatprep.subr.bf16.mxu1 %v3273_v57  ;;  %v3330_v57 = vld [vmem:[%s4211_s1 + $0x4e8] sm:$0xff]  }
  0x5f   :  { %2873 = vmatpush3.bf16.msra.mxu0 %v3272_v58  ;;  %v3329_v58 = vld [vmem:[%s4211_s1 + $0x428] sm:$0xff]  }
  0x60   :  { %2902 = vmatprep.subr.bf16.mxu0 %v3275_v61  ;;  %v3331_v61 = vld [vmem:[%s4211_s1 + $0x4a8] sm:$0xff]  }
  0x61   :  { %2895 = vmatpush3.bf16.msra.mxu1 %v3274_v62 }
  0x62   :  { %2022 = vmatmul.mubr.bf16.vlgmr.msra.gmra.mrb[8].mxu0 %v515_v60  ;;  %2924 = vmatprep.subr.bf16.mxu1 %v3277_v0  ;;  %v30_v60 = vld [vmem:[%s4210_s0 + $0x10] sm:$0xff] }
  0x63   :  { %2903 = vmatpush3.bf16.msra.mxu0 %v3276_v1  ;;  %2101 = vmatprep.mubr.bf16.mxu0 %v536_v63  ;;  %v548_v62 = vrot.slane %v30_v60, %v3559_v41  ;;  %v541_v63 = vcombine.high %v30_v60, %v30_v60  ;;  %v3334_v0 = vld [vmem:[%s4211_s1 + $0x4f0] sm:$0xff]  }
  0x64   :  { %2062 = vmatmul.mubr.bf16.vlgmr.msra.gmra.mrb[8].mxu1 %v537_v2  ;;  %2904 = vmatprep.subr.bf16.mxu0 %v3279_v3  ;;  %v3333_v1 = vld [vmem:[%s4211_s1 + $0x430] sm:$0xff]  }
  0x65   :  { %2925 = vmatpush3.bf16.msra.mxu1 %v3278_v4  ;;  %2141 = vmatprep.mubr.bf16.mxu1 %v540_v5  ;;  %v556_v2 = vcombine.high %v548_v62, %v548_v62  ;;  %v3954_v3 = vrot.slane %v541_v63, %v3559_v41  ;;  %v3336_v4 = vld [vmem:[%s4211_s1 + $0x478] sm:$0xff]   ;;  %v3335_v5 = vld [vmem:[%s4211_s1 + $0x4b0] sm:$0xff]  }
  0x66   :  { %2926 = vmatprep.subr.bf16.mxu1 %v3281_v6 }
  0x67   :  { %2905 = vmatpush3.bf16.msra.mxu0 %v3280_v7  ;;  %v578_v6 = vrot.slane %v556_v2, %v3559_v41  ;;  %v557_v7 = vcombine.high %v3954_v3, %v3954_v3 }
  0x68   :  { %2906 = vmatprep.subr.bf16.mxu0 %v3283_v8  ;;  %v3338_v8 = vld [vmem:[%s4211_s1 + $0x4f8] sm:$0xff]  }
  0x69   :  { %2927 = vmatpush3.bf16.msra.mxu1 %v3282_v9  ;;  %v3337_v9 = vld [vmem:[%s4211_s1 + $0x438] sm:$0xff]  }
  0x6a   :  { %2928 = vmatprep.subr.bf16.mxu1 %v3285_v10  ;;  %v588_v10 = vcombine.high %v578_v6, %v578_v6 }
  0x6b   :  { %2907 = vmatpush3.bf16.msra.mxu0 %v3284_v11  ;;  %v564_v11 = vrot.slane %v548_v62, %v3559_v41 }
  0x6c   :  { %2908 = vmatprep.subr.bf16.mxu0 %v3287_v12  ;;  %v3340_v12 = vld [vmem:[%s4211_s1 + $0x540] sm:$0xff]  }
  0x6d   :  { %2929 = vmatpush3.bf16.msra.mxu1 %v3286_v13  ;;  %v3339_v13 = vld [vmem:[%s4211_s1 + $0x4b8] sm:$0xff]  }
  0x6e   :  { %2930 = vmatprep.subr.bf16.mxu1 %v3289_v14  ;;  %v585_v14 = vrot.slane %v557_v7, %v3559_v41 }
  0x6f   :  { %2909 = vmatpush3.bf16.msra.mxu0 %v3288_v15  ;;  %v3342_v15 = vld [vmem:[%s4211_s1 + $0x5c0] sm:$0xff]  }
  0x70   :  { %2910 = vmatprep.subr.bf16.mxu0 %v3291_v16  ;;  %v3341_v16 = vld [vmem:[%s4211_s1 + $0x500] sm:$0xff]  }
  0x71   :  { %2931 = vmatpush3.bf16.msra.mxu1 %v3290_v17  ;;  %v586_v17 = vcombine.high %v564_v11, %v564_v11 }
  0x72   :  { %2932 = vmatprep.subr.bf16.mxu1 %v3293_v18  ;;  %v3344_v18 = vld [vmem:[%s4211_s1 + $0x548] sm:$0xff]  }
  0x73   :  { %2911 = vmatpush3.bf16.msra.mxu0 %v3292_v19  ;;  %v3343_v19 = vld [vmem:[%s4211_s1 + $0x580] sm:$0xff]  }
  0x74   :  { %2912 = vmatprep.subr.bf16.mxu0 %v3295_v20  ;;  %v589_v20 = vcombine.high %v585_v14, %v585_v14 }
  0x75   :  { %2933 = vmatpush3.bf16.msra.mxu1 %v3294_v21  ;;  %v3346_v21 = vld [vmem:[%s4211_s1 + $0x5c8] sm:$0xff]  }
  0x76   :  { %2934 = vmatprep.subr.bf16.mxu1 %v3297_v22  ;;  %v3345_v22 = vld [vmem:[%s4211_s1 + $0x508] sm:$0xff]  }
  0x77   :  { %2913 = vmatpush3.bf16.msra.mxu0 %v3296_v23  ;;  %v3348_v23 = vld [vmem:[%s4211_s1 + $0x550] sm:$0xff]  }
  0x78   :  { %2914 = vmatprep.subr.bf16.mxu0 %v3299_v24  ;;  %v3347_v24 = vld [vmem:[%s4211_s1 + $0x588] sm:$0xff]  }
  0x79   :  { %2935 = vmatpush3.bf16.msra.mxu1 %v3298_v25  ;;  %v3350_v25 = vld [vmem:[%s4211_s1 + $0x5d0] sm:$0xff]  }
  0x7a   :  { %2936 = vmatprep.subr.bf16.mxu1 %v3301_v26  ;;  %v3349_v26 = vld [vmem:[%s4211_s1 + $0x510] sm:$0xff]  }
  0x7b   :  { %2915 = vmatpush3.bf16.msra.mxu0 %v3300_v27  ;;  %v3352_v27 = vld [vmem:[%s4211_s1 + $0x558] sm:$0xff]  }
  0x7c   :  { %2916 = vmatprep.subr.bf16.mxu0 %v3303_v28  ;;  %v3351_v28 = vld [vmem:[%s4211_s1 + $0x590] sm:$0xff]  }
  0x7d   :  { %2937 = vmatpush3.bf16.msra.mxu1 %v3302_v29  ;;  %v3354_v29 = vld [vmem:[%s4211_s1 + $0x5d8] sm:$0xff]  }
  0x7e   :  { %2938 = vmatprep.subr.bf16.mxu1 %v3305_v30  ;;  %v3353_v30 = vld [vmem:[%s4211_s1 + $0x518] sm:$0xff]  }
  0x7f   :  { %2917 = vmatpush3.bf16.msra.mxu0 %v3304_v31  ;;  %v3356_v31 = vld [vmem:[%s4211_s1 + $0x560] sm:$0xff]  }
  0x80   :  { %2946 = vmatprep.subr.bf16.mxu0 %v3308_v33  ;;  %v3358_v33 = vld [vmem:[%s4211_s1 + $0x5e0] sm:$0xff]  }
  0x81   :  { %2939 = vmatpush3.bf16.msra.mxu1 %v3307_v34  ;;  %v3357_v34 = vld [vmem:[%s4211_s1 + $0x520] sm:$0xff]  }
  0x82   :  { %2102 = vmatmul.mubr.bf16.vlgmr.msra.gmra.mrb[12].mxu0 %v522_v32  ;;  %2968 = vmatprep.subr.bf16.mxu1 %v3310_v35  ;;  %v3355_v32 = vld [vmem:[%s4211_s1 + $0x598] sm:$0xff]   ;;  %v3360_v35 = vld [vmem:[%s4211_s1 + $0x568] sm:$0xff]  }
  0x83   :  { %2947 = vmatpush3.bf16.msra.mxu0 %v3309_v36  ;;  %2181 = vmatprep.mubr.bf16.mxu0 %v578_v6  ;;  %v3359_v36 = vld [vmem:[%s4211_s1 + $0x5a0] sm:$0xff]  }
  0x84   :  { %2142 = vmatmul.mubr.bf16.vlgmr.msra.gmra.mrb[12].mxu1 %v538_v37  ;;  %2948 = vmatprep.subr.bf16.mxu0 %v3312_v38  ;;  %v3362_v37 = vld [vmem:[%s4211_s1 + $0x5e8] sm:$0xff]  }
  0x85   :  { %2969 = vmatpush3.bf16.msra.mxu1 %v3311_v39  ;;  %2221 = vmatprep.mubr.bf16.mxu1 %v588_v10  ;;  %v3361_v38 = vld [vmem:[%s4211_s1 + $0x528] sm:$0xff]   ;;  %v3364_v39 = vld [vmem:[%s4211_s1 + $0x570] sm:$0xff]  }
  0x86   :  { %2970 = vmatprep.subr.bf16.mxu1 %v3314_v40  ;;  %v3363_v40 = vld [vmem:[%s4211_s1 + $0x5a8] sm:$0xff]  }
  0x87   :  { %2949 = vmatpush3.bf16.msra.mxu0 %v3313_v42  ;;  %v3366_v42 = vld [vmem:[%s4211_s1 + $0x5f0] sm:$0xff]  }
  0x88   :  { %2950 = vmatprep.subr.bf16.mxu0 %v3316_v43  ;;  %v3365_v43 = vld [vmem:[%s4211_s1 + $0x530] sm:$0xff]  }
  0x89   :  { %2971 = vmatpush3.bf16.msra.mxu1 %v3315_v44  ;;  %v3368_v44 = vld [vmem:[%s4211_s1 + $0x578] sm:$0xff]  }
  0x8a   :  { %2972 = vmatprep.subr.bf16.mxu1 %v3318_v45  ;;  %v3367_v45 = vld [vmem:[%s4211_s1 + $0x5b0] sm:$0xff]  }
  0x8b   :  { %2951 = vmatpush3.bf16.msra.mxu0 %v3317_v46  ;;  %v3370_v46 = vld [vmem:[%s4211_s1 + $0x5f8] sm:$0xff]  }
  0x8c   :  { %2952 = vmatprep.subr.bf16.mxu0 %v3320_v47  ;;  %v3369_v47 = vld [vmem:[%s4211_s1 + $0x538] sm:$0xff]  }
  0x8d   :  { %2973 = vmatpush3.bf16.msra.mxu1 %v3319_v48  ;;  %v571_v48 = vrot.slane %v3954_v3, %v3559_v41 }
  0x8e   :  { %2974 = vmatprep.subr.bf16.mxu1 %v3322_v49  ;;  %v3372_v49 = vld [vmem:[%s4211_s1 + $0x5b8] sm:$0xff]  }
  0x8f   :  { %2953 = vmatpush3.bf16.msra.mxu0 %v3321_v50  ;;  %v3373_v50 = vld [vmem:[%s4211_s1 + $0x600] sm:$0xff]  }
  0x90   :  { %2954 = vmatprep.subr.bf16.mxu0 %v3324_v51 }
  0x91   :  { %2975 = vmatpush3.bf16.msra.mxu1 %v3323_v52 }
  0x92   :  { %2976 = vmatprep.subr.bf16.mxu1 %v3326_v53 }
  0x93   :  { %2955 = vmatpush3.bf16.msra.mxu0 %v3325_v54 }
  0x94   :  { %2956 = vmatprep.subr.bf16.mxu0 %v3328_v55 }
  0x95   :  { %2977 = vmatpush3.bf16.msra.mxu1 %v3327_v56 }
  0x96   :  { %2978 = vmatprep.subr.bf16.mxu1 %v3330_v57 }
  0x97   :  { %2957 = vmatpush3.bf16.msra.mxu0 %v3329_v58 }
  0x98   :  { %2958 = vmatprep.subr.bf16.mxu0 %v3332_v59 }
  0x99   :  { %2979 = vmatpush3.bf16.msra.mxu1 %v3331_v61 }
  0x9a   :  { %2980 = vmatprep.subr.bf16.mxu1 %v3334_v0 }
  0x9b   :  { %2959 = vmatpush3.bf16.msra.mxu0 %v3333_v1 }
  0x9c   :  { %2960 = vmatprep.subr.bf16.mxu0 %v3336_v4 }
  0x9d   :  { %2981 = vmatpush3.bf16.msra.mxu1 %v3335_v5 }
  0x9e   :  { %2982 = vmatprep.subr.bf16.mxu1 %v3338_v8 }
  0x9f   :  { %2961 = vmatpush3.bf16.msra.mxu0 %v3337_v9 }
  0xa0   :  { %2990 = vmatprep.subr.bf16.mxu0 %v3340_v12 }
  0xa1   :  { %2983 = vmatpush3.bf16.msra.mxu1 %v3339_v13 }
  0xa2   :  { %2182 = vmatmul.mubr.bf16.vlgmr.msra.gmra.mrb[16].mxu0 %v564_v11  ;;  %3012 = vmatprep.subr.bf16.mxu1 %v3342_v15 }
  0xa3   :  { %2991 = vmatpush3.bf16.msra.mxu0 %v3341_v16  ;;  %2261 = vmatprep.mubr.bf16.mxu0 %v585_v14 }
  0xa4   :  { %2222 = vmatmul.mubr.bf16.vlgmr.msra.gmra.mrb[16].mxu1 %v586_v17  ;;  %2992 = vmatprep.subr.bf16.mxu0 %v3344_v18 }
  0xa5   :  { %3013 = vmatpush3.bf16.msra.mxu1 %v3343_v19  ;;  %2301 = vmatprep.mubr.bf16.mxu1 %v589_v20 }
  0xa6   :  { %3014 = vmatprep.subr.bf16.mxu1 %v3346_v21 }
  0xa7   :  { %2993 = vmatpush3.bf16.msra.mxu0 %v3345_v22 }
  0xa8   :  { %2994 = vmatprep.subr.bf16.mxu0 %v3348_v23 }
  0xa9   :  { %3015 = vmatpush3.bf16.msra.mxu1 %v3347_v24 }
  0xaa   :  { %3016 = vmatprep.subr.bf16.mxu1 %v3350_v25 }
  0xab   :  { %2995 = vmatpush3.bf16.msra.mxu0 %v3349_v26 }
  0xac   :  { %2996 = vmatprep.subr.bf16.mxu0 %v3352_v27 }
  0xad   :  { %3017 = vmatpush3.bf16.msra.mxu1 %v3351_v28 }
  0xae   :  { %3018 = vmatprep.subr.bf16.mxu1 %v3354_v29 }
  0xaf   :  { %2997 = vmatpush3.bf16.msra.mxu0 %v3353_v30 }
  0xb0   :  { %2998 = vmatprep.subr.bf16.mxu0 %v3356_v31 }
  0xb1   :  { %3019 = vmatpush3.bf16.msra.mxu1 %v3355_v32 }
  0xb2   :  { %3020 = vmatprep.subr.bf16.mxu1 %v3358_v33 }
  0xb3   :  { %2999 = vmatpush3.bf16.msra.mxu0 %v3357_v34 }
  0xb4   :  { %3000 = vmatprep.subr.bf16.mxu0 %v3360_v35 }
  0xb5   :  { %3021 = vmatpush3.bf16.msra.mxu1 %v3359_v36 }
  0xb6   :  { %3022 = vmatprep.subr.bf16.mxu1 %v3362_v37 }
  0xb7   :  { %3001 = vmatpush3.bf16.msra.mxu0 %v3361_v38 }
  0xb8   :  { %3002 = vmatprep.subr.bf16.mxu0 %v3364_v39 }
  0xb9   :  { %3023 = vmatpush3.bf16.msra.mxu1 %v3363_v40 }
  0xba   :  { %3024 = vmatprep.subr.bf16.mxu1 %v3366_v42 }
  0xbb   :  { %3003 = vmatpush3.bf16.msra.mxu0 %v3365_v43 }
  0xbc   :  { %3004 = vmatprep.subr.bf16.mxu0 %v3368_v44 }
  0xbd   :  { %3025 = vmatpush3.bf16.msra.mxu1 %v3367_v45 }
  0xbe   :  { %3026 = vmatprep.subr.bf16.mxu1 %v3370_v46 }
  0xbf   :  { %3005 = vmatpush3.bf16.msra.mxu0 %v3369_v47 }
  0xc0   :  { %12 = vsyncpa [#allocation3], 0  ;;  %v3410_v51 = vmov 0.0   ;;  %v587_v52 = vcombine.high %v571_v48, %v571_v48  ;;  %v3374_v53 = vld [vmem:[%s4211_s1 + $0x608] sm:$0xff]   ;;  %vm3411_vm0 = vmmov 0   ;;  %v3375_v54 = vld [vmem:[%s4211_s1 + $0x610] sm:$0xff]  }
  0xc1   :  { %3068 = vmatprep.subr.bf16.mxu0 %v3410_v51  ;;  %3027 = vmatpush3.bf16.msra.mxu1 %v3372_v49  ;;  %v3376_v55 = vld [vmem:[%s4211_s1 + $0x618] sm:$0xff]   ;;  %v3377_v56 = vld [vmem:[%s4211_s1 + $0x620] sm:$0xff]   ;;  %v3378_v57 = vld [vmem:[%s4211_s1 + $0x628] sm:$0xff]   ;;  %v3412_v26 = vmov 0.0|0.0   ;;  %vm2462_vm1 = vcmask 1041408   ;;  %vm2458_vm2 = vcmask 408576  }
  0xc2   :  { %2262 = vmatmul.mubr.bf16.vlgmr.msra.gmra.mrb[20].mxu0 %v571_v48  ;;  %v3379_v58 = vld [vmem:[%s4211_s1 + $0x630] sm:$0xff]   ;;  %v3380_v59 = vld [vmem:[%s4211_s1 + $0x638] sm:$0xff]   ;;  %v2564_v63 = vld [vmem:[%s4212_s2] ss:$0 sm:$0xff]  ;;  %3140 = vmatprep.subr.bf16.mxu1 %v3412_v26  ;;  %vm2536_vm3 = vcmask 74752  }
  0xc3   :  { %3069 = vmatpush3.bf16.msra.mxu0 %v3373_v50  ;;  %3084 = vmatprep.mubr.msk.bf16.mxu0 %vm3411_vm0, %v3410_v51  ;;  %v2565_v60 = vld.sshfl [vmem:[%s4210_s0 + $0x18] sm:$0x1 pattern:$0x75316420]  ;;  %v2350_v17 = vld [vmem:[%s4213_s3] sm:$0xff]  ;;  %v2351_v18 = vld [vmem:[%s4213_s3 + $0x8] sm:$0xff] }
  0xc4   :  { %2302 = vmatmul.mubr.bf16.vlgmr.msra.gmra.mrb[20].mxu1 %v587_v52  ;;  %3070 = vmatprep.subr.bf16.mxu0 %v3410_v51  ;;  %v603_v61 = vrot.slane %v2565_v60, %v3559_v41  ;;  %v3141_v22 = vpack.c.bf16 %v2351_v18, %v2350_v17  ;;  %v2352_v23 = vld [vmem:[%s4213_s3 + $0x10] sm:$0xff]  ;;  %v2353_v24 = vld [vmem:[%s4213_s3 + $0x18] sm:$0xff]  ;;  %v2354_v29 = vld [vmem:[%s4213_s3 + $0x20] sm:$0xff] }
  0xc5   :  { %3120 = vmatprep.mubr.msk.f32.mxu1 %vm3411_vm0, %v3410_v51  ;;  %v3144_v28 = vpack.c.bf16 %v2353_v24, %v2352_v23  ;;  %v2355_v30 = vld [vmem:[%s4213_s3 + $0x28] sm:$0xff]  ;;  %v2356_v32 = vld [vmem:[%s4213_s3 + $0x30] sm:$0xff]  ;;  %v2357_v33 = vld [vmem:[%s4213_s3 + $0x38] sm:$0xff] }
  0xc6   :  { %3142 = vmatpush3.bf16.msra.mxu1 %v3141_v22  ;;  %v3147_v31 = vpack.c.bf16 %v2355_v30, %v2354_v29  ;;  %v3150_v34 = vpack.c.bf16 %v2357_v33, %v2356_v32  ;;  %v2358_v35 = vld [vmem:[%s4213_s3 + $0x40] sm:$0xff]  ;;  %v2359_v36 = vld [vmem:[%s4213_s3 + $0x48] sm:$0xff]  ;;  %v2360_v38 = vld [vmem:[%s4213_s3 + $0x50] sm:$0xff] }
  0xc7   :  { %3071 = vmatpush3.bf16.msra.mxu0 %v3374_v53  ;;  %3143 = vmatprep.subr.bf16.mxu1 %v3412_v26  ;;  %v3153_v37 = vpack.c.bf16 %v2359_v36, %v2358_v35  ;;  %v2361_v39 = vld [vmem:[%s4213_s3 + $0x58] sm:$0xff]  ;;  %v2362_v42 = vld [vmem:[%s4213_s3 + $0x60] sm:$0xff]  ;;  %v2363_v43 = vld [vmem:[%s4213_s3 + $0x68] sm:$0xff] }
  0xc8   :  { %3072 = vmatprep.subr.bf16.mxu0 %v3410_v51  ;;  %v3156_v40 = vpack.c.bf16 %v2361_v39, %v2360_v38  ;;  %v3159_v44 = vpack.c.bf16 %v2363_v43, %v2362_v42  ;;  %v2364_v45 = vld [vmem:[%s4213_s3 + $0x70] sm:$0xff]  ;;  %v2365_v46 = vld [vmem:[%s4213_s3 + $0x78] sm:$0xff]  ;;  %v2444_v60 = vld [vmem:[%s4215_s5] sm:$0xff] }
  0xc9   :  { %v3162_v48 = vpack.c.bf16 %v2365_v46, %v2364_v45 }
  0xca   :  { %3145 = vmatpush3.bf16.msra.mxu1 %v3144_v28 }
  0xcb   :  { %3073 = vmatpush3.bf16.msra.mxu0 %v3375_v54  ;;  %3146 = vmatprep.subr.bf16.mxu1 %v3412_v26 }
  0xcc   :  { %3074 = vmatprep.subr.bf16.mxu0 %v3410_v51 }
  0xce   :  { %3148 = vmatpush3.bf16.msra.mxu1 %v3147_v31 }
  0xcf   :  { %3075 = vmatpush3.bf16.msra.mxu0 %v3376_v55  ;;  %3149 = vmatprep.subr.bf16.mxu1 %v3412_v26 }
  0xd0   :  { %3076 = vmatprep.subr.bf16.mxu0 %v3410_v51 }
  0xd2   :  { %3151 = vmatpush3.bf16.msra.mxu1 %v3150_v34 }
  0xd3   :  { %3077 = vmatpush3.bf16.msra.mxu0 %v3377_v56  ;;  %3152 = vmatprep.subr.bf16.mxu1 %v3412_v26 }
  0xd4   :  { %3078 = vmatprep.subr.bf16.mxu0 %v3410_v51 }
  0xd6   :  { %3154 = vmatpush3.bf16.msra.mxu1 %v3153_v37 }
  0xd7   :  { %3079 = vmatpush3.bf16.msra.mxu0 %v3378_v57  ;;  %3155 = vmatprep.subr.bf16.mxu1 %v3412_v26 }
  0xd8   :  { %3080 = vmatprep.subr.bf16.mxu0 %v3410_v51 }
  0xda   :  { %3157 = vmatpush3.bf16.msra.mxu1 %v3156_v40 }
  0xdb   :  { %3081 = vmatpush3.bf16.msra.mxu0 %v3379_v58  ;;  %3158 = vmatprep.subr.bf16.mxu1 %v3412_v26 }
  0xdc   :  { %3082 = vmatprep.subr.bf16.mxu0 %v3410_v51 }
  0xde   :  { %3160 = vmatpush3.bf16.msra.mxu1 %v3159_v44 }
  0xdf   :  { %3083 = vmatpush3.bf16.msra.mxu0 %v3380_v59  ;;  %3161 = vmatprep.subr.bf16.mxu1 %v3412_v26 }
  0xe0   :  { %3164 = vmatprep.subr.bf16.mxu0 %v3412_v26 }
  0xe2   :  { %3085 = vmatmul.mubr.bf16.vlgmr.msra.gmra.mrb[24].mxu0 %v603_v61  ;;  %3163 = vmatpush3.bf16.msra.mxu1 %v3162_v48  ;;  %v2445_v61 = vld [vmem:[%s4215_s5 + $0x8] sm:$0xff]  ;;  %v2766_v48 = vld [vmem:[%s4214_s4] ss:$0 sm:$0xff]  ;;  %s3413_s4 = smov [#allocation2]  }
  0xe3   :  { %3137 = vmatprep.mubr.msk.f32.mxu0 %vm3411_vm0, %v3410_v51 }
  0xf5   :  { %v2786_v62 = vpop.f32.mrb[0].mxu0 }
  0xf6   :  { %v2787_v0 = vpop.f32.mrb[1].mxu0 }
  0xf7   :  { %v2788_v1 = vadd.f32 %v2787_v0, %v2786_v62  ;;  %v2789_v2 = vpop.f32.mrb[2].mxu0  ;;  %v2808_v3 = vpop.f32.mrb[0].mxu1  ;;  %v2446_v62 = vld [vmem:[%s4215_s5 + $0x10] sm:$0xff]  ;;  %v3165_v0 = vpack.c.bf16 %v2445_v61, %v2444_v60 }
  0xf8   :  { %v2790_v4 = vpop.f32.mrb[3].mxu0  ;;  %v2809_v5 = vpop.f32.mrb[1].mxu1 }
  0xf9   :  { %v1864_v6 = vadd.f32 %v2788_v1, %v2564_v63  ;;  %v2810_v7 = vadd.f32 %v2809_v5, %v2808_v3  ;;  %v2811_v8 = vpop.f32.mrb[2].mxu1  ;;  %v2447_v1 = vld [vmem:[%s4215_s5 + $0x18] sm:$0xff]  ;;  %3166 = vmatpush3.bf16.msra.mxu0 %v3165_v0  ;;  %v2448_v3 = vld [vmem:[%s4215_s5 + $0x20] sm:$0xff]  ;;  %v2449_v4 = vld [vmem:[%s4215_s5 + $0x28] sm:$0xff] }
  0xfa   :  { %v2812_v41 = vpop.f32.mrb[3].mxu1  ;;  %v3168_v2 = vpack.c.bf16 %v2447_v1, %v2446_v62  ;;  %3167 = vmatprep.subr.bf16.mxu0 %v3412_v26  ;;  %v3171_v5 = vpack.c.bf16 %v2449_v4, %v2448_v3 }
  0xfb   :  { %v1904_v9 = vadd.f32 %v2810_v7, %v1864_v6 }
  0xfd   :  { %3169 = vmatpush3.bf16.msra.mxu0 %v3168_v2 }
  0xfe   :  { %3170 = vmatprep.subr.bf16.mxu0 %v3412_v26 }
 0x101   :  { %3172 = vmatpush3.bf16.msra.mxu0 %v3171_v5 }
 0x102   :  { %3135 = vmatprep.subr.mxu0 %v3410_v51 }
 0x115   :  { %v2830_v10 = vpop.f32.mrb[4].mxu0 }
 0x116   :  { %v2831_v11 = vpop.f32.mrb[5].mxu0 }
 0x117   :  { %v2832_v12 = vadd.f32 %v2831_v11, %v2830_v10  ;;  %v2833_v13 = vpop.f32.mrb[6].mxu0  ;;  %v2852_v14 = vpop.f32.mrb[4].mxu1 }
 0x118   :  { %v2834_v15 = vpop.f32.mrb[7].mxu0  ;;  %v2853_v16 = vpop.f32.mrb[5].mxu1 }
 0x119   :  { %v1944_v19 = vadd.f32 %v2832_v12, %v1904_v9  ;;  %v2854_v20 = vadd.f32 %v2853_v16, %v2852_v14  ;;  %v2855_v21 = vpop.f32.mrb[6].mxu1 }
 0x11a   :  { %v2856_v25 = vpop.f32.mrb[7].mxu1 }
 0x11b   :  { %v1984_v27 = vadd.f32 %v2854_v20, %v1944_v19 }
 0x135   :  { %v2874_v47 = vpop.f32.mrb[8].mxu0 }
 0x136   :  { %v2875_v49 = vpop.f32.mrb[9].mxu0 }
 0x137   :  { %v2876_v50 = vadd.f32 %v2875_v49, %v2874_v47  ;;  %v2877_v52 = vpop.f32.mrb[10].mxu0  ;;  %v2896_v53 = vpop.f32.mrb[8].mxu1  ;;  %v2450_v47 = vld [vmem:[%s4215_s5 + $0x30] sm:$0x3]  ;;  %s2556_s5 = sshll.u32 %s3413_s4, 4  ;;  %s2557_s5 = int_to_ptr.vmem [resolvable:$true] %s2556_s5 }
 0x138   :  { %v2878_v54 = vpop.f32.mrb[11].mxu0  ;;  %v2897_v55 = vpop.f32.mrb[9].mxu1  ;;  %3136 = vmatpush3.msk.msra.mxu0 %vm2462_vm1, %v2450_v47  ;;  %p3390_p1 = scmp.lt.s32.totalorder %s2557_s5, %s2557_s5 }
 0x139   :  { %v2024_v56 = vadd.f32 %v2876_v50, %v1984_v27  ;;  %v2898_v57 = vadd.f32 %v2897_v55, %v2896_v53  ;;  %v2899_v58 = vpop.f32.mrb[10].mxu1  ;;  %v2767_v54 = vld [vmem:[%s4216_s6] ss:$0 sm:$0xff]  ;;  %s3385_s6 = scalar_lea.vmem %s2557_s5, 32 }
 0x13a   :  { %v2900_v59 = vpop.f32.mrb[11].mxu1  ;;  %p3386_p0 = scmp.ne.s32.totalorder %s2557_s5, %s3385_s6  ;;  %p3391_p2 = scmp.lt.s32.totalorder %s3385_s6, %s3385_s6 }
 0x13b   :  { %v2064_v63 = vadd.f32 %v2898_v57, %v2024_v56 }
 0x13c   :  { %p3392_p3 = por %p3391_p2, %p3390_p1 }
 0x13e   :  { %p3393_p4 = pnand %p3392_p3, %p3386_p0 }
 0x155   :  { %v2918_v6 = vpop.f32.mrb[12].mxu0 }
 0x156   :  { %v2919_v7 = vpop.f32.mrb[13].mxu0 }
 0x157   :  { %v2920_v8 = vadd.f32 %v2919_v7, %v2918_v6  ;;  %v2921_v41 = vpop.f32.mrb[14].mxu0  ;;  %v2940_v9 = vpop.f32.mrb[12].mxu1 }
 0x158   :  { %v2922_v10 = vpop.f32.mrb[15].mxu0  ;;  %v2941_v11 = vpop.f32.mrb[13].mxu1 }
 0x159   :  { %v2104_v12 = vadd.f32 %v2920_v8, %v2064_v63  ;;  %v2942_v13 = vadd.f32 %v2941_v11, %v2940_v9  ;;  %v2943_v14 = vpop.f32.mrb[14].mxu1 }
 0x15a   :  { %v2944_v15 = vpop.f32.mrb[15].mxu1 }
 0x15b   :  { %v2144_v16 = vadd.f32 %v2942_v13, %v2104_v12 }
 0x175   :  { %v2962_v17 = vpop.f32.mrb[16].mxu0 }
 0x176   :  { %v2963_v18 = vpop.f32.mrb[17].mxu0 }
 0x177   :  { %v2964_v19 = vadd.f32 %v2963_v18, %v2962_v17  ;;  %v2965_v20 = vpop.f32.mrb[18].mxu0  ;;  %v2984_v21 = vpop.f32.mrb[16].mxu1 }
 0x178   :  { %v2966_v22 = vpop.f32.mrb[19].mxu0  ;;  %v2985_v23 = vpop.f32.mrb[17].mxu1 }
 0x179   :  { %v2184_v51 = vadd.f32 %v2964_v19, %v2144_v16  ;;  %v2986_v24 = vadd.f32 %v2985_v23, %v2984_v21  ;;  %v2987_v25 = vpop.f32.mrb[18].mxu1 }
 0x17a   :  { %v2988_v26 = vpop.f32.mrb[19].mxu1 }
 0x17b   :  { %v2224_v27 = vadd.f32 %v2986_v24, %v2184_v51 }
 0x195   :  { %v3006_v28 = vpop.f32.mrb[20].mxu0 }
 0x196   :  { %v3007_v29 = vpop.f32.mrb[21].mxu0 }
 0x197   :  { %v3008_v30 = vadd.f32 %v3007_v29, %v3006_v28  ;;  %v3009_v31 = vpop.f32.mrb[22].mxu0  ;;  %v3028_v32 = vpop.f32.mrb[20].mxu1 }
 0x198   :  { %v3010_v33 = vpop.f32.mrb[23].mxu0  ;;  %v3029_v34 = vpop.f32.mrb[21].mxu1 }
 0x199   :  { %v2264_v35 = vadd.f32 %v3008_v30, %v2224_v27  ;;  %v3030_v36 = vadd.f32 %v3029_v34, %v3028_v32  ;;  %v3031_v37 = vpop.f32.mrb[22].mxu1 }
 0x19a   :  { %v3032_v38 = vpop.f32.mrb[23].mxu1 }
 0x19b   :  { %v2304_v39 = vadd.f32 %v3030_v36, %v2264_v35 }
 0x1b5   :  { %v2343_v40 = vpop.f32.mrb[24].mxu0 }
 0x1b6   :  { %v2344_v42 = vadd.f32 %v2343_v40, %v2304_v39  ;;  %v3086_v43 = vpop.f32.mrb[25].mxu0 }
 0x1b7   :  { %v2346_v44 = vpop.f32.mrb[26].mxu0 }
 0x1b8   :  { %v2349_v45 = vmax.f32 %v2344_v42, 0.0  ;;  %v3087_v46 = vpop.f32.mrb[27].mxu0 }
 0x1ba   :  { %3121 = vmatmul.mubr.f32.vlgmr.msra.gmra.mrb[24].mxu1 %v2349_v45 }
 0x28d   :  { %v2439_v49 = vpop.f32.mrb[24].mxu1 }
 0x28e   :  { %v2440_v50 = vadd.f32 %v2766_v48, %v2439_v49  ;;  %v3122_v52 = vpop.f32.mrb[25].mxu1 }
 0x290   :  { %v2443_v53 = vmax.f32 %v2440_v50, 0.0 }
 0x292   :  { %3138 = vmatmul.mubr.msk.f32.vlgmr.msra.gmra.mrb[28].mxu0 %vm2458_vm2, %v2443_v53 }
 0x365   :  { %v2532_v55 = vpop.f32.mrb[28].mxu0 }
 0x366   :  { %v2533_v56 = vadd.f32 %v2767_v54, %v2532_v55  ;;  %v3139_v57 = vpop.f32.mrb[29].mxu0 }
 0x368   :  { %v2537_v58 = vsel %vm2536_vm3, %v2533_v56, -inf }
 0x369   :  { %2538 = vmax.xlane.f32.xlu0 %v2537_v58 }
 0x3f6   :  { %v2539_v59 = vpop.xlane.xlu0 %2538 }
 0x3f7   :  { %v2540_v60 = vsub.f32 %v2533_v56, %v2539_v59 }
 0x3f9   :  { %v2541_v61 = vmul.f32 1.442695, %v2540_v60 }
 0x3fb   :  { %3381 = vpow2.f32 %v2541_v61 }
 0x405   :  { %v3382_v62 = vpop.eup %3381 }
 0x406   :  { %v2543_v63 = vsel %vm2536_vm3, %v3382_v62, 0.0 }
 0x407   :  { %2544 = vadd.xlane.f32.xlu0 %v2543_v63 }
 0x494   :  { %v2545_v0 = vpop.xlane.xlu0 %2544 }
 0x495   :  { %3383 = vlog2.f32 %v2545_v0 }
 0x49f   :  { %v3384_v1 = vpop.eup %3383 }
 0x4a0   :  { %v2547_v2 = vmul.f32 0.6931472, %v3384_v1 }
 0x4a2   :  { %v2548_v3 = vsub.f32 %v2540_v60, %v2547_v2 }
 0x4a4   :  { %2549 = vst.msk [vmem:[#allocation2] sm:$0x3] %vm2536_vm3, %v2548_v3 }
 0x4a5   :  { %3396 = shalt.err (!%p3393_p4)
}
 0x4a6   :  { %s3397_s19 = scalar_lea.hbm %s4217_s7, 32 }
 0x4a7   :  { %p3398_p5 = scmp.ne.s32.totalorder %s4217_s7, %s3397_s19  ;;  %p3401_p6 = scmp.lt.u32.totalorder %s3397_s19, %s4217_s7 }
 0x4a9   :  { %p3403_p7 = pnand %p3401_p6, %p3398_p5 }
 0x4ab   :  { %3406 = shalt.err (!%p3403_p7)
}
 0x4ac   :  { %2559 = dma.vmem_to_hbm [thread:$0]  %s2557_s5, 32, %s4217_s7, [#allocation3]  }
 0x4ad   :  { %3407 = dma.done.wait [#allocation3], 32  }
 0x4ae   :  { %3408 = vsyncadd [#allocation3], 4294967264 }
 0x4af   :  { %2563 = vsyncpa [#allocation3], 1 }

</bundles_post_ra>
